<compile_context>
chip_gen: v7x
topology: tpu7x:2x2x1
jax: 0.10.0
libtpu: 0.0.40
codegen_flags: <defaults>
</compile_context>

<pallas_src>
import jax
import jax.numpy as jnp
from jax.experimental import pallas as pl
from jax.experimental.pallas import tpu as pltpu

# layer sizes from the PyTorch module
IN_DIM = 52 * 2 + 16 * 4 + 4 * 4  # = 184
LAYER_DIMS = [IN_DIM, 256, 128, 64, 64, 64, 64, 64, 64, 64, 64, 52]
NUM_LAYERS = len(LAYER_DIMS) - 1  # 11 linear layers
OUT_DIM = LAYER_DIMS[-1]          # 52
OUT_PAD = 128                     # lane-dense padded output width
SUBLANE = 16                      # bf16 sublane packing -> keep tiles 16-aligned


def _round_up(n, m):
    return ((n + m - 1) // m) * m


def _mlp_kernel(x_ref, *refs):
    """Whole MLP for one batch tile. Weights (bf16) + biases (f32) are VMEM-resident."""
    w_refs = refs[:NUM_LAYERS]
    b_refs = refs[NUM_LAYERS:2 * NUM_LAYERS]
    o_ref = refs[2 * NUM_LAYERS]

    h = x_ref[...]                                  # already bf16 from the wrapper
    for li in range(NUM_LAYERS):
        w = w_refs[li][...]                         # bf16 (MXU path)
        b = b_refs[li][...]                         # f32 (1, out)
        acc = jnp.dot(h, w, preferred_element_type=jnp.float32) + b
        if li < NUM_LAYERS - 1:
            h = jnp.maximum(acc, 0.0).astype(jnp.bfloat16)
        else:
            h = acc                                 # final layer: f32 acc, padded to 128 cols
    o_ref[...] = h.astype(o_ref.dtype)              # bf16 lane-dense (TB, 128) store


def _choose_tb(B, block_b):
    """Batch tile: <= block_b, 16-aligned, and capped so the grid has >=2 steps
    when possible (keeps both v7x TensorCores busy via the 'parallel' axis)."""
    B16 = _round_up(max(B, 1), SUBLANE)
    TB = _round_up(min(block_b, B16), SUBLANE)
    if B16 >= 2 * SUBLANE:
        TB = min(TB, _round_up((B16 + 1) // 2, SUBLANE))
    return max(TB, SUBLANE)


def _build_call(TB, B_pad, w_shapes, b_shapes, use_buffered):
    grid = (B_pad // TB,)
    const_kwargs = dict(pipeline_mode=pl.Buffered(1)) if use_buffered else {}

    in_specs = [pl.BlockSpec((TB, IN_DIM), lambda i: (i, 0))]
    # constant index_maps: weights/biases DMA'd once, stay VMEM-resident across steps
    in_specs += [pl.BlockSpec(s, lambda i: (0, 0), **const_kwargs) for s in w_shapes]
    in_specs += [pl.BlockSpec(s, lambda i: (0, 0), **const_kwargs) for s in b_shapes]

    vmem_limit = (32 << 20) if TB > 512 else (16 << 20)

    return pl.pallas_call(
        _mlp_kernel,
        out_shape=jax.ShapeDtypeStruct((B_pad, OUT_PAD), jnp.bfloat16),
        grid=grid,
        in_specs=in_specs,
        out_specs=pl.BlockSpec((TB, OUT_PAD), lambda i: (i, 0)),
        compiler_params=pltpu.CompilerParams(
            dimension_semantics=("parallel",),
            vmem_limit_bytes=vmem_limit,
        ),
    )


def nn_first_forward(x, weights_bf16, biases_f32, *, block_b=2048):
    """x: [B, 184] (any float dtype). weights_bf16[i]: [in_i, out_i] bf16 (last padded
    to 128 cols). biases_f32[i]: [1, out_i] f32 (last padded to 128 cols).
    Returns [B, 52] f32."""
    B = x.shape[0]
    TB = _choose_tb(B, block_b)
    B_pad = _round_up(B, TB)

    x = x.astype(jnp.bfloat16)                      # halve input HBM traffic
    if B_pad != B:
        x = jnp.pad(x, ((0, B_pad - B), (0, 0)))

    w_shapes = [w.shape for w in weights_bf16]
    b_shapes = [b.shape for b in biases_f32]

    try:
        call = _build_call(TB, B_pad, w_shapes, b_shapes, use_buffered=True)
        out = call(x, *weights_bf16, *biases_f32)
    except Exception:
        # pipeline_mode=pl.Buffered(1) not supported by this JAX: use default specs.
        call = _build_call(TB, B_pad, w_shapes, b_shapes, use_buffered=False)
        out = call(x, *weights_bf16, *biases_f32)

    # padded batch rows / padded output columns are sliced off here (do not remove)
    return out[:B, :OUT_DIM].astype(jnp.float32)


def init_params(key):
    """Deterministic PyTorch-style init: U(-1/sqrt(fan_in), 1/sqrt(fan_in)). f32 masters."""
    weights, biases = [], []
    for li in range(NUM_LAYERS):
        fan_in, fan_out = LAYER_DIMS[li], LAYER_DIMS[li + 1]
        key, kw, kb = jax.random.split(key, 3)
        bound = 1.0 / (fan_in ** 0.5)
        w = jax.random.uniform(kw, (fan_in, fan_out), jnp.float32, -bound, bound)
        b = jax.random.uniform(kb, (1, fan_out), jnp.float32, -bound, bound)
        weights.append(w)
        biases.append(b)
    return weights, biases


def pack_params(weights_f32, biases_f32):
    """Cast weights to bf16 and zero-pad the last layer to OUT_PAD lane-dense columns."""
    w_bf16 = [w.astype(jnp.bfloat16) for w in weights_f32]
    b_f32 = [b for b in biases_f32]
    pad_cols = OUT_PAD - OUT_DIM
    w_bf16[-1] = jnp.pad(w_bf16[-1], ((0, 0), (0, pad_cols)))
    b_f32[-1] = jnp.pad(b_f32[-1], ((0, 0), (0, pad_cols)))
    return w_bf16, b_f32


def reference_forward_bf16(x, weights_f32, biases_f32):
    """Pure-JAX reference following the same bf16-matmul / f32-accumulate recipe."""
    h = x.astype(jnp.bfloat16)
    for li in range(NUM_LAYERS):
        w = weights_f32[li].astype(jnp.bfloat16)
        b = biases_f32[li]
        acc = jnp.dot(h, w, preferred_element_type=jnp.float32) + b
        if li < NUM_LAYERS - 1:
            h = jnp.maximum(acc, 0.0).astype(jnp.bfloat16)
        else:
            h = acc
    return h


if __name__ == "__main__":
    key = jax.random.PRNGKey(0)
    key, kx = jax.random.split(key)

    # small batch; default block_b still yields a 2-step grid (TB capped at ~B/2)
    # plus tail padding (40 -> 64), exercising the pipelined path.
    B = 40
    x = jax.random.normal(kx, (B, IN_DIM), jnp.float32)

    weights_f32, biases_f32 = init_params(key)
    weights_bf16, biases_packed = pack_params(weights_f32, biases_f32)

    out = nn_first_forward(x, weights_bf16, biases_packed)
    out = jax.block_until_ready(out)

    ref = reference_forward_bf16(x, weights_f32, biases_f32)
    assert out.shape == (B, OUT_DIM)
    # kernel output passes through one extra f32->bf16 round on the last layer
    assert jnp.allclose(out, ref, atol=2e-2, rtol=2e-2), "mismatch vs bf16 reference"

    print("KERNEL_OK")
</pallas_src>

<mosaic_0001>
module attributes {stable_mosaic.version = 11 : i64} {
  func.func @_mlp_kernel(%arg0: i32, %arg1: memref<32x184xbf16, #tpu.memory_space<vmem>>, %arg2: memref<184x256xbf16, #tpu.memory_space<vmem>>, %arg3: memref<256x128xbf16, #tpu.memory_space<vmem>>, %arg4: memref<128x64xbf16, #tpu.memory_space<vmem>>, %arg5: memref<64x64xbf16, #tpu.memory_space<vmem>>, %arg6: memref<64x64xbf16, #tpu.memory_space<vmem>>, %arg7: memref<64x64xbf16, #tpu.memory_space<vmem>>, %arg8: memref<64x64xbf16, #tpu.memory_space<vmem>>, %arg9: memref<64x64xbf16, #tpu.memory_space<vmem>>, %arg10: memref<64x64xbf16, #tpu.memory_space<vmem>>, %arg11: memref<64x64xbf16, #tpu.memory_space<vmem>>, %arg12: memref<64x128xbf16, #tpu.memory_space<vmem>>, %arg13: memref<1x256xf32, #tpu.memory_space<vmem>>, %arg14: memref<1x128xf32, #tpu.memory_space<vmem>>, %arg15: memref<1x64xf32, #tpu.memory_space<vmem>>, %arg16: memref<1x64xf32, #tpu.memory_space<vmem>>, %arg17: memref<1x64xf32, #tpu.memory_space<vmem>>, %arg18: memref<1x64xf32, #tpu.memory_space<vmem>>, %arg19: memref<1x64xf32, #tpu.memory_space<vmem>>, %arg20: memref<1x64xf32, #tpu.memory_space<vmem>>, %arg21: memref<1x64xf32, #tpu.memory_space<vmem>>, %arg22: memref<1x64xf32, #tpu.memory_space<vmem>>, %arg23: memref<1x128xf32, #tpu.memory_space<vmem>>, %arg24: memref<32x128xbf16, #tpu.memory_space<vmem>>) attributes {dimension_semantics = [#tpu.dimension_semantics<parallel>], iteration_bounds = array<i64: 2>, scalar_prefetch = 0 : i64, scratch_operands = 0 : i64, tpu.core_type = #tpu.core_type<tc>, window_params = [{transform_indices = @transform_0, window_bounds = array<i64: 32, 184>}, {pipeline_mode = #tpu.pipeline_mode<synchronous>, transform_indices = @transform_1, window_bounds = array<i64: 184, 256>}, {pipeline_mode = #tpu.pipeline_mode<synchronous>, transform_indices = @transform_2, window_bounds = array<i64: 256, 128>}, {pipeline_mode = #tpu.pipeline_mode<synchronous>, transform_indices = @transform_3, window_bounds = array<i64: 128, 64>}, {pipeline_mode = #tpu.pipeline_mode<synchronous>, transform_indices = @transform_4, window_bounds = array<i64: 64, 64>}, {pipeline_mode = #tpu.pipeline_mode<synchronous>, transform_indices = @transform_5, window_bounds = array<i64: 64, 64>}, {pipeline_mode = #tpu.pipeline_mode<synchronous>, transform_indices = @transform_6, window_bounds = array<i64: 64, 64>}, {pipeline_mode = #tpu.pipeline_mode<synchronous>, transform_indices = @transform_7, window_bounds = array<i64: 64, 64>}, {pipeline_mode = #tpu.pipeline_mode<synchronous>, transform_indices = @transform_8, window_bounds = array<i64: 64, 64>}, {pipeline_mode = #tpu.pipeline_mode<synchronous>, transform_indices = @transform_9, window_bounds = array<i64: 64, 64>}, {pipeline_mode = #tpu.pipeline_mode<synchronous>, transform_indices = @transform_10, window_bounds = array<i64: 64, 64>}, {pipeline_mode = #tpu.pipeline_mode<synchronous>, transform_indices = @transform_11, window_bounds = array<i64: 64, 128>}, {pipeline_mode = #tpu.pipeline_mode<synchronous>, transform_indices = @transform_12, window_bounds = array<i64: 1, 256>}, {pipeline_mode = #tpu.pipeline_mode<synchronous>, transform_indices = @transform_13, window_bounds = array<i64: 1, 128>}, {pipeline_mode = #tpu.pipeline_mode<synchronous>, transform_indices = @transform_14, window_bounds = array<i64: 1, 64>}, {pipeline_mode = #tpu.pipeline_mode<synchronous>, transform_indices = @transform_15, window_bounds = array<i64: 1, 64>}, {pipeline_mode = #tpu.pipeline_mode<synchronous>, transform_indices = @transform_16, window_bounds = array<i64: 1, 64>}, {pipeline_mode = #tpu.pipeline_mode<synchronous>, transform_indices = @transform_17, window_bounds = array<i64: 1, 64>}, {pipeline_mode = #tpu.pipeline_mode<synchronous>, transform_indices = @transform_18, window_bounds = array<i64: 1, 64>}, {pipeline_mode = #tpu.pipeline_mode<synchronous>, transform_indices = @transform_19, window_bounds = array<i64: 1, 64>}, {pipeline_mode = #tpu.pipeline_mode<synchronous>, transform_indices = @transform_20, window_bounds = array<i64: 1, 64>}, {pipeline_mode = #tpu.pipeline_mode<synchronous>, transform_indices = @transform_21, window_bounds = array<i64: 1, 64>}, {pipeline_mode = #tpu.pipeline_mode<synchronous>, transform_indices = @transform_22, window_bounds = array<i64: 1, 128>}, {transform_indices = @transform_23, window_bounds = array<i64: 32, 128>}]} {
    %c0 = arith.constant 0 : index
    %c0_0 = arith.constant 0 : index
    %0 = vector.load %arg1[%c0, %c0_0] : memref<32x184xbf16, #tpu.memory_space<vmem>>, vector<32x184xbf16>
    %c0_1 = arith.constant 0 : index
    %c0_2 = arith.constant 0 : index
    %1 = vector.load %arg2[%c0_1, %c0_2] : memref<184x256xbf16, #tpu.memory_space<vmem>>, vector<184x256xbf16>
    %c0_3 = arith.constant 0 : index
    %c0_4 = arith.constant 0 : index
    %2 = vector.load %arg13[%c0_3, %c0_4] : memref<1x256xf32, #tpu.memory_space<vmem>>, vector<1x256xf32>
    %cst = arith.constant dense<0.000000e+00> : vector<32x256xf32>
    %3 = tpu.matmul %0, %1, %cst {dimension_numbers = #tpu.dot_dimension_numbers<[1], [0], [0], [1], [0, 0, 1, 1], [], []>} : vector<32x184xbf16>, vector<184x256xbf16>, vector<32x256xf32> -> vector<32x256xf32>
    %4 = vector.broadcast %2 : vector<1x256xf32> to vector<32x256xf32>
    %5 = arith.addf %3, %4 : vector<32x256xf32>
    %cst_5 = arith.constant 0.000000e+00 : f32
    %6 = vector.broadcast %cst_5 : f32 to vector<32x256xf32>
    %7 = arith.maximumf %5, %6 : vector<32x256xf32>
    %8 = arith.truncf %7 : vector<32x256xf32> to vector<32x256xbf16>
    %c0_6 = arith.constant 0 : index
    %c0_7 = arith.constant 0 : index
    %9 = vector.load %arg3[%c0_6, %c0_7] : memref<256x128xbf16, #tpu.memory_space<vmem>>, vector<256x128xbf16>
    %c0_8 = arith.constant 0 : index
    %c0_9 = arith.constant 0 : index
    %10 = vector.load %arg14[%c0_8, %c0_9] : memref<1x128xf32, #tpu.memory_space<vmem>>, vector<1x128xf32>
    %cst_10 = arith.constant dense<0.000000e+00> : vector<32x128xf32>
    %11 = tpu.matmul %8, %9, %cst_10 {dimension_numbers = #tpu.dot_dimension_numbers<[1], [0], [0], [1], [0, 0, 1, 1], [], []>} : vector<32x256xbf16>, vector<256x128xbf16>, vector<32x128xf32> -> vector<32x128xf32>
    %12 = vector.broadcast %10 : vector<1x128xf32> to vector<32x128xf32>
    %13 = arith.addf %11, %12 : vector<32x128xf32>
    %cst_11 = arith.constant 0.000000e+00 : f32
    %14 = vector.broadcast %cst_11 : f32 to vector<32x128xf32>
    %15 = arith.maximumf %13, %14 : vector<32x128xf32>
    %16 = arith.truncf %15 : vector<32x128xf32> to vector<32x128xbf16>
    %c0_12 = arith.constant 0 : index
    %c0_13 = arith.constant 0 : index
    %17 = vector.load %arg4[%c0_12, %c0_13] : memref<128x64xbf16, #tpu.memory_space<vmem>>, vector<128x64xbf16>
    %c0_14 = arith.constant 0 : index
    %c0_15 = arith.constant 0 : index
    %18 = vector.load %arg15[%c0_14, %c0_15] : memref<1x64xf32, #tpu.memory_space<vmem>>, vector<1x64xf32>
    %cst_16 = arith.constant dense<0.000000e+00> : vector<32x64xf32>
    %19 = tpu.matmul %16, %17, %cst_16 {dimension_numbers = #tpu.dot_dimension_numbers<[1], [0], [0], [1], [0, 0, 1, 1], [], []>} : vector<32x128xbf16>, vector<128x64xbf16>, vector<32x64xf32> -> vector<32x64xf32>
    %20 = vector.broadcast %18 : vector<1x64xf32> to vector<32x64xf32>
    %21 = arith.addf %19, %20 : vector<32x64xf32>
    %cst_17 = arith.constant 0.000000e+00 : f32
    %22 = vector.broadcast %cst_17 : f32 to vector<32x64xf32>
    %23 = arith.maximumf %21, %22 : vector<32x64xf32>
    %24 = arith.truncf %23 : vector<32x64xf32> to vector<32x64xbf16>
    %c0_18 = arith.constant 0 : index
    %c0_19 = arith.constant 0 : index
    %25 = vector.load %arg5[%c0_18, %c0_19] : memref<64x64xbf16, #tpu.memory_space<vmem>>, vector<64x64xbf16>
    %c0_20 = arith.constant 0 : index
    %c0_21 = arith.constant 0 : index
    %26 = vector.load %arg16[%c0_20, %c0_21] : memref<1x64xf32, #tpu.memory_space<vmem>>, vector<1x64xf32>
    %cst_22 = arith.constant dense<0.000000e+00> : vector<32x64xf32>
    %27 = tpu.matmul %24, %25, %cst_22 {dimension_numbers = #tpu.dot_dimension_numbers<[1], [0], [0], [1], [0, 0, 1, 1], [], []>} : vector<32x64xbf16>, vector<64x64xbf16>, vector<32x64xf32> -> vector<32x64xf32>
    %28 = vector.broadcast %26 : vector<1x64xf32> to vector<32x64xf32>
    %29 = arith.addf %27, %28 : vector<32x64xf32>
    %cst_23 = arith.constant 0.000000e+00 : f32
    %30 = vector.broadcast %cst_23 : f32 to vector<32x64xf32>
    %31 = arith.maximumf %29, %30 : vector<32x64xf32>
    %32 = arith.truncf %31 : vector<32x64xf32> to vector<32x64xbf16>
    %c0_24 = arith.constant 0 : index
    %c0_25 = arith.constant 0 : index
    %33 = vector.load %arg6[%c0_24, %c0_25] : memref<64x64xbf16, #tpu.memory_space<vmem>>, vector<64x64xbf16>
    %c0_26 = arith.constant 0 : index
    %c0_27 = arith.constant 0 : index
    %34 = vector.load %arg17[%c0_26, %c0_27] : memref<1x64xf32, #tpu.memory_space<vmem>>, vector<1x64xf32>
    %cst_28 = arith.constant dense<0.000000e+00> : vector<32x64xf32>
    %35 = tpu.matmul %32, %33, %cst_28 {dimension_numbers = #tpu.dot_dimension_numbers<[1], [0], [0], [1], [0, 0, 1, 1], [], []>} : vector<32x64xbf16>, vector<64x64xbf16>, vector<32x64xf32> -> vector<32x64xf32>
    %36 = vector.broadcast %34 : vector<1x64xf32> to vector<32x64xf32>
    %37 = arith.addf %35, %36 : vector<32x64xf32>
    %cst_29 = arith.constant 0.000000e+00 : f32
    %38 = vector.broadcast %cst_29 : f32 to vector<32x64xf32>
    %39 = arith.maximumf %37, %38 : vector<32x64xf32>
    %40 = arith.truncf %39 : vector<32x64xf32> to vector<32x64xbf16>
    %c0_30 = arith.constant 0 : index
    %c0_31 = arith.constant 0 : index
    %41 = vector.load %arg7[%c0_30, %c0_31] : memref<64x64xbf16, #tpu.memory_space<vmem>>, vector<64x64xbf16>
    %c0_32 = arith.constant 0 : index
    %c0_33 = arith.constant 0 : index
    %42 = vector.load %arg18[%c0_32, %c0_33] : memref<1x64xf32, #tpu.memory_space<vmem>>, vector<1x64xf32>
    %cst_34 = arith.constant dense<0.000000e+00> : vector<32x64xf32>
    %43 = tpu.matmul %40, %41, %cst_34 {dimension_numbers = #tpu.dot_dimension_numbers<[1], [0], [0], [1], [0, 0, 1, 1], [], []>} : vector<32x64xbf16>, vector<64x64xbf16>, vector<32x64xf32> -> vector<32x64xf32>
    %44 = vector.broadcast %42 : vector<1x64xf32> to vector<32x64xf32>
    %45 = arith.addf %43, %44 : vector<32x64xf32>
    %cst_35 = arith.constant 0.000000e+00 : f32
    %46 = vector.broadcast %cst_35 : f32 to vector<32x64xf32>
    %47 = arith.maximumf %45, %46 : vector<32x64xf32>
    %48 = arith.truncf %47 : vector<32x64xf32> to vector<32x64xbf16>
    %c0_36 = arith.constant 0 : index
    %c0_37 = arith.constant 0 : index
    %49 = vector.load %arg8[%c0_36, %c0_37] : memref<64x64xbf16, #tpu.memory_space<vmem>>, vector<64x64xbf16>
    %c0_38 = arith.constant 0 : index
    %c0_39 = arith.constant 0 : index
    %50 = vector.load %arg19[%c0_38, %c0_39] : memref<1x64xf32, #tpu.memory_space<vmem>>, vector<1x64xf32>
    %cst_40 = arith.constant dense<0.000000e+00> : vector<32x64xf32>
    %51 = tpu.matmul %48, %49, %cst_40 {dimension_numbers = #tpu.dot_dimension_numbers<[1], [0], [0], [1], [0, 0, 1, 1], [], []>} : vector<32x64xbf16>, vector<64x64xbf16>, vector<32x64xf32> -> vector<32x64xf32>
    %52 = vector.broadcast %50 : vector<1x64xf32> to vector<32x64xf32>
    %53 = arith.addf %51, %52 : vector<32x64xf32>
    %cst_41 = arith.constant 0.000000e+00 : f32
    %54 = vector.broadcast %cst_41 : f32 to vector<32x64xf32>
    %55 = arith.maximumf %53, %54 : vector<32x64xf32>
    %56 = arith.truncf %55 : vector<32x64xf32> to vector<32x64xbf16>
    %c0_42 = arith.constant 0 : index
    %c0_43 = arith.constant 0 : index
    %57 = vector.load %arg9[%c0_42, %c0_43] : memref<64x64xbf16, #tpu.memory_space<vmem>>, vector<64x64xbf16>
    %c0_44 = arith.constant 0 : index
    %c0_45 = arith.constant 0 : index
    %58 = vector.load %arg20[%c0_44, %c0_45] : memref<1x64xf32, #tpu.memory_space<vmem>>, vector<1x64xf32>
    %cst_46 = arith.constant dense<0.000000e+00> : vector<32x64xf32>
    %59 = tpu.matmul %56, %57, %cst_46 {dimension_numbers = #tpu.dot_dimension_numbers<[1], [0], [0], [1], [0, 0, 1, 1], [], []>} : vector<32x64xbf16>, vector<64x64xbf16>, vector<32x64xf32> -> vector<32x64xf32>
    %60 = vector.broadcast %58 : vector<1x64xf32> to vector<32x64xf32>
    %61 = arith.addf %59, %60 : vector<32x64xf32>
    %cst_47 = arith.constant 0.000000e+00 : f32
    %62 = vector.broadcast %cst_47 : f32 to vector<32x64xf32>
    %63 = arith.maximumf %61, %62 : vector<32x64xf32>
    %64 = arith.truncf %63 : vector<32x64xf32> to vector<32x64xbf16>
    %c0_48 = arith.constant 0 : index
    %c0_49 = arith.constant 0 : index
    %65 = vector.load %arg10[%c0_48, %c0_49] : memref<64x64xbf16, #tpu.memory_space<vmem>>, vector<64x64xbf16>
    %c0_50 = arith.constant 0 : index
    %c0_51 = arith.constant 0 : index
    %66 = vector.load %arg21[%c0_50, %c0_51] : memref<1x64xf32, #tpu.memory_space<vmem>>, vector<1x64xf32>
    %cst_52 = arith.constant dense<0.000000e+00> : vector<32x64xf32>
    %67 = tpu.matmul %64, %65, %cst_52 {dimension_numbers = #tpu.dot_dimension_numbers<[1], [0], [0], [1], [0, 0, 1, 1], [], []>} : vector<32x64xbf16>, vector<64x64xbf16>, vector<32x64xf32> -> vector<32x64xf32>
    %68 = vector.broadcast %66 : vector<1x64xf32> to vector<32x64xf32>
    %69 = arith.addf %67, %68 : vector<32x64xf32>
    %cst_53 = arith.constant 0.000000e+00 : f32
    %70 = vector.broadcast %cst_53 : f32 to vector<32x64xf32>
    %71 = arith.maximumf %69, %70 : vector<32x64xf32>
    %72 = arith.truncf %71 : vector<32x64xf32> to vector<32x64xbf16>
    %c0_54 = arith.constant 0 : index
    %c0_55 = arith.constant 0 : index
    %73 = vector.load %arg11[%c0_54, %c0_55] : memref<64x64xbf16, #tpu.memory_space<vmem>>, vector<64x64xbf16>
    %c0_56 = arith.constant 0 : index
    %c0_57 = arith.constant 0 : index
    %74 = vector.load %arg22[%c0_56, %c0_57] : memref<1x64xf32, #tpu.memory_space<vmem>>, vector<1x64xf32>
    %cst_58 = arith.constant dense<0.000000e+00> : vector<32x64xf32>
    %75 = tpu.matmul %72, %73, %cst_58 {dimension_numbers = #tpu.dot_dimension_numbers<[1], [0], [0], [1], [0, 0, 1, 1], [], []>} : vector<32x64xbf16>, vector<64x64xbf16>, vector<32x64xf32> -> vector<32x64xf32>
    %76 = vector.broadcast %74 : vector<1x64xf32> to vector<32x64xf32>
    %77 = arith.addf %75, %76 : vector<32x64xf32>
    %cst_59 = arith.constant 0.000000e+00 : f32
    %78 = vector.broadcast %cst_59 : f32 to vector<32x64xf32>
    %79 = arith.maximumf %77, %78 : vector<32x64xf32>
    %80 = arith.truncf %79 : vector<32x64xf32> to vector<32x64xbf16>
    %c0_60 = arith.constant 0 : index
    %c0_61 = arith.constant 0 : index
    %81 = vector.load %arg12[%c0_60, %c0_61] : memref<64x128xbf16, #tpu.memory_space<vmem>>, vector<64x128xbf16>
    %c0_62 = arith.constant 0 : index
    %c0_63 = arith.constant 0 : index
    %82 = vector.load %arg23[%c0_62, %c0_63] : memref<1x128xf32, #tpu.memory_space<vmem>>, vector<1x128xf32>
    %cst_64 = arith.constant dense<0.000000e+00> : vector<32x128xf32>
    %83 = tpu.matmul %80, %81, %cst_64 {dimension_numbers = #tpu.dot_dimension_numbers<[1], [0], [0], [1], [0, 0, 1, 1], [], []>} : vector<32x64xbf16>, vector<64x128xbf16>, vector<32x128xf32> -> vector<32x128xf32>
    %84 = vector.broadcast %82 : vector<1x128xf32> to vector<32x128xf32>
    %85 = arith.addf %83, %84 : vector<32x128xf32>
    %86 = arith.truncf %85 : vector<32x128xf32> to vector<32x128xbf16>
    %c0_65 = arith.constant 0 : index
    %c0_66 = arith.constant 0 : index
    %87 = vector.load %arg24[%c0_65, %c0_66] : memref<32x128xbf16, #tpu.memory_space<vmem>>, vector<32x128xbf16>
    tpu.vector_store %arg24[%c0_65, %c0_66], %86 {strides = array<i32>} : memref<32x128xbf16, #tpu.memory_space<vmem>>, vector<32x128xbf16>,
    return
  }
  func.func @transform_0(%arg0: i32) -> (i32, i32) {
    %c0_i32 = arith.constant 0 : i32
    %c0_i32_0 = arith.constant 0 : i32
    return %arg0, %c0_i32 : i32, i32
  }
  func.func @transform_1(%arg0: i32) -> (i32, i32) {
    %c0_i32 = arith.constant 0 : i32
    %c0_i32_0 = arith.constant 0 : i32
    %c0_i32_1 = arith.constant 0 : i32
    return %c0_i32, %c0_i32_0 : i32, i32
  }
  func.func @transform_2(%arg0: i32) -> (i32, i32) {
    %c0_i32 = arith.constant 0 : i32
    %c0_i32_0 = arith.constant 0 : i32
    %c0_i32_1 = arith.constant 0 : i32
    return %c0_i32, %c0_i32_0 : i32, i32
  }
  func.func @transform_3(%arg0: i32) -> (i32, i32) {
    %c0_i32 = arith.constant 0 : i32
    %c0_i32_0 = arith.constant 0 : i32
    %c0_i32_1 = arith.constant 0 : i32
    return %c0_i32, %c0_i32_0 : i32, i32
  }
  func.func @transform_4(%arg0: i32) -> (i32, i32) {
    %c0_i32 = arith.constant 0 : i32
    %c0_i32_0 = arith.constant 0 : i32
    %c0_i32_1 = arith.constant 0 : i32
    return %c0_i32, %c0_i32_0 : i32, i32
  }
  func.func @transform_5(%arg0: i32) -> (i32, i32) {
    %c0_i32 = arith.constant 0 : i32
    %c0_i32_0 = arith.constant 0 : i32
    %c0_i32_1 = arith.constant 0 : i32
    return %c0_i32, %c0_i32_0 : i32, i32
  }
  func.func @transform_6(%arg0: i32) -> (i32, i32) {
    %c0_i32 = arith.constant 0 : i32
    %c0_i32_0 = arith.constant 0 : i32
    %c0_i32_1 = arith.constant 0 : i32
    return %c0_i32, %c0_i32_0 : i32, i32
  }
  func.func @transform_7(%arg0: i32) -> (i32, i32) {
    %c0_i32 = arith.constant 0 : i32
    %c0_i32_0 = arith.constant 0 : i32
    %c0_i32_1 = arith.constant 0 : i32
    return %c0_i32, %c0_i32_0 : i32, i32
  }
  func.func @transform_8(%arg0: i32) -> (i32, i32) {
    %c0_i32 = arith.constant 0 : i32
    %c0_i32_0 = arith.constant 0 : i32
    %c0_i32_1 = arith.constant 0 : i32
    return %c0_i32, %c0_i32_0 : i32, i32
  }
  func.func @transform_9(%arg0: i32) -> (i32, i32) {
    %c0_i32 = arith.constant 0 : i32
    %c0_i32_0 = arith.constant 0 : i32
    %c0_i32_1 = arith.constant 0 : i32
    return %c0_i32, %c0_i32_0 : i32, i32
  }
  func.func @transform_10(%arg0: i32) -> (i32, i32) {
    %c0_i32 = arith.constant 0 : i32
    %c0_i32_0 = arith.constant 0 : i32
    %c0_i32_1 = arith.constant 0 : i32
    return %c0_i32, %c0_i32_0 : i32, i32
  }
  func.func @transform_11(%arg0: i32) -> (i32, i32) {
    %c0_i32 = arith.constant 0 : i32
    %c0_i32_0 = arith.constant 0 : i32
    %c0_i32_1 = arith.constant 0 : i32
    return %c0_i32, %c0_i32_0 : i32, i32
  }
  func.func @transform_12(%arg0: i32) -> (i32, i32) {
    %c0_i32 = arith.constant 0 : i32
    %c0_i32_0 = arith.constant 0 : i32
    %c0_i32_1 = arith.constant 0 : i32
    return %c0_i32, %c0_i32_0 : i32, i32
  }
  func.func @transform_13(%arg0: i32) -> (i32, i32) {
    %c0_i32 = arith.constant 0 : i32
    %c0_i32_0 = arith.constant 0 : i32
    %c0_i32_1 = arith.constant 0 : i32
    return %c0_i32, %c0_i32_0 : i32, i32
  }
  func.func @transform_14(%arg0: i32) -> (i32, i32) {
    %c0_i32 = arith.constant 0 : i32
    %c0_i32_0 = arith.constant 0 : i32
    %c0_i32_1 = arith.constant 0 : i32
    return %c0_i32, %c0_i32_0 : i32, i32
  }
  func.func @transform_15(%arg0: i32) -> (i32, i32) {
    %c0_i32 = arith.constant 0 : i32
    %c0_i32_0 = arith.constant 0 : i32
    %c0_i32_1 = arith.constant 0 : i32
    return %c0_i32, %c0_i32_0 : i32, i32
  }
  func.func @transform_16(%arg0: i32) -> (i32, i32) {
    %c0_i32 = arith.constant 0 : i32
    %c0_i32_0 = arith.constant 0 : i32
    %c0_i32_1 = arith.constant 0 : i32
    return %c0_i32, %c0_i32_0 : i32, i32
  }
  func.func @transform_17(%arg0: i32) -> (i32, i32) {
    %c0_i32 = arith.constant 0 : i32
    %c0_i32_0 = arith.constant 0 : i32
    %c0_i32_1 = arith.constant 0 : i32
    return %c0_i32, %c0_i32_0 : i32, i32
  }
  func.func @transform_18(%arg0: i32) -> (i32, i32) {
    %c0_i32 = arith.constant 0 : i32
    %c0_i32_0 = arith.constant 0 : i32
    %c0_i32_1 = arith.constant 0 : i32
    return %c0_i32, %c0_i32_0 : i32, i32
  }
  func.func @transform_19(%arg0: i32) -> (i32, i32) {
    %c0_i32 = arith.constant 0 : i32
    %c0_i32_0 = arith.constant 0 : i32
    %c0_i32_1 = arith.constant 0 : i32
    return %c0_i32, %c0_i32_0 : i32, i32
  }
  func.func @transform_20(%arg0: i32) -> (i32, i32) {
    %c0_i32 = arith.constant 0 : i32
    %c0_i32_0 = arith.constant 0 : i32
    %c0_i32_1 = arith.constant 0 : i32
    return %c0_i32, %c0_i32_0 : i32, i32
  }
  func.func @transform_21(%arg0: i32) -> (i32, i32) {
    %c0_i32 = arith.constant 0 : i32
    %c0_i32_0 = arith.constant 0 : i32
    %c0_i32_1 = arith.constant 0 : i32
    return %c0_i32, %c0_i32_0 : i32, i32
  }
  func.func @transform_22(%arg0: i32) -> (i32, i32) {
    %c0_i32 = arith.constant 0 : i32
    %c0_i32_0 = arith.constant 0 : i32
    %c0_i32_1 = arith.constant 0 : i32
    return %c0_i32, %c0_i32_0 : i32, i32
  }
  func.func @transform_23(%arg0: i32) -> (i32, i32) {
    %c0_i32 = arith.constant 0 : i32
    %c0_i32_0 = arith.constant 0 : i32
    return %arg0, %c0_i32 : i32, i32
  }
}

module attributes {stable_mosaic.version = 11 : i64} {
  func.func @_mlp_kernel(%arg0: i32, %arg1: memref<32x184xbf16, #tpu.memory_space<vmem>>, %arg2: memref<184x256xbf16, #tpu.memory_space<vmem>>, %arg3: memref<256x128xbf16, #tpu.memory_space<vmem>>, %arg4: memref<128x64xbf16, #tpu.memory_space<vmem>>, %arg5: memref<64x64xbf16, #tpu.memory_space<vmem>>, %arg6: memref<64x64xbf16, #tpu.memory_space<vmem>>, %arg7: memref<64x64xbf16, #tpu.memory_space<vmem>>, %arg8: memref<64x64xbf16, #tpu.memory_space<vmem>>, %arg9: memref<64x64xbf16, #tpu.memory_space<vmem>>, %arg10: memref<64x64xbf16, #tpu.memory_space<vmem>>, %arg11: memref<64x64xbf16, #tpu.memory_space<vmem>>, %arg12: memref<64x128xbf16, #tpu.memory_space<vmem>>, %arg13: memref<1x256xf32, #tpu.memory_space<vmem>>, %arg14: memref<1x128xf32, #tpu.memory_space<vmem>>, %arg15: memref<1x64xf32, #tpu.memory_space<vmem>>, %arg16: memref<1x64xf32, #tpu.memory_space<vmem>>, %arg17: memref<1x64xf32, #tpu.memory_space<vmem>>, %arg18: memref<1x64xf32, #tpu.memory_space<vmem>>, %arg19: memref<1x64xf32, #tpu.memory_space<vmem>>, %arg20: memref<1x64xf32, #tpu.memory_space<vmem>>, %arg21: memref<1x64xf32, #tpu.memory_space<vmem>>, %arg22: memref<1x64xf32, #tpu.memory_space<vmem>>, %arg23: memref<1x128xf32, #tpu.memory_space<vmem>>, %arg24: memref<32x128xbf16, #tpu.memory_space<vmem>>) attributes {dimension_semantics = [#tpu.dimension_semantics<parallel>], iteration_bounds = array<i64: 2>, scalar_prefetch = 0 : i64, scratch_operands = 0 : i64, tpu.core_type = #tpu.core_type<tc>, window_params = [{transform_indices = @transform_0, window_bounds = array<i64: 32, 184>}, {pipeline_mode = #tpu.pipeline_mode<synchronous>, transform_indices = @transform_1, window_bounds = array<i64: 184, 256>}, {pipeline_mode = #tpu.pipeline_mode<synchronous>, transform_indices = @transform_2, window_bounds = array<i64: 256, 128>}, {pipeline_mode = #tpu.pipeline_mode<synchronous>, transform_indices = @transform_3, window_bounds = array<i64: 128, 64>}, {pipeline_mode = #tpu.pipeline_mode<synchronous>, transform_indices = @transform_4, window_bounds = array<i64: 64, 64>}, {pipeline_mode = #tpu.pipeline_mode<synchronous>, transform_indices = @transform_5, window_bounds = array<i64: 64, 64>}, {pipeline_mode = #tpu.pipeline_mode<synchronous>, transform_indices = @transform_6, window_bounds = array<i64: 64, 64>}, {pipeline_mode = #tpu.pipeline_mode<synchronous>, transform_indices = @transform_7, window_bounds = array<i64: 64, 64>}, {pipeline_mode = #tpu.pipeline_mode<synchronous>, transform_indices = @transform_8, window_bounds = array<i64: 64, 64>}, {pipeline_mode = #tpu.pipeline_mode<synchronous>, transform_indices = @transform_9, window_bounds = array<i64: 64, 64>}, {pipeline_mode = #tpu.pipeline_mode<synchronous>, transform_indices = @transform_10, window_bounds = array<i64: 64, 64>}, {pipeline_mode = #tpu.pipeline_mode<synchronous>, transform_indices = @transform_11, window_bounds = array<i64: 64, 128>}, {pipeline_mode = #tpu.pipeline_mode<synchronous>, transform_indices = @transform_12, window_bounds = array<i64: 1, 256>}, {pipeline_mode = #tpu.pipeline_mode<synchronous>, transform_indices = @transform_13, window_bounds = array<i64: 1, 128>}, {pipeline_mode = #tpu.pipeline_mode<synchronous>, transform_indices = @transform_14, window_bounds = array<i64: 1, 64>}, {pipeline_mode = #tpu.pipeline_mode<synchronous>, transform_indices = @transform_15, window_bounds = array<i64: 1, 64>}, {pipeline_mode = #tpu.pipeline_mode<synchronous>, transform_indices = @transform_16, window_bounds = array<i64: 1, 64>}, {pipeline_mode = #tpu.pipeline_mode<synchronous>, transform_indices = @transform_17, window_bounds = array<i64: 1, 64>}, {pipeline_mode = #tpu.pipeline_mode<synchronous>, transform_indices = @transform_18, window_bounds = array<i64: 1, 64>}, {pipeline_mode = #tpu.pipeline_mode<synchronous>, transform_indices = @transform_19, window_bounds = array<i64: 1, 64>}, {pipeline_mode = #tpu.pipeline_mode<synchronous>, transform_indices = @transform_20, window_bounds = array<i64: 1, 64>}, {pipeline_mode = #tpu.pipeline_mode<synchronous>, transform_indices = @transform_21, window_bounds = array<i64: 1, 64>}, {pipeline_mode = #tpu.pipeline_mode<synchronous>, transform_indices = @transform_22, window_bounds = array<i64: 1, 128>}, {transform_indices = @transform_23, window_bounds = array<i64: 32, 128>}]} {
    %c0 = arith.constant 0 : index
    %c0_0 = arith.constant 0 : index
    %0 = vector.load %arg1[%c0, %c0_0] : memref<32x184xbf16, #tpu.memory_space<vmem>>, vector<32x184xbf16>
    %c0_1 = arith.constant 0 : index
    %c0_2 = arith.constant 0 : index
    %1 = vector.load %arg2[%c0_1, %c0_2] : memref<184x256xbf16, #tpu.memory_space<vmem>>, vector<184x256xbf16>
    %c0_3 = arith.constant 0 : index
    %c0_4 = arith.constant 0 : index
    %2 = vector.load %arg13[%c0_3, %c0_4] : memref<1x256xf32, #tpu.memory_space<vmem>>, vector<1x256xf32>
    %cst = arith.constant dense<0.000000e+00> : vector<32x256xf32>
    %3 = tpu.matmul %0, %1, %cst {dimension_numbers = #tpu.dot_dimension_numbers<[1], [0], [0], [1], [0, 0, 1, 1], [], []>} : vector<32x184xbf16>, vector<184x256xbf16>, vector<32x256xf32> -> vector<32x256xf32>
    %4 = vector.broadcast %2 : vector<1x256xf32> to vector<32x256xf32>
    %5 = arith.addf %3, %4 : vector<32x256xf32>
    %cst_5 = arith.constant 0.000000e+00 : f32
    %6 = vector.broadcast %cst_5 : f32 to vector<32x256xf32>
    %7 = arith.maximumf %5, %6 : vector<32x256xf32>
    %8 = arith.truncf %7 : vector<32x256xf32> to vector<32x256xbf16>
    %c0_6 = arith.constant 0 : index
    %c0_7 = arith.constant 0 : index
    %9 = vector.load %arg3[%c0_6, %c0_7] : memref<256x128xbf16, #tpu.memory_space<vmem>>, vector<256x128xbf16>
    %c0_8 = arith.constant 0 : index
    %c0_9 = arith.constant 0 : index
    %10 = vector.load %arg14[%c0_8, %c0_9] : memref<1x128xf32, #tpu.memory_space<vmem>>, vector<1x128xf32>
    %cst_10 = arith.constant dense<0.000000e+00> : vector<32x128xf32>
    %11 = tpu.matmul %8, %9, %cst_10 {dimension_numbers = #tpu.dot_dimension_numbers<[1], [0], [0], [1], [0, 0, 1, 1], [], []>} : vector<32x256xbf16>, vector<256x128xbf16>, vector<32x128xf32> -> vector<32x128xf32>
    %12 = vector.broadcast %10 : vector<1x128xf32> to vector<32x128xf32>
    %13 = arith.addf %11, %12 : vector<32x128xf32>
    %cst_11 = arith.constant 0.000000e+00 : f32
    %14 = vector.broadcast %cst_11 : f32 to vector<32x128xf32>
    %15 = arith.maximumf %13, %14 : vector<32x128xf32>
    %16 = arith.truncf %15 : vector<32x128xf32> to vector<32x128xbf16>
    %c0_12 = arith.constant 0 : index
    %c0_13 = arith.constant 0 : index
    %17 = vector.load %arg4[%c0_12, %c0_13] : memref<128x64xbf16, #tpu.memory_space<vmem>>, vector<128x64xbf16>
    %c0_14 = arith.constant 0 : index
    %c0_15 = arith.constant 0 : index
    %18 = vector.load %arg15[%c0_14, %c0_15] : memref<1x64xf32, #tpu.memory_space<vmem>>, vector<1x64xf32>
    %cst_16 = arith.constant dense<0.000000e+00> : vector<32x64xf32>
    %19 = tpu.matmul %16, %17, %cst_16 {dimension_numbers = #tpu.dot_dimension_numbers<[1], [0], [0], [1], [0, 0, 1, 1], [], []>} : vector<32x128xbf16>, vector<128x64xbf16>, vector<32x64xf32> -> vector<32x64xf32>
    %20 = vector.broadcast %18 : vector<1x64xf32> to vector<32x64xf32>
    %21 = arith.addf %19, %20 : vector<32x64xf32>
    %cst_17 = arith.constant 0.000000e+00 : f32
    %22 = vector.broadcast %cst_17 : f32 to vector<32x64xf32>
    %23 = arith.maximumf %21, %22 : vector<32x64xf32>
    %24 = arith.truncf %23 : vector<32x64xf32> to vector<32x64xbf16>
    %c0_18 = arith.constant 0 : index
    %c0_19 = arith.constant 0 : index
    %25 = vector.load %arg5[%c0_18, %c0_19] : memref<64x64xbf16, #tpu.memory_space<vmem>>, vector<64x64xbf16>
    %c0_20 = arith.constant 0 : index
    %c0_21 = arith.constant 0 : index
    %26 = vector.load %arg16[%c0_20, %c0_21] : memref<1x64xf32, #tpu.memory_space<vmem>>, vector<1x64xf32>
    %cst_22 = arith.constant dense<0.000000e+00> : vector<32x64xf32>
    %27 = tpu.matmul %24, %25, %cst_22 {dimension_numbers = #tpu.dot_dimension_numbers<[1], [0], [0], [1], [0, 0, 1, 1], [], []>} : vector<32x64xbf16>, vector<64x64xbf16>, vector<32x64xf32> -> vector<32x64xf32>
    %28 = vector.broadcast %26 : vector<1x64xf32> to vector<32x64xf32>
    %29 = arith.addf %27, %28 : vector<32x64xf32>
    %cst_23 = arith.constant 0.000000e+00 : f32
    %30 = vector.broadcast %cst_23 : f32 to vector<32x64xf32>
    %31 = arith.maximumf %29, %30 : vector<32x64xf32>
    %32 = arith.truncf %31 : vector<32x64xf32> to vector<32x64xbf16>
    %c0_24 = arith.constant 0 : index
    %c0_25 = arith.constant 0 : index
    %33 = vector.load %arg6[%c0_24, %c0_25] : memref<64x64xbf16, #tpu.memory_space<vmem>>, vector<64x64xbf16>
    %c0_26 = arith.constant 0 : index
    %c0_27 = arith.constant 0 : index
    %34 = vector.load %arg17[%c0_26, %c0_27] : memref<1x64xf32, #tpu.memory_space<vmem>>, vector<1x64xf32>
    %cst_28 = arith.constant dense<0.000000e+00> : vector<32x64xf32>
    %35 = tpu.matmul %32, %33, %cst_28 {dimension_numbers = #tpu.dot_dimension_numbers<[1], [0], [0], [1], [0, 0, 1, 1], [], []>} : vector<32x64xbf16>, vector<64x64xbf16>, vector<32x64xf32> -> vector<32x64xf32>
    %36 = vector.broadcast %34 : vector<1x64xf32> to vector<32x64xf32>
    %37 = arith.addf %35, %36 : vector<32x64xf32>
    %cst_29 = arith.constant 0.000000e+00 : f32
    %38 = vector.broadcast %cst_29 : f32 to vector<32x64xf32>
    %39 = arith.maximumf %37, %38 : vector<32x64xf32>
    %40 = arith.truncf %39 : vector<32x64xf32> to vector<32x64xbf16>
    %c0_30 = arith.constant 0 : index
    %c0_31 = arith.constant 0 : index
    %41 = vector.load %arg7[%c0_30, %c0_31] : memref<64x64xbf16, #tpu.memory_space<vmem>>, vector<64x64xbf16>
    %c0_32 = arith.constant 0 : index
    %c0_33 = arith.constant 0 : index
    %42 = vector.load %arg18[%c0_32, %c0_33] : memref<1x64xf32, #tpu.memory_space<vmem>>, vector<1x64xf32>
    %cst_34 = arith.constant dense<0.000000e+00> : vector<32x64xf32>
    %43 = tpu.matmul %40, %41, %cst_34 {dimension_numbers = #tpu.dot_dimension_numbers<[1], [0], [0], [1], [0, 0, 1, 1], [], []>} : vector<32x64xbf16>, vector<64x64xbf16>, vector<32x64xf32> -> vector<32x64xf32>
    %44 = vector.broadcast %42 : vector<1x64xf32> to vector<32x64xf32>
    %45 = arith.addf %43, %44 : vector<32x64xf32>
    %cst_35 = arith.constant 0.000000e+00 : f32
    %46 = vector.broadcast %cst_35 : f32 to vector<32x64xf32>
    %47 = arith.maximumf %45, %46 : vector<32x64xf32>
    %48 = arith.truncf %47 : vector<32x64xf32> to vector<32x64xbf16>
    %c0_36 = arith.constant 0 : index
    %c0_37 = arith.constant 0 : index
    %49 = vector.load %arg8[%c0_36, %c0_37] : memref<64x64xbf16, #tpu.memory_space<vmem>>, vector<64x64xbf16>
    %c0_38 = arith.constant 0 : index
    %c0_39 = arith.constant 0 : index
    %50 = vector.load %arg19[%c0_38, %c0_39] : memref<1x64xf32, #tpu.memory_space<vmem>>, vector<1x64xf32>
    %cst_40 = arith.constant dense<0.000000e+00> : vector<32x64xf32>
    %51 = tpu.matmul %48, %49, %cst_40 {dimension_numbers = #tpu.dot_dimension_numbers<[1], [0], [0], [1], [0, 0, 1, 1], [], []>} : vector<32x64xbf16>, vector<64x64xbf16>, vector<32x64xf32> -> vector<32x64xf32>
    %52 = vector.broadcast %50 : vector<1x64xf32> to vector<32x64xf32>
    %53 = arith.addf %51, %52 : vector<32x64xf32>
    %cst_41 = arith.constant 0.000000e+00 : f32
    %54 = vector.broadcast %cst_41 : f32 to vector<32x64xf32>
    %55 = arith.maximumf %53, %54 : vector<32x64xf32>
    %56 = arith.truncf %55 : vector<32x64xf32> to vector<32x64xbf16>
    %c0_42 = arith.constant 0 : index
    %c0_43 = arith.constant 0 : index
    %57 = vector.load %arg9[%c0_42, %c0_43] : memref<64x64xbf16, #tpu.memory_space<vmem>>, vector<64x64xbf16>
    %c0_44 = arith.constant 0 : index
    %c0_45 = arith.constant 0 : index
    %58 = vector.load %arg20[%c0_44, %c0_45] : memref<1x64xf32, #tpu.memory_space<vmem>>, vector<1x64xf32>
    %cst_46 = arith.constant dense<0.000000e+00> : vector<32x64xf32>
    %59 = tpu.matmul %56, %57, %cst_46 {dimension_numbers = #tpu.dot_dimension_numbers<[1], [0], [0], [1], [0, 0, 1, 1], [], []>} : vector<32x64xbf16>, vector<64x64xbf16>, vector<32x64xf32> -> vector<32x64xf32>
    %60 = vector.broadcast %58 : vector<1x64xf32> to vector<32x64xf32>
    %61 = arith.addf %59, %60 : vector<32x64xf32>
    %cst_47 = arith.constant 0.000000e+00 : f32
    %62 = vector.broadcast %cst_47 : f32 to vector<32x64xf32>
    %63 = arith.maximumf %61, %62 : vector<32x64xf32>
    %64 = arith.truncf %63 : vector<32x64xf32> to vector<32x64xbf16>
    %c0_48 = arith.constant 0 : index
    %c0_49 = arith.constant 0 : index
    %65 = vector.load %arg10[%c0_48, %c0_49] : memref<64x64xbf16, #tpu.memory_space<vmem>>, vector<64x64xbf16>
    %c0_50 = arith.constant 0 : index
    %c0_51 = arith.constant 0 : index
    %66 = vector.load %arg21[%c0_50, %c0_51] : memref<1x64xf32, #tpu.memory_space<vmem>>, vector<1x64xf32>
    %cst_52 = arith.constant dense<0.000000e+00> : vector<32x64xf32>
    %67 = tpu.matmul %64, %65, %cst_52 {dimension_numbers = #tpu.dot_dimension_numbers<[1], [0], [0], [1], [0, 0, 1, 1], [], []>} : vector<32x64xbf16>, vector<64x64xbf16>, vector<32x64xf32> -> vector<32x64xf32>
    %68 = vector.broadcast %66 : vector<1x64xf32> to vector<32x64xf32>
    %69 = arith.addf %67, %68 : vector<32x64xf32>
    %cst_53 = arith.constant 0.000000e+00 : f32
    %70 = vector.broadcast %cst_53 : f32 to vector<32x64xf32>
    %71 = arith.maximumf %69, %70 : vector<32x64xf32>
    %72 = arith.truncf %71 : vector<32x64xf32> to vector<32x64xbf16>
    %c0_54 = arith.constant 0 : index
    %c0_55 = arith.constant 0 : index
    %73 = vector.load %arg11[%c0_54, %c0_55] : memref<64x64xbf16, #tpu.memory_space<vmem>>, vector<64x64xbf16>
    %c0_56 = arith.constant 0 : index
    %c0_57 = arith.constant 0 : index
    %74 = vector.load %arg22[%c0_56, %c0_57] : memref<1x64xf32, #tpu.memory_space<vmem>>, vector<1x64xf32>
    %cst_58 = arith.constant dense<0.000000e+00> : vector<32x64xf32>
    %75 = tpu.matmul %72, %73, %cst_58 {dimension_numbers = #tpu.dot_dimension_numbers<[1], [0], [0], [1], [0, 0, 1, 1], [], []>} : vector<32x64xbf16>, vector<64x64xbf16>, vector<32x64xf32> -> vector<32x64xf32>
    %76 = vector.broadcast %74 : vector<1x64xf32> to vector<32x64xf32>
    %77 = arith.addf %75, %76 : vector<32x64xf32>
    %cst_59 = arith.constant 0.000000e+00 : f32
    %78 = vector.broadcast %cst_59 : f32 to vector<32x64xf32>
    %79 = arith.maximumf %77, %78 : vector<32x64xf32>
    %80 = arith.truncf %79 : vector<32x64xf32> to vector<32x64xbf16>
    %c0_60 = arith.constant 0 : index
    %c0_61 = arith.constant 0 : index
    %81 = vector.load %arg12[%c0_60, %c0_61] : memref<64x128xbf16, #tpu.memory_space<vmem>>, vector<64x128xbf16>
    %c0_62 = arith.constant 0 : index
    %c0_63 = arith.constant 0 : index
    %82 = vector.load %arg23[%c0_62, %c0_63] : memref<1x128xf32, #tpu.memory_space<vmem>>, vector<1x128xf32>
    %cst_64 = arith.constant dense<0.000000e+00> : vector<32x128xf32>
    %83 = tpu.matmul %80, %81, %cst_64 {dimension_numbers = #tpu.dot_dimension_numbers<[1], [0], [0], [1], [0, 0, 1, 1], [], []>} : vector<32x64xbf16>, vector<64x128xbf16>, vector<32x128xf32> -> vector<32x128xf32>
    %84 = vector.broadcast %82 : vector<1x128xf32> to vector<32x128xf32>
    %85 = arith.addf %83, %84 : vector<32x128xf32>
    %86 = arith.truncf %85 : vector<32x128xf32> to vector<32x128xbf16>
    %c0_65 = arith.constant 0 : index
    %c0_66 = arith.constant 0 : index
    %87 = vector.load %arg24[%c0_65, %c0_66] : memref<32x128xbf16, #tpu.memory_space<vmem>>, vector<32x128xbf16>
    tpu.vector_store %arg24[%c0_65, %c0_66], %86 {strides = array<i32>} : memref<32x128xbf16, #tpu.memory_space<vmem>>, vector<32x128xbf16>,
    return
  }
  func.func @transform_0(%arg0: i32) -> (i32, i32) {
    %c0_i32 = arith.constant 0 : i32
    %c0_i32_0 = arith.constant 0 : i32
    return %arg0, %c0_i32 : i32, i32
  }
  func.func @transform_1(%arg0: i32) -> (i32, i32) {
    %c0_i32 = arith.constant 0 : i32
    %c0_i32_0 = arith.constant 0 : i32
    %c0_i32_1 = arith.constant 0 : i32
    return %c0_i32, %c0_i32_0 : i32, i32
  }
  func.func @transform_2(%arg0: i32) -> (i32, i32) {
    %c0_i32 = arith.constant 0 : i32
    %c0_i32_0 = arith.constant 0 : i32
    %c0_i32_1 = arith.constant 0 : i32
    return %c0_i32, %c0_i32_0 : i32, i32
  }
  func.func @transform_3(%arg0: i32) -> (i32, i32) {
    %c0_i32 = arith.constant 0 : i32
    %c0_i32_0 = arith.constant 0 : i32
    %c0_i32_1 = arith.constant 0 : i32
    return %c0_i32, %c0_i32_0 : i32, i32
  }
  func.func @transform_4(%arg0: i32) -> (i32, i32) {
    %c0_i32 = arith.constant 0 : i32
    %c0_i32_0 = arith.constant 0 : i32
    %c0_i32_1 = arith.constant 0 : i32
    return %c0_i32, %c0_i32_0 : i32, i32
  }
  func.func @transform_5(%arg0: i32) -> (i32, i32) {
    %c0_i32 = arith.constant 0 : i32
    %c0_i32_0 = arith.constant 0 : i32
    %c0_i32_1 = arith.constant 0 : i32
    return %c0_i32, %c0_i32_0 : i32, i32
  }
  func.func @transform_6(%arg0: i32) -> (i32, i32) {
    %c0_i32 = arith.constant 0 : i32
    %c0_i32_0 = arith.constant 0 : i32
    %c0_i32_1 = arith.constant 0 : i32
    return %c0_i32, %c0_i32_0 : i32, i32
  }
  func.func @transform_7(%arg0: i32) -> (i32, i32) {
    %c0_i32 = arith.constant 0 : i32
    %c0_i32_0 = arith.constant 0 : i32
    %c0_i32_1 = arith.constant 0 : i32
    return %c0_i32, %c0_i32_0 : i32, i32
  }
  func.func @transform_8(%arg0: i32) -> (i32, i32) {
    %c0_i32 = arith.constant 0 : i32
    %c0_i32_0 = arith.constant 0 : i32
    %c0_i32_1 = arith.constant 0 : i32
    return %c0_i32, %c0_i32_0 : i32, i32
  }
  func.func @transform_9(%arg0: i32) -> (i32, i32) {
    %c0_i32 = arith.constant 0 : i32
    %c0_i32_0 = arith.constant 0 : i32
    %c0_i32_1 = arith.constant 0 : i32
    return %c0_i32, %c0_i32_0 : i32, i32
  }
  func.func @transform_10(%arg0: i32) -> (i32, i32) {
    %c0_i32 = arith.constant 0 : i32
    %c0_i32_0 = arith.constant 0 : i32
    %c0_i32_1 = arith.constant 0 : i32
    return %c0_i32, %c0_i32_0 : i32, i32
  }
  func.func @transform_11(%arg0: i32) -> (i32, i32) {
    %c0_i32 = arith.constant 0 : i32
    %c0_i32_0 = arith.constant 0 : i32
    %c0_i32_1 = arith.constant 0 : i32
    return %c0_i32, %c0_i32_0 : i32, i32
  }
  func.func @transform_12(%arg0: i32) -> (i32, i32) {
    %c0_i32 = arith.constant 0 : i32
    %c0_i32_0 = arith.constant 0 : i32
    %c0_i32_1 = arith.constant 0 : i32
    return %c0_i32, %c0_i32_0 : i32, i32
  }
  func.func @transform_13(%arg0: i32) -> (i32, i32) {
    %c0_i32 = arith.constant 0 : i32
    %c0_i32_0 = arith.constant 0 : i32
    %c0_i32_1 = arith.constant 0 : i32
    return %c0_i32, %c0_i32_0 : i32, i32
  }
  func.func @transform_14(%arg0: i32) -> (i32, i32) {
    %c0_i32 = arith.constant 0 : i32
    %c0_i32_0 = arith.constant 0 : i32
    %c0_i32_1 = arith.constant 0 : i32
    return %c0_i32, %c0_i32_0 : i32, i32
  }
  func.func @transform_15(%arg0: i32) -> (i32, i32) {
    %c0_i32 = arith.constant 0 : i32
    %c0_i32_0 = arith.constant 0 : i32
    %c0_i32_1 = arith.constant 0 : i32
    return %c0_i32, %c0_i32_0 : i32, i32
  }
  func.func @transform_16(%arg0: i32) -> (i32, i32) {
    %c0_i32 = arith.constant 0 : i32
    %c0_i32_0 = arith.constant 0 : i32
    %c0_i32_1 = arith.constant 0 : i32
    return %c0_i32, %c0_i32_0 : i32, i32
  }
  func.func @transform_17(%arg0: i32) -> (i32, i32) {
    %c0_i32 = arith.constant 0 : i32
    %c0_i32_0 = arith.constant 0 : i32
    %c0_i32_1 = arith.constant 0 : i32
    return %c0_i32, %c0_i32_0 : i32, i32
  }
  func.func @transform_18(%arg0: i32) -> (i32, i32) {
    %c0_i32 = arith.constant 0 : i32
    %c0_i32_0 = arith.constant 0 : i32
    %c0_i32_1 = arith.constant 0 : i32
    return %c0_i32, %c0_i32_0 : i32, i32
  }
  func.func @transform_19(%arg0: i32) -> (i32, i32) {
    %c0_i32 = arith.constant 0 : i32
    %c0_i32_0 = arith.constant 0 : i32
    %c0_i32_1 = arith.constant 0 : i32
    return %c0_i32, %c0_i32_0 : i32, i32
  }
  func.func @transform_20(%arg0: i32) -> (i32, i32) {
    %c0_i32 = arith.constant 0 : i32
    %c0_i32_0 = arith.constant 0 : i32
    %c0_i32_1 = arith.constant 0 : i32
    return %c0_i32, %c0_i32_0 : i32, i32
  }
  func.func @transform_21(%arg0: i32) -> (i32, i32) {
    %c0_i32 = arith.constant 0 : i32
    %c0_i32_0 = arith.constant 0 : i32
    %c0_i32_1 = arith.constant 0 : i32
    return %c0_i32, %c0_i32_0 : i32, i32
  }
  func.func @transform_22(%arg0: i32) -> (i32, i32) {
    %c0_i32 = arith.constant 0 : i32
    %c0_i32_0 = arith.constant 0 : i32
    %c0_i32_1 = arith.constant 0 : i32
    return %c0_i32, %c0_i32_0 : i32, i32
  }
  func.func @transform_23(%arg0: i32) -> (i32, i32) {
    %c0_i32 = arith.constant 0 : i32
    %c0_i32_0 = arith.constant 0 : i32
    return %arg0, %c0_i32 : i32, i32
  }
}

</mosaic_0001>

<bundles_post_ra>
// kernel: tpu_custom_call.1
= control target key start
LH: loop header
LB: loop body
LE: loop exit
PB: predicated region body
PF: predicated region fallthrough
CT: control target
= control target key end

     0   :  { %s3847_s0 = inlined_call_operand.vmem [shape: bf16[64,184], index: 0, kind: input, shape index: {}]   ;;  %s3848_s1 = inlined_call_operand.hbm [shape: bf16[184,256], index: 1, kind: input, shape index: {}]   ;;  %s3849_s2 = inlined_call_operand.hbm [shape: bf16[256,128], index: 2, kind: input, shape index: {}]   ;;  %s3850_s3 = inlined_call_operand.vmem [shape: bf16[128,64], index: 3, kind: input, shape index: {}]   ;;  %s3851_s4 = inlined_call_operand.vmem [shape: bf16[64,64], index: 4, kind: input, shape index: {}]   ;;  %s3852_s5 = inlined_call_operand.hbm [shape: bf16[64,64], index: 5, kind: input, shape index: {}]   ;;  %s3853_s6 = inlined_call_operand.hbm [shape: bf16[64,64], index: 6, kind: input, shape index: {}]   ;;  %s3854_s7 = inlined_call_operand.hbm [shape: bf16[64,64], index: 7, kind: input, shape index: {}]   ;;  %s3855_s8 = inlined_call_operand.hbm [shape: bf16[64,64], index: 8, kind: input, shape index: {}]   ;;  %s3856_s9 = inlined_call_operand.vmem [shape: bf16[64,64], index: 9, kind: input, shape index: {}]   ;;  %s3857_s10 = inlined_call_operand.hbm [shape: bf16[64,64], index: 10, kind: input, shape index: {}]   ;;  %s3858_s11 = inlined_call_operand.hbm [shape: bf16[64,128], index: 11, kind: input, shape index: {}]   ;;  %s3859_s12 = inlined_call_operand.vmem [shape: f32[1,256], index: 12, kind: input, shape index: {}]   ;;  %s3860_s13 = inlined_call_operand.vmem [shape: f32[1,128], index: 13, kind: input, shape index: {}]   ;;  %s3861_s14 = inlined_call_operand.vmem [shape: f32[1,64], index: 14, kind: input, shape index: {}]   ;;  %s3862_s15 = inlined_call_operand.vmem [shape: f32[1,64], index: 15, kind: input, shape index: {}]   ;;  %s3863_s16 = inlined_call_operand.vmem [shape: f32[1,64], index: 16, kind: input, shape index: {}]   ;;  %s3864_s17 = inlined_call_operand.vmem [shape: f32[1,64], index: 17, kind: input, shape index: {}]   ;;  %s3865_s18 = inlined_call_operand.vmem [shape: f32[1,64], index: 18, kind: input, shape index: {}]   ;;  %s3866_s19 = inlined_call_operand.vmem [shape: f32[1,64], index: 19, kind: input, shape index: {}]   ;;  %s3867_s20 = inlined_call_operand.vmem [shape: f32[1,64], index: 20, kind: input, shape index: {}]   ;;  %s3868_s21 = inlined_call_operand.vmem [shape: f32[1,64], index: 21, kind: input, shape index: {}]   ;;  %s3869_s22 = inlined_call_operand.vmem [shape: f32[1,128], index: 22, kind: input, shape index: {}]   ;;  %s3870_s23 = inlined_call_operand.hbm [shape: bf16[64,128], index: 23, kind: output, shape index: {}]  }
   0x1   :  { %3897 = sst [smem:[#allocation31_spill]] %s3847_s0 }
   0x2   :  { %3898 = sst [smem:[#allocation32_spill]] %s3848_s1 }
   0x3   :  { %3899 = sst [smem:[#allocation33_spill]] %s3849_s2 }
   0x4   :  { %3900 = sst [smem:[#allocation34_spill]] %s3850_s3 }
   0x5   :  { %3901 = sst [smem:[#allocation35_spill]] %s3851_s4 }
   0x6   :  { %3902 = sst [smem:[#allocation36_spill]] %s3852_s5 }
   0x7   :  { %3903 = sst [smem:[#allocation37_spill]] %s3853_s6 }
   0x8   :  { %3904 = sst [smem:[#allocation38_spill]] %s3854_s7 }
   0x9   :  { %3905 = sst [smem:[#allocation39_spill]] %s3855_s8 }
   0xa   :  { %3906 = sst [smem:[#allocation40_spill]] %s3866_s19 }
   0xb   :  { %3907 = sst [smem:[#allocation41_spill]] %s3867_s20 }
   0xc   :  { %3908 = sst [smem:[#allocation42_spill]] %s3868_s21 }
   0xd   :  { %3909 = sst [smem:[#allocation43_spill]] %s3869_s22 }
   0xe   :  { %3910 = sst [smem:[#allocation44_spill]] %s3870_s23 }
   0xf   :  { %28 = vsyncpa [#allocation3], 0 }
  0x10   :  { %29 = vsyncpa [#allocation6], 0 }
  0x11   :  { %30 = vsyncpa [#allocation9], 0 }
  0x12   :  { %31 = vsyncpa [#allocation12], 0 }
  0x13   :  { %32 = vsyncpa [#allocation15], 0 }
  0x14   :  { %33 = vsyncpa [#allocation4], 0 }
  0x15   :  { %35 = vsyncpa [#allocation4 + $0x1], 0  ;;  %s3401_s4 = smov 0   ;;  %s3403_s30 = smov 0  }
  0x16   :  { %s3405_s24 = smov 0   ;;  %s3407_s25 = smov 0  }
  0x17   :  { %3911 = sst [smem:[#allocation23_spill]] %s3407_s25 }
  0x18 LB: > { %s3913_s25 = sld [smem:[#allocation23_spill]]  ;;  %3915 = sst [smem:[#allocation24_spill]] %s3256_s30  ;;  %s3260_s24 = sphi %s3405_s24, %s3966_s24   ;;  %s3256_s30 = sphi %s3403_s30, %s3968_s30   ;;  %s3252_s4 = sphi %s3401_s4, %s3964_s4  }
  0x19   : > { %3914 = sst [smem:[#allocation23_spill]] %s3252_s4  ;;  %s536_s2 = sadd.s32 1, %s3260_s24 }
  0x1a   : > { %3916 = sst [smem:[#allocation25_spill]] %s3260_s24  ;;  %p546_p0 = scmp.ne.s32.totalorder %s3260_s24, %s3256_s30 }
  0x1b   : > { %p552_p3 = scmp.ne.s32.totalorder %s3256_s30, %s3252_s4  ;;  %s3266_s3 = smov [#allocation5]  }
  0x1c   : > { %s585_s0 = sshll.u32 %s3266_s3, 4  ;;  %s3926_s3 = sld [smem:[#allocation33_spill]]  ;;  %s3456_s0 = int_to_ptr.vmem [resolvable:$true] %s585_s0 }
  0x1e   : > { %3917 = sst [smem:[#allocation26_spill]] %s3913_s25  ;;  %s3422_s5 = sadd.s32 4294967295, %s3913_s25  }
  0x1f   : > { %s2370_s1 = sadd.s32 4294967294, %s3913_s25   ;;  %s3426_s26 = sadd.s32 1, %s3913_s25  }
  0x20   : > { %3918 = sst [smem:[#allocation27_spill]] %s3426_s26  ;;  %s533_s6 = ssub.s32 %s3913_s25, %s3426_s26 }
  0x21   : > { %p534_p1 = scmp.eq.s32.totalorder %s533_s6, 0  ;;  %p547_p2 = scmp.eq.s32.totalorder %s3422_s5, 1 }
  0x22   : > { %p553_p4 = scmp.eq.s32.totalorder %s2370_s1, 1  ;;  %p2371_p7 = scmp.ge.s32.totalorder %s3913_s25, 1 }
  0x23   : > { %s3437_s27 = scalar_select %p534_p1, %s3260_s24, %s536_s2  }
  0x24   : > { %p3439_p5 = por %p547_p2, %p546_p0  ;;  %p3443_p6 = por %p553_p4, %p552_p3 }
  0x25   : > { %3919 = sst [smem:[#allocation28_spill]] %s3437_s27  ;;  %p560_p8 = scmp.lt.s32.totalorder %s3913_s25, 3 }
  0x26   : > { %s3920_s7 = scalar_select %p3439_p5, 1, 0 }
  0x27   : > { %s3922_s28 = scalar_select %p3443_p6, 1, 0 }
  0x28   : > { %3921 = sst [smem:[#allocation29_spill]] %s3920_s7  ;;  %p3887_p9 = scmp.eq.s32.totalorder %s3422_s5, 0 }
  0x29   : > { %3923 = sst [smem:[#allocation30_spill]] %s3922_s28  ;;  %p3450_p10 = pnand %p2371_p7, %p560_p8 }
  0x2a   : > { %s3267_s2 = smov [#allocation8]   ;;  %s3268_s27 = smov [#allocation11]  }
  0x2b   : > { %s3924_s29 = scalar_select %p3450_p10, 1, 0 }
  0x2c   : > { %p2769_p11 = pneg %p3450_p10  ;;  %s617_s6 = sshll.u32 %s3267_s2, 4  ;;  %s3464_s6 = int_to_ptr.vmem [resolvable:$true] %s617_s6 }
  0x2d   : > { %s3466_s24 = sshll.u32 %s3268_s27, 4  ;;  %s2958_s4 = scalar_lea.hbm %s3926_s3, 2048  ;;  %s644_s24 = int_to_ptr.vmem [resolvable:$true] %s3466_s24 }
  0x2e   : > { %p3460_p12 = pnand %p3887_p9, %p2769_p11  ;;  %p2959_p13 = scmp.ne.s32.totalorder %s3926_s3, %s2958_s4 }
  0x2f   : > { %p2965_p3 = scmp.lt.u32.totalorder %s2958_s4, %s3926_s3 }
  0x30   : > { %p3476_p0 = pneg %p3460_p12 }
  0x32   : > { %p2961_p1 = pnand %p3476_p0, %p2959_p13 }
  0x34   : > { %p2962_p2 = pneg %p2961_p1 }
  0x36   : > { %p2967_p4 = pnand %p2965_p3, %p2962_p2 }
  0x38   : > { %2970 = shalt.err (!%p2967_p4)
}
  0x39   : > { %s2971_s23 = scalar_lea.vmem %s3456_s0, 2048  ;;  %p2979_p9 = scmp.lt.s32.totalorder %s3456_s0, %s3456_s0 }
  0x3a   : > { %p2972_p7 = scmp.ne.s32.totalorder %s3456_s0, %s2971_s23  ;;  %p2980_p6 = scmp.lt.s32.totalorder %s2971_s23, %s2971_s23 }
  0x3c   : > { %p2974_p8 = pnand %p2972_p7, %p3476_p0  ;;  %p2981_p13 = por %p2980_p6, %p2979_p9 }
  0x3e   : > { %p2975_p11 = pneg %p2974_p8 }
  0x40   : > { %p2982_p1 = pnand %p2981_p13, %p2975_p11 }
  0x42   : > { %2985 = shalt.err (!%p2982_p1)
}
  0x43   : > { %s3892_s25 = smov 64   ;;  %s3894_s4 = smov 4  }
  0x44   : > { %2775 = dma.hbm_to_vmem [thread:$0]  (!%p3460_p12), %s3926_s3, 2048, %s3456_s0, [#allocation6], %s3892_s25, %s3892_s25, %s3894_s4  }
  0x45   : > { %s3928_s22 = sld [smem:[#allocation37_spill]] }
  0x4b   : > { %s2986_s23 = scalar_lea.hbm %s3928_s22, 512 }
  0x4c   : > { %p2987_p6 = scmp.ne.s32.totalorder %s3928_s22, %s2986_s23  ;;  %p2993_p3 = scmp.lt.u32.totalorder %s2986_s23, %s3928_s22 }
  0x4e   : > { %p2989_p9 = pnand %p2987_p6, %p3476_p0 }
  0x50   : > { %p2990_p2 = pneg %p2989_p9 }
  0x52   : > { %p2995_p4 = pnand %p2993_p3, %p2990_p2 }
  0x54   : > { %2998 = shalt.err (!%p2995_p4)
}
  0x55   : > { %s2999_s0 = scalar_lea.vmem %s3464_s6, 512  ;;  %p3007_p13 = scmp.lt.s32.totalorder %s3464_s6, %s3464_s6 }
  0x56   : > { %p3000_p7 = scmp.ne.s32.totalorder %s3464_s6, %s2999_s0  ;;  %p3008_p1 = scmp.lt.s32.totalorder %s2999_s0, %s2999_s0 }
  0x58   : > { %p3002_p8 = pnand %p3000_p7, %p3476_p0  ;;  %p3009_p6 = por %p3008_p1, %p3007_p13 }
  0x5a   : > { %p3003_p11 = pneg %p3002_p8 }
  0x5c   : > { %p3010_p9 = pnand %p3009_p6, %p3003_p11 }
  0x5e   : > { %3013 = shalt.err (!%p3010_p9)
}
  0x5f   : > { %2781 = dma.hbm_to_vmem [thread:$0]  (!%p3460_p12), %s3928_s22, 512, %s3464_s6, [#allocation9], %s3892_s25, %s3892_s25, %s3894_s4  }
  0x60   : > { %s3929_s8 = sld [smem:[#allocation39_spill]] }
  0x66   : > { %s3014_s26 = scalar_lea.hbm %s3929_s8, 512 }
  0x67   : > { %p3015_p2 = scmp.ne.s32.totalorder %s3929_s8, %s3014_s26  ;;  %p3021_p7 = scmp.lt.u32.totalorder %s3014_s26, %s3929_s8 }
  0x69   : > { %p3017_p3 = pnand %p3015_p2, %p3476_p0 }
  0x6b   : > { %p3018_p4 = pneg %p3017_p3 }
  0x6d   : > { %p3023_p8 = pnand %p3021_p7, %p3018_p4 }
  0x6f   : > { %3026 = shalt.err (!%p3023_p8)
}
  0x70   : > { %s3027_s0 = scalar_lea.vmem %s644_s24, 512  ;;  %p3035_p6 = scmp.lt.s32.totalorder %s644_s24, %s644_s24 }
  0x71   : > { %p3028_p11 = scmp.ne.s32.totalorder %s644_s24, %s3027_s0  ;;  %p3036_p9 = scmp.lt.s32.totalorder %s3027_s0, %s3027_s0 }
  0x73   : > { %p3030_p13 = pnand %p3028_p11, %p3476_p0  ;;  %p3037_p5 = por %p3036_p9, %p3035_p6 }
  0x75   : > { %p3031_p1 = pneg %p3030_p13 }
  0x77   : > { %p3038_p10 = pnand %p3037_p5, %p3031_p1 }
  0x79   : > { %3041 = shalt.err (!%p3038_p10)
}
  0x7a   : > { %2787 = dma.hbm_to_vmem [thread:$0]  (!%p3460_p12), %s3929_s8, 512, %s644_s24, [#allocation12], %s3892_s25, %s3892_s25, %s3894_s4  }
  0x7b   : > { %s3271_s20 = smov [#allocation2]   ;;  %s3930_s28 = sld [smem:[#allocation32_spill]] }
  0x7c   : > { %s572_s21 = sshll.u32 %s3271_s20, 4  ;;  %s573_s21 = int_to_ptr.vmem [resolvable:$true] %s572_s21 }
  0x81   : > { %s3042_s2 = scalar_lea.hbm %s3930_s28, 2944 }
  0x82   : > { %p3043_p5 = scmp.ne.s32.totalorder %s3930_s28, %s3042_s2  ;;  %p3049_p3 = scmp.lt.u32.totalorder %s3042_s2, %s3930_s28 }
  0x84   : > { %p3045_p10 = pnand %p3043_p5, %p3476_p0 }
  0x86   : > { %p3046_p2 = pneg %p3045_p10 }
  0x88   : > { %p3051_p4 = pnand %p3049_p3, %p3046_p2 }
  0x8a   : > { %3054 = shalt.err (!%p3051_p4)
}
  0x8b   : > { %s3055_s24 = scalar_lea.vmem %s573_s21, 2944  ;;  %p3063_p13 = scmp.lt.s32.totalorder %s573_s21, %s573_s21 }
  0x8c   : > { %p3056_p7 = scmp.ne.s32.totalorder %s573_s21, %s3055_s24  ;;  %p3064_p1 = scmp.lt.s32.totalorder %s3055_s24, %s3055_s24 }
  0x8e   : > { %p3058_p8 = pnand %p3056_p7, %p3476_p0  ;;  %p3065_p6 = por %p3064_p1, %p3063_p13 }
  0x90   : > { %p3059_p11 = pneg %p3058_p8 }
  0x92   : > { %p3066_p9 = pnand %p3065_p6, %p3059_p11 }
  0x94   : > { %3069 = shalt.err (!%p3066_p9)
}
  0x95   : > { %s3272_s6 = smov 128   ;;  %s3273_s19 = smov 8  }
  0x96   : > { %2772 = dma.hbm_to_vmem [thread:$0]  (!%p3460_p12), %s3930_s28, 2944, %s573_s21, [#allocation3], %s3272_s6, %s3272_s6, %s3273_s19  }
  0x97   : > { %s3274_s30 = smov [#allocation7]   ;;  %s3275_s2 = smov [#allocation10]  }
  0x98   : > { %s604_s26 = sshll.u32 %s3274_s30, 4  ;;  %s630_s27 = sshll.u32 %s3275_s2, 4  ;;  %s605_s26 = int_to_ptr.vmem [resolvable:$true] %s604_s26  ;;  %s3566_s27 = int_to_ptr.vmem [resolvable:$true] %s630_s27 }
  0x99   : > { %s3931_s24 = sld [smem:[#allocation36_spill]] }
  0x9f   : > { %s3932_s25 = smov %s3931_s24  ;;  %s3070_s4 = scalar_lea.hbm %s3931_s24, 512 }
  0xa0   : > { %p3071_p5 = scmp.ne.s32.totalorder %s3932_s25, %s3070_s4  ;;  %p3077_p3 = scmp.lt.u32.totalorder %s3070_s4, %s3932_s25 }
  0xa2   : > { %p3073_p10 = pnand %p3071_p5, %p3476_p0 }
  0xa4   : > { %p3074_p2 = pneg %p3073_p10 }
  0xa6   : > { %p3079_p4 = pnand %p3077_p3, %p3074_p2 }
  0xa8   : > { %3082 = shalt.err (!%p3079_p4)
}
  0xa9   : > { %s3083_s6 = scalar_lea.vmem %s605_s26, 512  ;;  %p3091_p13 = scmp.lt.s32.totalorder %s605_s26, %s605_s26 }
  0xaa   : > { %p3084_p7 = scmp.ne.s32.totalorder %s605_s26, %s3083_s6  ;;  %p3092_p1 = scmp.lt.s32.totalorder %s3083_s6, %s3083_s6 }
  0xac   : > { %p3086_p8 = pnand %p3084_p7, %p3476_p0  ;;  %p3093_p6 = por %p3092_p1, %p3091_p13 }
  0xae   : > { %p3087_p11 = pneg %p3086_p8 }
  0xb0   : > { %p3094_p9 = pnand %p3093_p6, %p3087_p11 }
  0xb2   : > { %3097 = shalt.err (!%p3094_p9)
}
  0xb3   : > { %s3933_s8 = smov 4   ;;  %s3934_s22 = smov 64  }
  0xb4   : > { %2778 = dma.hbm_to_vmem [thread:$0]  (!%p3460_p12), %s3932_s25, 512, %s605_s26, [#allocation6], %s3934_s22, %s3934_s22, %s3933_s8  }
  0xb5   : > { %s3935_s2 = sld [smem:[#allocation38_spill]] }
  0xbb   : > { %s3098_s23 = scalar_lea.hbm %s3935_s2, 512 }
  0xbc   : > { %p3099_p5 = scmp.ne.s32.totalorder %s3935_s2, %s3098_s23  ;;  %p3105_p3 = scmp.lt.u32.totalorder %s3098_s23, %s3935_s2 }
  0xbe   : > { %p3101_p10 = pnand %p3099_p5, %p3476_p0 }
  0xc0   : > { %p3102_p2 = pneg %p3101_p10 }
  0xc2   : > { %p3107_p4 = pnand %p3105_p3, %p3102_p2 }
  0xc4   : > { %3110 = shalt.err (!%p3107_p4)
}
  0xc5   : > { %s3111_s26 = scalar_lea.vmem %s3566_s27, 512  ;;  %p3119_p13 = scmp.lt.s32.totalorder %s3566_s27, %s3566_s27 }
  0xc6   : > { %p3112_p7 = scmp.ne.s32.totalorder %s3566_s27, %s3111_s26  ;;  %p3120_p1 = scmp.lt.s32.totalorder %s3111_s26, %s3111_s26 }
  0xc8   : > { %p3114_p8 = pnand %p3112_p7, %p3476_p0  ;;  %p3121_p6 = por %p3120_p1, %p3119_p13 }
  0xca   : > { %p3115_p11 = pneg %p3114_p8 }
  0xcc   : > { %p3122_p9 = pnand %p3121_p6, %p3115_p11 }
  0xce   : > { %3125 = shalt.err (!%p3122_p9)
}
  0xcf   : > { %2784 = dma.hbm_to_vmem [thread:$0]  (!%p3460_p12), %s3935_s2, 512, %s3566_s27, [#allocation9], %s3934_s22, %s3934_s22, %s3933_s8  }
  0xd0   : > { %s3276_s4 = smov [#allocation13]   ;;  %s3277_s30 = smov [#allocation14]  }
  0xd1   : > { %s659_s20 = sshll.u32 %s3276_s4, 4  ;;  %s672_s23 = sshll.u32 %s3277_s30, 4  ;;  %s660_s20 = int_to_ptr.vmem [resolvable:$true] %s659_s20  ;;  %s3615_s23 = int_to_ptr.vmem [resolvable:$true] %s672_s23 }
  0xd2   : > { %s3126_s3 = scalar_lea.hbm %s3857_s10, 512 }
  0xd3   : > { %p3127_p5 = scmp.ne.s32.totalorder %s3857_s10, %s3126_s3  ;;  %p3133_p3 = scmp.lt.u32.totalorder %s3126_s3, %s3857_s10 }
  0xd5   : > { %p3129_p10 = pnand %p3127_p5, %p3476_p0 }
  0xd7   : > { %p3130_p2 = pneg %p3129_p10 }
  0xd9   : > { %p3135_p4 = pnand %p3133_p3, %p3130_p2 }
  0xdb   : > { %3138 = shalt.err (!%p3135_p4)
}
  0xdc   : > { %s3139_s19 = scalar_lea.vmem %s660_s20, 512  ;;  %p3147_p13 = scmp.lt.s32.totalorder %s660_s20, %s660_s20 }
  0xdd   : > { %p3140_p7 = scmp.ne.s32.totalorder %s660_s20, %s3139_s19  ;;  %p3148_p1 = scmp.lt.s32.totalorder %s3139_s19, %s3139_s19 }
  0xdf   : > { %p3142_p8 = pnand %p3140_p7, %p3476_p0  ;;  %p3149_p6 = por %p3148_p1, %p3147_p13 }
  0xe1   : > { %p3143_p11 = pneg %p3142_p8 }
  0xe3   : > { %p3150_p9 = pnand %p3149_p6, %p3143_p11 }
  0xe5   : > { %3153 = shalt.err (!%p3150_p9)
}
  0xe6   : > { %2790 = dma.hbm_to_vmem [thread:$0]  (!%p3460_p12), %s3857_s10, 512, %s660_s20, [#allocation12], %s3934_s22, %s3934_s22, %s3933_s8  }
  0xe7   : > { %s3154_s3 = scalar_lea.hbm %s3858_s11, 512 }
  0xe8   : > { %p3155_p5 = scmp.ne.s32.totalorder %s3858_s11, %s3154_s3  ;;  %p3161_p3 = scmp.lt.u32.totalorder %s3154_s3, %s3858_s11 }
  0xea   : > { %p3157_p10 = pnand %p3155_p5, %p3476_p0 }
  0xec   : > { %p3158_p2 = pneg %p3157_p10 }
  0xee   : > { %p3163_p4 = pnand %p3161_p3, %p3158_p2 }
  0xf0   : > { %3166 = shalt.err (!%p3163_p4)
}
  0xf1   : > { %s3167_s20 = scalar_lea.vmem %s3615_s23, 512  ;;  %p3175_p13 = scmp.lt.s32.totalorder %s3615_s23, %s3615_s23 }
  0xf2   : > { %p3168_p7 = scmp.ne.s32.totalorder %s3615_s23, %s3167_s20  ;;  %p3176_p1 = scmp.lt.s32.totalorder %s3167_s20, %s3167_s20 }
  0xf4   : > { %p3170_p8 = pnand %p3168_p7, %p3476_p0  ;;  %p3177_p6 = por %p3176_p1, %p3175_p13 }
  0xf6   : > { %p3171_p11 = pneg %p3170_p8 }
  0xf8   : > { %p3178_p9 = pnand %p3177_p6, %p3171_p11 }
  0xfa   : > { %3181 = shalt.err (!%p3178_p9)
}
  0xfb   : > { %2793 = dma.hbm_to_vmem [thread:$0]  (!%p3460_p12), %s3858_s11, 512, %s3615_s23, [#allocation15], %s3934_s22, %s3934_s22, %s3933_s8  }
  0xfc   : > { %p3936_p5 = scmp.ne.s32.totalorder %s3924_s29, 0 }
  0xfd   : > { %p3937_p0 = scmp.eq.s32.totalorder (!%p3936_p5), %s3422_s5, 0 }
  0xfe   : > { %731 = sbr.rel (%p3936_p5) target bundleno = 2786 (0xae2), region = 112 }
 0x105   : > { %3227 = dma.done.wait (%p3937_p0), [#allocation3], 2944   ;;  %p3938_p10 = pmov %p3937_p0 }
 0x106   : > { %p3939_p2 = pmov %p3937_p0 }
 0x107   : > { %3229 = vsyncadd (%p3938_p10), [#allocation3], 4294964352 }
 0x108   : > { %3231 = dma.done.wait (%p3939_p2), [#allocation6], 2560   ;;  %p3940_p3 = pmov %p3937_p0 }
 0x109   : > { %p3941_p4 = pmov %p3937_p0 }
 0x10a   : > { %3233 = vsyncadd (%p3940_p3), [#allocation6], 4294964736 }
 0x10b   : > { %3235 = dma.done.wait (%p3941_p4), [#allocation9], 1024   ;;  %p3942_p12 = pmov %p3937_p0 }
 0x10c   : > { %p3943_p7 = pmov %p3937_p0 }
 0x10d   : > { %3237 = vsyncadd (%p3942_p12), [#allocation9], 4294966272 }
 0x10e   : > { %3239 = dma.done.wait (%p3943_p7), [#allocation12], 1024   ;;  %p3944_p8 = pmov %p3937_p0 }
 0x10f   : > { %p3945_p11 = pmov %p3937_p0 }
 0x110   : > { %3241 = vsyncadd (%p3944_p8), [#allocation12], 4294966272 }
 0x111   : > { %3243 = dma.done.wait (%p3945_p11), [#allocation15], 512   ;;  %p3946_p13 = pmov %p3937_p0 }
 0x112   : > { %s2391_s7 = sshll.u32 %s3422_s5, 2  ;;  %v2861_v0 = vld [vmem:[#allocation2 + $0x4] ss:$8 sps:$4 sm:$0xff]   ;;  %v2863_v1 = vld [vmem:[#allocation2] ss:$8 sps:$4 sm:$0xff]   ;;  %s3947_s22 = sld [smem:[#allocation31_spill]]  ;;  %v862_v47 = vlaneseq }
 0x113   : > { %3245 = vsyncadd (%p3946_p13), [#allocation15], 4294966784  ;;  %1019 = vmatprep.subr.bf16.mxu0 %v2861_v0  ;;  %v2864_v2 = vld [vmem:[#allocation2 + $0x14] ss:$8 sps:$4 sm:$0xff]   ;;  %p825_p1 = scmp.lt.s32.totalorder %s2391_s7, 7  ;;  %vm1005_vm0 = vcmask 457728  }
 0x114   : > { %1020 = vmatpush1.bf16.msra.mxu0 %v2863_v1  ;;  %v2866_v3 = vld [vmem:[#allocation2 + $0x10] ss:$8 sps:$4 sm:$0xff]   ;;  %v2867_v4 = vld [vmem:[#allocation2 + $0x24] ss:$8 sps:$4 sm:$0xff]   ;;  %v2869_v5 = vld [vmem:[#allocation2 + $0x20] ss:$8 sps:$4 sm:$0xff]  }
 0x115   : > { %1021 = vmatprep.subr.bf16.mxu0 %v2864_v2  ;;  %s3971_s7 = smov (!%p825_p1, %s2391_s7), 7  ;;  %v2870_v6 = vld [vmem:[#allocation2 + $0x34] ss:$8 sps:$4 sm:$0xff]   ;;  %v2872_v7 = vld [vmem:[#allocation2 + $0x30] ss:$8 sps:$4 sm:$0xff]   ;;  %v2904_v17 = vld [vmem:[#allocation5 + $0x48] sm:$0xff]  }
 0x116   : > { %s2516_s29 = sshll.u32 %s3971_s7, 3  ;;  %v2873_v8 = vld [vmem:[#allocation2 + $0x44] ss:$8 sps:$4 sm:$0xff]   ;;  %v2875_v9 = vld [vmem:[#allocation2 + $0x40] ss:$8 sps:$4 sm:$0xff]   ;;  %v2902_v13 = vld [vmem:[#allocation5 + $0x40] sm:$0xff]  }
 0x117   : > { %v2876_v10 = vld [vmem:[#allocation2 + $0x54] ss:$8 sps:$4 sm:$0xff]   ;;  %v2878_v12 = vld [vmem:[#allocation2 + $0x50] ss:$8 sps:$4 sm:$0xff]   ;;  %v2879_v14 = vld [vmem:[#allocation2 + $0x64] ss:$8 sps:$4 sm:$0xff]   ;;  %2533 = vmatprep.subr.bf16.mxu1 %v2902_v13 }
 0x118   : > { %1022 = vmatpush1.bf16.msra.mxu0 %v2866_v3  ;;  %s3690_s23 = scalar_lea.vmem %s3947_s22, %s2516_s29  ;;  %v859_v15 = vld [vmem:[#allocation2 + $0xb0] sm:$0xff]  ;;  %v2903_v16 = vld [vmem:[#allocation5] sm:$0xff]   ;;  %v2905_v18 = vld [vmem:[#allocation5 + $0x8] sm:$0xff]   ;;  %vm1012_vm1 = vcmask 1043456   ;;  %s3948_s24 = sld [smem:[#allocation34_spill]]  ;;  %v863_v48 = vshrl.u32 %v862_v47, 7 }
 0x119   : > { %1023 = vmatprep.subr.bf16.mxu0 %v2867_v4  ;;  %v2898_v11 = vld [vmem:[%s3690_s23 + $0x4] ss:$8 sps:$4 sm:$0xff]   ;;  %2534 = vmatpush3.bf16.msra.mxu1 %v2903_v16  ;;  %v2881_v20 = vld [vmem:[#allocation2 + $0x60] ss:$8 sps:$4 sm:$0xff]   ;;  %v2882_v21 = vld [vmem:[#allocation2 + $0x74] ss:$8 sps:$4 sm:$0xff]   ;;  %v2420_v22 = vcombine.low %v859_v15, %v859_v15  ;;  %v2421_v37 = vcombine.high %v859_v15, %v859_v15 }
 0x11a   : > { %2423 = vmatprep.mubr.msk.bf16.mxu0 %vm1005_vm0, %v2898_v11  ;;  %2535 = vmatprep.subr.bf16.mxu1 %v2904_v17  ;;  %v2906_v19 = vld [vmem:[#allocation5 + $0x50] sm:$0xff]   ;;  %v2884_v23 = vld [vmem:[#allocation2 + $0x70] ss:$8 sps:$4 sm:$0xff]   ;;  %v2888_v31 = vld [vmem:[#allocation2 + $0x94] ss:$8 sps:$4 sm:$0xff]   ;;  %v864_v49 = vsub.s32 0, %v863_v48 }
 0x11b   : > { %v2907_v24 = vld [vmem:[#allocation5 + $0x10] sm:$0xff]   ;;  %v2908_v25 = vld [vmem:[#allocation5 + $0x58] sm:$0xff]   ;;  %v1014_v27 = vsel %vm1012_vm1, %v2420_v22, 0  ;;  %v2910_v29 = vld [vmem:[#allocation5 + $0x60] sm:$0xff]   ;;  %v868_v51 = vsub.s32 1, %v863_v48  ;;  %s3950_s6 = sld [smem:[#allocation35_spill]] }
 0x11c   : > { %1024 = vmatpush1.bf16.msra.mxu0 %v2869_v5  ;;  %v2885_v26 = vld [vmem:[#allocation2 + $0x84] ss:$8 sps:$4 sm:$0xff]   ;;  %v2909_v28 = vld [vmem:[#allocation5 + $0x18] sm:$0xff]   ;;  %v2887_v30 = vld [vmem:[#allocation2 + $0x80] ss:$8 sps:$4 sm:$0xff]   ;;  %vm1439_vm2 = vcmask 523264  }
 0x11d   : > { %1025 = vmatprep.subr.bf16.mxu0 %v2870_v6  ;;  %2536 = vmatpush3.bf16.msra.mxu1 %v2905_v18  ;;  %v2911_v32 = vld [vmem:[#allocation5 + $0x20] sm:$0xff]   ;;  %v2912_v33 = vld [vmem:[#allocation5 + $0x68] sm:$0xff]   ;;  %v2914_v42 = vld [vmem:[#allocation5 + $0x70] sm:$0xff]   ;;  %s3951_s21 = sld [smem:[#allocation40_spill]]  ;;  %s3952_s20 = sld [smem:[#allocation41_spill]] }
 0x11e   : > { %2537 = vmatprep.subr.bf16.mxu1 %v2906_v19  ;;  %v2890_v34 = vld [vmem:[#allocation2 + $0x90] ss:$8 sps:$4 sm:$0xff]   ;;  %v2891_v35 = vld [vmem:[#allocation2 + $0xa4] ss:$8 sps:$4 sm:$0xff]   ;;  %v2893_v36 = vld [vmem:[#allocation2 + $0xa0] ss:$8 sps:$4 sm:$0xff]   ;;  %s3949_s3 = smov %s3948_s24 }
 0x11f   : > { %v2896_v38 = vld [vmem:[%s3690_s23] ss:$8 sps:$4 sm:$0xff]   ;;  %v2899_v39 = vld [vmem:[%s3690_s23 + $0x14] ss:$8 sps:$4 sm:$0xff]   ;;  %v2901_v40 = vld [vmem:[%s3690_s23 + $0x10] ss:$8 sps:$4 sm:$0xff]  }
 0x120   : > { %1026 = vmatpush1.bf16.msra.mxu0 %v2872_v7  ;;  %v2913_v41 = vld [vmem:[#allocation5 + $0x28] sm:$0xff]   ;;  %v2915_v43 = vld [vmem:[#allocation5 + $0x30] sm:$0xff]   ;;  %v2916_v44 = vld [vmem:[#allocation5 + $0x78] sm:$0xff]   ;;  %s3953_s7 = sld [smem:[#allocation42_spill]]  ;;  %s3954_s29 = sld [smem:[#allocation24_spill]] }
 0x121   : > { %1027 = vmatprep.subr.bf16.mxu0 %v2873_v8  ;;  %2538 = vmatpush3.bf16.msra.mxu1 %v2907_v24  ;;  %v2917_v45 = vld [vmem:[#allocation5 + $0x38] sm:$0xff]   ;;  %v2918_v46 = vld [vmem:[%s3948_s24] sm:$0xff]   ;;  %v2919_v7 = vld [vmem:[%s3949_s3 + $0x8] sm:$0xff]   ;;  %s3955_s30 = sld [smem:[#allocation43_spill]]  ;;  %s2521_s26 = sshll.u32 %s3422_s5, 8 }
 0x122   : > { %2539 = vmatprep.subr.bf16.mxu1 %v2908_v25  ;;  %v860_v50 = vld [vmem:[%s3859_s12] sm:$0x3]  ;;  %v2920_v15 = vld [vmem:[%s3949_s3 + $0x10] sm:$0xff]   ;;  %v2923_v22 = vld [vmem:[%s3949_s3 + $0x28] sm:$0xff]   ;;  %s3957_s19 = sld [smem:[#allocation44_spill]] }
 0x123   : > { %v865_v52 = vrot.slane %v860_v50, %v864_v49  ;;  %v869_v53 = vrot.slane %v860_v50, %v868_v51  ;;  %v2925_v24 = vld [vmem:[%s3949_s3 + $0x38] sm:$0xff]   ;;  %v2926_v25 = vld [vmem:[%s3950_s6] sm:$0xff]   ;;  %v2928_v50 = vld [vmem:[%s3950_s6 + $0x10] sm:$0xff]  }
 0x124   : > { %1028 = vmatpush1.bf16.msra.mxu0 %v2875_v9  ;;  %v2929_v51 = vld [vmem:[%s3950_s6 + $0x18] sm:$0xff]  }
 0x125   : > { %1029 = vmatprep.subr.bf16.mxu0 %v2876_v10  ;;  %2540 = vmatpush3.bf16.msra.mxu1 %v2909_v28  ;;  %v2425_v28 = vld [vmem:[%s3860_s13] ss:$0 sm:$0xff] }
 0x126   : > { %2541 = vmatprep.subr.bf16.mxu1 %v2910_v29  ;;  %s821_s1 = sand.u32 1, %s3954_s29   ;;  %s3278_s29 = smov [#allocation16]  }
 0x127   : > { %s2390_s8 = sshll.u32 %s821_s1, 4  ;;  %s3806_s5 = scalar_lea.sflag [#allocation4], %s821_s1 }
 0x128   : > { %1030 = vmatpush1.bf16.msra.mxu0 %v2878_v12  ;;  %s823_s0 = scalar_lea.vmem [#allocation16], %s2390_s8  ;;  %s3804_s4 = scalar_lea.hbm %s3957_s19, %s2521_s26 }
 0x129   : > { %1031 = vmatprep.subr.bf16.mxu0 %v2879_v14  ;;  %2542 = vmatpush3.bf16.msra.mxu1 %v2911_v32  ;;  %s2229_s24 = sshll.u32 %s823_s0, 4  ;;  %s3186_s8 = sshll.u32 %s3278_s29, 4  ;;  %s3799_s24 = int_to_ptr.vmem [resolvable:$true] %s2229_s24  ;;  %s3187_s8 = int_to_ptr.vmem [resolvable:$false] %s3186_s8 }
 0x12a   : > { %2543 = vmatprep.subr.bf16.mxu1 %v2912_v33  ;;  %s3188_s22 = scalar_lea.vmem %s3187_s8, 512  ;;  %p3189_p10 = scmp.lt.s32.totalorder %s3799_s24, %s3187_s8 }
 0x12c   : > { %1032 = vmatpush1.bf16.msra.mxu0 %v2881_v20  ;;  %v2921_v20 = vld [vmem:[%s3949_s3 + $0x18] sm:$0xff]  }
 0x12d   : > { %1033 = vmatprep.subr.bf16.mxu0 %v2882_v21  ;;  %2544 = vmatpush3.bf16.msra.mxu1 %v2913_v41  ;;  %v2922_v21 = vld [vmem:[%s3949_s3 + $0x20] sm:$0xff]  }
 0x12e   : > { %2545 = vmatprep.subr.bf16.mxu1 %v2914_v42 }
 0x130   : > { %1034 = vmatpush1.bf16.msra.mxu0 %v2884_v23  ;;  %v2924_v23 = vld [vmem:[%s3949_s3 + $0x30] sm:$0xff]  }
 0x131   : > { %1035 = vmatprep.subr.bf16.mxu0 %v2885_v26  ;;  %2546 = vmatpush3.bf16.msra.mxu1 %v2915_v43  ;;  %v2927_v26 = vld [vmem:[%s3950_s6 + $0x8] sm:$0xff]  }
 0x132   : > { %2547 = vmatprep.subr.bf16.mxu1 %v2916_v44 }
 0x134   : > { %1036 = vmatpush1.bf16.msra.mxu0 %v2887_v30 }
 0x135   : > { %1037 = vmatprep.subr.bf16.mxu0 %v2888_v31  ;;  %2548 = vmatpush3.bf16.msra.mxu1 %v2917_v45 }
 0x136   : > { %2619 = vmatprep.subr.bf16.mxu1 %v2918_v46 }
 0x138   : > { %1038 = vmatpush1.bf16.msra.mxu0 %v2890_v34 }
 0x139   : > { %1039 = vmatprep.subr.bf16.mxu0 %v2891_v35 }
 0x13c   : > { %1040 = vmatpush1.bf16.msra.mxu0 %v2893_v36 }
 0x13d   : > { %2422 = vmatprep.subr.msk.bf16.mxu0 %vm1012_vm1, %v2421_v37 }
 0x140   : > { %1042 = vmatpush1.bf16.msra.mxu0 %v1014_v27 }
 0x141   : > { %2639 = vmatprep.subr.bf16.mxu0 %v2926_v25 }
 0x143   : > { %1052 = vmatmul.mubr.bf16.vlgmr.msra.gmra.mrb[0].mxu0 %v2896_v38 }
 0x144   : > { %2424 = vmatprep.mubr.msk.bf16.mxu0 %vm1005_vm0, %v2899_v39  ;;  %2640 = vmatpush3.bf16.msra.mxu0 %v2926_v25  ;;  %v2937_v25 = vld [vmem:[#allocation8 + $0x18] sm:$0xff]  }
 0x145   : > { %2641 = vmatprep.subr.bf16.mxu0 %v2927_v26 }
 0x148   : > { %2642 = vmatpush3.bf16.msra.mxu0 %v2927_v26  ;;  %v2938_v26 = vld [vmem:[#allocation10] sm:$0xff]  }
 0x149   : > { %2643 = vmatprep.subr.bf16.mxu0 %v2928_v50 }
 0x14b   : > { %1062 = vmatmul.mubr.bf16.gmra.mrb[4].mxu0 %v2901_v40 }
 0x14c   : > { %2644 = vmatpush3.bf16.msra.mxu0 %v2928_v50 }
 0x14d   : > { %2645 = vmatprep.subr.bf16.mxu0 %v2929_v51 }
 0x150   : > { %2646 = vmatpush3.bf16.msra.mxu0 %v2929_v51 }
 0x216   : > { %v1053_v54 = vpop.f32.mrb[0].mxu0 }
 0x217   : > { %v1054_v55 = vadd.f32 %v1053_v54, %v865_v52  ;;  %v1055_v56 = vpop.f32.mrb[1].mxu0 }
 0x218   : > { %v1056_v57 = vadd.f32 %v1055_v56, %v869_v53  ;;  %v1057_v58 = vpop.f32.mrb[2].mxu0 }
 0x219   : > { %v1058_v59 = vadd.f32 %v1057_v58, %v865_v52  ;;  %v1059_v60 = vpop.f32.mrb[3].mxu0  ;;  %v1072_v62 = vmax.f32 %v1054_v55, 0.0 }
 0x21a   : > { %v1060_v61 = vadd.f32 %v1059_v60, %v869_v53  ;;  %v1073_v0 = vmax.f32 %v1056_v57, 0.0 }
 0x21b   : > { %v1074_v63 = vmax.f32 %v1058_v59, 0.0 }
 0x21c   : > { %v1075_v1 = vmax.f32 %v1060_v61, 0.0 }
 0x21d   : > { %v1080_v2 = vpack.c.bf16 %v1074_v63, %v1072_v62 }
 0x21e   : > { %v1063_v3 = vpop.f32.mrb[4].mxu0  ;;  %v1081_v4 = vpack.c.bf16 %v1075_v1, %v1073_v0 }
 0x21f   : > { %v1064_v5 = vadd.f32 %v1063_v3, %v865_v52  ;;  %v1065_v6 = vpop.f32.mrb[5].mxu0 }
 0x220   : > { %v1066_v8 = vadd.f32 %v1065_v6, %v869_v53  ;;  %v1067_v9 = vpop.f32.mrb[6].mxu0  ;;  %1251 = vmatprep.mubr.bf16.mxu1 %v1081_v4  ;;  %v2931_v4 = vld [vmem:[#allocation7 + $0x8] sm:$0xff]   ;;  %v2933_v6 = vld [vmem:[#allocation7 + $0x18] sm:$0xff]  }
 0x221   : > { %v1068_v10 = vadd.f32 %v1067_v9, %v865_v52  ;;  %v1069_v11 = vpop.f32.mrb[7].mxu0  ;;  %1252 = vmatmul.mubr.bf16.vlgmr.msra.gmra.mrb[0].mxu1 %v1080_v2  ;;  %v1076_v13 = vmax.f32 %v1064_v5, 0.0  ;;  %v2930_v52 = vld [vmem:[#allocation7] sm:$0xff]   ;;  %v2932_v5 = vld [vmem:[#allocation7 + $0x10] sm:$0xff]   ;;  %v2451_v9 = vld [vmem:[%s3862_s15] ss:$0 sm:$0xff] }
 0x222   : > { %v1070_v12 = vadd.f32 %v1069_v11, %v869_v53  ;;  %2620 = vmatpush3.bf16.msra.mxu1 %v2918_v46  ;;  %v1077_v16 = vmax.f32 %v1066_v8, 0.0  ;;  %2651 = vmatprep.subr.bf16.mxu0 %v2930_v52  ;;  %v2442_v53 = vld [vmem:[%s3861_s14] ss:$0 sm:$0xff] }
 0x223   : > { %v1078_v14 = vmax.f32 %v1068_v10, 0.0  ;;  %2621 = vmatprep.subr.bf16.mxu1 %v2919_v7  ;;  %v2935_v8 = vld [vmem:[#allocation8 + $0x8] sm:$0xff]  }
 0x224   : > { %v1079_v17 = vmax.f32 %v1070_v12, 0.0 }
 0x225   : > { %v1082_v18 = vpack.c.bf16 %v1078_v14, %v1076_v13 }
 0x226   : > { %v1083_v19 = vpack.c.bf16 %v1079_v17, %v1077_v16  ;;  %2622 = vmatpush3.bf16.msra.mxu1 %v2919_v7  ;;  %v2934_v7 = vld [vmem:[#allocation8] sm:$0xff]  }
 0x227   : > { %2623 = vmatprep.subr.bf16.mxu1 %v2920_v15 }
 0x228   : > { %1259 = vmatprep.mubr.bf16.mxu1 %v1083_v19 }
 0x229   : > { %1260 = vmatmul.mubr.bf16.gmra.mrb[4].mxu1 %v1082_v18 }
 0x22a   : > { %2624 = vmatpush3.bf16.msra.mxu1 %v2920_v15 }
 0x22b   : > { %2625 = vmatprep.subr.bf16.mxu1 %v2921_v20 }
 0x22e   : > { %2626 = vmatpush3.bf16.msra.mxu1 %v2921_v20 }
 0x22f   : > { %2627 = vmatprep.subr.bf16.mxu1 %v2922_v21 }
 0x232   : > { %2628 = vmatpush3.bf16.msra.mxu1 %v2922_v21 }
 0x233   : > { %2629 = vmatprep.subr.bf16.mxu1 %v2923_v22 }
 0x236   : > { %2630 = vmatpush3.bf16.msra.mxu1 %v2923_v22 }
 0x237   : > { %2631 = vmatprep.subr.bf16.mxu1 %v2924_v23 }
 0x23a   : > { %2632 = vmatpush3.bf16.msra.mxu1 %v2924_v23 }
 0x23b   : > { %2633 = vmatprep.subr.bf16.mxu1 %v2925_v24 }
 0x23e   : > { %2634 = vmatpush3.bf16.msra.mxu1 %v2925_v24  ;;  %v2936_v24 = vld [vmem:[#allocation8 + $0x10] sm:$0xff]  }
 0x23f   : > { %2663 = vmatprep.subr.bf16.mxu1 %v2934_v7 }
 0x2f4   : > { %v2549_v27 = vpop.f32.mrb[0].mxu1 }
 0x2f5   : > { %v2550_v29 = vpop.f32.mrb[1].mxu1 }
 0x2f6   : > { %v2551_v30 = vadd.f32 %v2550_v29, %v2549_v27  ;;  %v2552_v31 = vpop.f32.mrb[2].mxu1  ;;  %v2939_v27 = vld [vmem:[#allocation10 + $0x8] sm:$0xff]  }
 0x2f7   : > { %v2553_v32 = vpop.f32.mrb[3].mxu1 }
 0x2f8   : > { %v1254_v33 = vadd.f32 %v2551_v30, %v2425_v28  ;;  %v2554_v34 = vadd.f32 %v2553_v32, %v2552_v31 }
 0x2fa   : > { %v1257_v35 = vadd.f32 %v2554_v34, %v2425_v28  ;;  %v1268_v36 = vmax.f32 %v1254_v33, 0.0 }
 0x2fc   : > { %v1269_v37 = vmax.f32 %v1257_v35, 0.0  ;;  %v2555_v38 = vpop.f32.mrb[4].mxu1 }
 0x2fd   : > { %v2556_v39 = vpop.f32.mrb[5].mxu1 }
 0x2fe   : > { %v2557_v40 = vadd.f32 %v2556_v39, %v2555_v38  ;;  %v2558_v41 = vpop.f32.mrb[6].mxu1  ;;  %v1272_v42 = vpack.c.bf16 %v1269_v37, %v1268_v36 }
 0x2ff   : > { %v2559_v43 = vpop.f32.mrb[7].mxu1 }
 0x300   : > { %v1262_v44 = vadd.f32 %v2557_v40, %v2425_v28  ;;  %v2560_v45 = vadd.f32 %v2559_v43, %v2558_v41  ;;  %2635 = vmatprep.mubr.bf16.mxu1 %v1272_v42  ;;  %v2940_v43 = vld [vmem:[#allocation10 + $0x10] sm:$0xff]  }
 0x302   : > { %v1265_v46 = vadd.f32 %v2560_v45, %v2425_v28  ;;  %v1270_v47 = vmax.f32 %v1262_v44, 0.0  ;;  %v2458_v28 = vld [vmem:[%s3863_s16] ss:$0 sm:$0xff]  ;;  %v2941_v44 = vld [vmem:[#allocation10 + $0x18] sm:$0xff]   ;;  %v2942_v45 = vld [vmem:[#allocation11] sm:$0xff]  }
 0x304   : > { %v1271_v48 = vmax.f32 %v1265_v46, 0.0  ;;  %v2943_v46 = vld [vmem:[#allocation11 + $0x8] sm:$0xff]  }
 0x306   : > { %v1273_v49 = vpack.c.bf16 %v1271_v48, %v1270_v47  ;;  %v2465_v47 = vld [vmem:[%s3864_s17] ss:$0 sm:$0xff] }
 0x308   : > { %2636 = vmatmul.mubr.bf16.vlgmr.msra.gmra.mrb[8].mxu1 %v1273_v49 }
 0x309   : > { %2664 = vmatpush3.bf16.msra.mxu1 %v2934_v7 }
 0x30a   : > { %2665 = vmatprep.subr.bf16.mxu1 %v2935_v8 }
 0x30d   : > { %2666 = vmatpush3.bf16.msra.mxu1 %v2935_v8 }
 0x30e   : > { %2667 = vmatprep.subr.bf16.mxu1 %v2936_v24 }
 0x311   : > { %2668 = vmatpush3.bf16.msra.mxu1 %v2936_v24 }
 0x312   : > { %2669 = vmatprep.subr.bf16.mxu1 %v2937_v25 }
 0x315   : > { %2670 = vmatpush3.bf16.msra.mxu1 %v2937_v25 }
 0x316   : > { %2687 = vmatprep.subr.bf16.mxu1 %v2942_v45 }
 0x3db   : > { %v2637_v54 = vpop.f32.mrb[8].mxu1 }
 0x3dc   : > { %v1388_v55 = vadd.f32 %v2637_v54, %v2442_v53  ;;  %v1379_v56 = vpop.f32.mrb[9].mxu1 }
 0x3dd   : > { %v1380_v57 = vadd.f32 %v2442_v53, %v1379_v56  ;;  %v2638_v58 = vpop.f32.mrb[10].mxu1 }
 0x3de   : > { %v1391_v59 = vadd.f32 %v2638_v58, %v2442_v53  ;;  %v1382_v60 = vpop.f32.mrb[11].mxu1  ;;  %v1396_v62 = vmax.f32 %v1388_v55, 0.0 }
 0x3df   : > { %v1383_v61 = vadd.f32 %v2442_v53, %v1382_v60  ;;  %v1394_v0 = vmax.f32 %v1380_v57, 0.0 }
 0x3e0   : > { %v1397_v63 = vmax.f32 %v1391_v59, 0.0 }
 0x3e1   : > { %v1395_v1 = vmax.f32 %v1383_v61, 0.0 }
 0x3e2   : > { %v1399_v2 = vpack.c.bf16 %v1397_v63, %v1396_v62  ;;  %v2944_v62 = vld [vmem:[#allocation11 + $0x10] sm:$0xff]   ;;  %v2945_v63 = vld [vmem:[#allocation11 + $0x18] sm:$0xff]  }
 0x3e3   : > { %v1398_v3 = vpack.c.bf16 %v1395_v1, %v1394_v0  ;;  %v2946_v0 = vld [vmem:[%s3856_s9] sm:$0xff]   ;;  %v2947_v1 = vld [vmem:[%s3856_s9 + $0x8] sm:$0xff]  }
 0x3e5   : > { %2647 = vmatprep.mubr.msk.bf16.mxu0 %vm1439_vm2, %v1398_v3 }
 0x3e6   : > { %2648 = vmatmul.mubr.msk.bf16.vlgmr.msra.gmra.mrb[8].mxu0 %vm1439_vm2, %v1399_v2  ;;  %v2472_v2 = vld [vmem:[%s3865_s18] ss:$0 sm:$0xff] }
 0x3e7   : > { %2652 = vmatpush3.bf16.msra.mxu0 %v2930_v52 }
 0x3e8   : > { %2653 = vmatprep.subr.bf16.mxu0 %v2931_v4 }
 0x3eb   : > { %2654 = vmatpush3.bf16.msra.mxu0 %v2931_v4 }
 0x3ec   : > { %2655 = vmatprep.subr.bf16.mxu0 %v2932_v5 }
 0x3ef   : > { %2656 = vmatpush3.bf16.msra.mxu0 %v2932_v5 }
 0x3f0   : > { %2657 = vmatprep.subr.bf16.mxu0 %v2933_v6 }
 0x3f3   : > { %2658 = vmatpush3.bf16.msra.mxu0 %v2933_v6 }
 0x3f4   : > { %2675 = vmatprep.subr.bf16.mxu0 %v2938_v26 }
 0x4b9   : > { %v2649_v10 = vpop.f32.mrb[8].mxu0 }
 0x4ba   : > { %v1489_v11 = vadd.f32 %v2649_v10, %v2451_v9  ;;  %v1480_v12 = vpop.f32.mrb[9].mxu0 }
 0x4bb   : > { %v1481_v13 = vadd.f32 %v2451_v9, %v1480_v12  ;;  %v2650_v14 = vpop.f32.mrb[10].mxu0 }
 0x4bc   : > { %v1492_v15 = vadd.f32 %v2650_v14, %v2451_v9  ;;  %v1483_v16 = vpop.f32.mrb[11].mxu0  ;;  %v1497_v18 = vmax.f32 %v1489_v11, 0.0 }
 0x4bd   : > { %v1484_v17 = vadd.f32 %v2451_v9, %v1483_v16  ;;  %v1495_v20 = vmax.f32 %v1481_v13, 0.0 }
 0x4be   : > { %v1498_v19 = vmax.f32 %v1492_v15, 0.0 }
 0x4bf   : > { %v1496_v21 = vmax.f32 %v1484_v17, 0.0  ;;  %v2948_v17 = vld [vmem:[%s3856_s9 + $0x10] sm:$0xff]  }
 0x4c0   : > { %v1500_v22 = vpack.c.bf16 %v1498_v19, %v1497_v18  ;;  %v2949_v18 = vld [vmem:[%s3856_s9 + $0x18] sm:$0xff]  }
 0x4c1   : > { %v1499_v23 = vpack.c.bf16 %v1496_v21, %v1495_v20  ;;  %v2950_v19 = vld [vmem:[#allocation13] sm:$0xff]   ;;  %v2951_v20 = vld [vmem:[#allocation13 + $0x8] sm:$0xff]  }
 0x4c2   : > { %v2479_v21 = vld [vmem:[%s3951_s21] ss:$0 sm:$0xff]  ;;  %s3956_s21 = sld [smem:[#allocation29_spill]] }
 0x4c3   : > { %2659 = vmatprep.mubr.msk.bf16.mxu0 %vm1439_vm2, %v1499_v23 }
 0x4c4   : > { %2660 = vmatmul.mubr.msk.bf16.vlgmr.msra.gmra.mrb[12].mxu0 %vm1439_vm2, %v1500_v22 }
 0x4c5   : > { %2676 = vmatpush3.bf16.msra.mxu0 %v2938_v26 }
 0x4c6   : > { %2677 = vmatprep.subr.bf16.mxu0 %v2939_v27 }
 0x4c8   : > { %p3958_p9 = scmp.ne.s32.totalorder %s3956_s21, 0 }
 0x4c9   : > { %2678 = vmatpush3.bf16.msra.mxu0 %v2939_v27 }
 0x4ca   : > { %2679 = vmatprep.subr.bf16.mxu0 %v2940_v43 }
 0x4cd   : > { %2680 = vmatpush3.bf16.msra.mxu0 %v2940_v43 }
 0x4ce   : > { %2681 = vmatprep.subr.bf16.mxu0 %v2941_v44 }
 0x4d1   : > { %2682 = vmatpush3.bf16.msra.mxu0 %v2941_v44 }
 0x4d2   : > { %2699 = vmatprep.subr.bf16.mxu0 %v2946_v0 }
 0x597   : > { %v2661_v29 = vpop.f32.mrb[12].mxu0 }
 0x598   : > { %v1589_v30 = vadd.f32 %v2661_v29, %v2458_v28  ;;  %v1580_v31 = vpop.f32.mrb[13].mxu0 }
 0x599   : > { %v1581_v32 = vadd.f32 %v2458_v28, %v1580_v31  ;;  %v2662_v33 = vpop.f32.mrb[14].mxu0 }
 0x59a   : > { %v1592_v34 = vadd.f32 %v2662_v33, %v2458_v28  ;;  %v1583_v35 = vpop.f32.mrb[15].mxu0  ;;  %v1597_v37 = vmax.f32 %v1589_v30, 0.0 }
 0x59b   : > { %v1584_v36 = vadd.f32 %v2458_v28, %v1583_v35  ;;  %v1595_v39 = vmax.f32 %v1581_v32, 0.0 }
 0x59c   : > { %v1598_v38 = vmax.f32 %v1592_v34, 0.0 }
 0x59d   : > { %v1596_v40 = vmax.f32 %v1584_v36, 0.0  ;;  %v2952_v36 = vld [vmem:[#allocation13 + $0x10] sm:$0xff]  }
 0x59e   : > { %v1600_v41 = vpack.c.bf16 %v1598_v38, %v1597_v37  ;;  %v2953_v37 = vld [vmem:[#allocation13 + $0x18] sm:$0xff]   ;;  %v2954_v38 = vld [vmem:[#allocation14] sm:$0xff]  }
 0x59f   : > { %v1599_v42 = vpack.c.bf16 %v1596_v40, %v1595_v39  ;;  %v2955_v39 = vld [vmem:[#allocation14 + $0x8] sm:$0xff]  }
 0x5a0   : > { %v2486_v40 = vld [vmem:[%s3952_s20] ss:$0 sm:$0xff] }
 0x5a1   : > { %2671 = vmatprep.mubr.msk.bf16.mxu1 %vm1439_vm2, %v1599_v42 }
 0x5a2   : > { %2672 = vmatmul.mubr.msk.bf16.vlgmr.msra.gmra.mrb[12].mxu1 %vm1439_vm2, %v1600_v41 }
 0x5a3   : > { %2688 = vmatpush3.bf16.msra.mxu1 %v2942_v45 }
 0x5a4   : > { %2689 = vmatprep.subr.bf16.mxu1 %v2943_v46 }
 0x5a7   : > { %2690 = vmatpush3.bf16.msra.mxu1 %v2943_v46 }
 0x5a8   : > { %2691 = vmatprep.subr.bf16.mxu1 %v2944_v62 }
 0x5ab   : > { %2692 = vmatpush3.bf16.msra.mxu1 %v2944_v62 }
 0x5ac   : > { %2693 = vmatprep.subr.bf16.mxu1 %v2945_v63 }
 0x5af   : > { %2694 = vmatpush3.bf16.msra.mxu1 %v2945_v63 }
 0x5b0   : > { %2711 = vmatprep.subr.bf16.mxu1 %v2950_v19 }
 0x675   : > { %v2673_v48 = vpop.f32.mrb[12].mxu1 }
 0x676   : > { %v1689_v49 = vadd.f32 %v2673_v48, %v2465_v47  ;;  %v1680_v50 = vpop.f32.mrb[13].mxu1 }
 0x677   : > { %v1681_v51 = vadd.f32 %v2465_v47, %v1680_v50  ;;  %v2674_v52 = vpop.f32.mrb[14].mxu1 }
 0x678   : > { %v1692_v53 = vadd.f32 %v2674_v52, %v2465_v47  ;;  %v1683_v54 = vpop.f32.mrb[15].mxu1  ;;  %v1697_v56 = vmax.f32 %v1689_v49, 0.0 }
 0x679   : > { %v1684_v55 = vadd.f32 %v2465_v47, %v1683_v54  ;;  %v1695_v58 = vmax.f32 %v1681_v51, 0.0 }
 0x67a   : > { %v1698_v57 = vmax.f32 %v1692_v53, 0.0 }
 0x67b   : > { %v1696_v59 = vmax.f32 %v1684_v55, 0.0  ;;  %v2956_v55 = vld [vmem:[#allocation14 + $0x10] sm:$0xff]  }
 0x67c   : > { %v1700_v60 = vpack.c.bf16 %v1698_v57, %v1697_v56  ;;  %v2957_v56 = vld [vmem:[#allocation14 + $0x18] sm:$0xff]   ;;  %v2493_v57 = vld [vmem:[%s3953_s7] ss:$0 sm:$0xff]  ;;  %s3182_s7 = scalar_lea.vmem %s3799_s24, 256 }
 0x67d   : > { %v1699_v61 = vpack.c.bf16 %v1696_v59, %v1695_v58  ;;  %p3183_p6 = scmp.ne.s32.totalorder %s3799_s24, %s3182_s7  ;;  %p3190_p2 = scmp.lt.s32.totalorder %s3188_s22, %s3182_s7 }
 0x67f   : > { %2683 = vmatprep.mubr.msk.bf16.mxu0 %vm1439_vm2, %v1699_v61  ;;  %p3184_p5 = pnand %p3183_p6, %p3958_p9  ;;  %p3191_p3 = por %p3190_p2, %p3189_p10 }
 0x680   : > { %2684 = vmatmul.mubr.msk.bf16.vlgmr.msra.gmra.mrb[16].mxu0 %vm1439_vm2, %v1700_v60 }
 0x681   : > { %2700 = vmatpush3.bf16.msra.mxu0 %v2946_v0  ;;  %p3185_p0 = pneg %p3184_p5 }
 0x682   : > { %2701 = vmatprep.subr.bf16.mxu0 %v2947_v1 }
 0x683   : > { %p3192_p4 = pnand %p3191_p3, %p3185_p0 }
 0x685   : > { %2702 = vmatpush3.bf16.msra.mxu0 %v2947_v1 }
 0x686   : > { %2703 = vmatprep.subr.bf16.mxu0 %v2948_v17 }
 0x689   : > { %2704 = vmatpush3.bf16.msra.mxu0 %v2948_v17 }
 0x68a   : > { %2705 = vmatprep.subr.bf16.mxu0 %v2949_v18 }
 0x68d   : > { %2706 = vmatpush3.bf16.msra.mxu0 %v2949_v18 }
 0x68e   : > { %2723 = vmatprep.subr.bf16.mxu0 %v2954_v38 }
 0x753   : > { %v2685_v3 = vpop.f32.mrb[16].mxu0 }
 0x754   : > { %v1789_v4 = vadd.f32 %v2685_v3, %v2472_v2  ;;  %v1780_v5 = vpop.f32.mrb[17].mxu0 }
 0x755   : > { %v1781_v6 = vadd.f32 %v2472_v2, %v1780_v5  ;;  %v2686_v7 = vpop.f32.mrb[18].mxu0 }
 0x756   : > { %v1792_v8 = vadd.f32 %v2686_v7, %v2472_v2  ;;  %v1783_v9 = vpop.f32.mrb[19].mxu0  ;;  %v1797_v11 = vmax.f32 %v1789_v4, 0.0 }
 0x757   : > { %v1784_v10 = vadd.f32 %v2472_v2, %v1783_v9  ;;  %v1795_v13 = vmax.f32 %v1781_v6, 0.0  ;;  %v2500_v9 = vld [vmem:[%s3955_s30] ss:$0 sm:$0xff] }
 0x758   : > { %v1798_v12 = vmax.f32 %v1792_v8, 0.0 }
 0x759   : > { %v1796_v14 = vmax.f32 %v1784_v10, 0.0 }
 0x75a   : > { %v1800_v15 = vpack.c.bf16 %v1798_v12, %v1797_v11 }
 0x75b   : > { %v1799_v16 = vpack.c.bf16 %v1796_v14, %v1795_v13 }
 0x75d   : > { %2695 = vmatprep.mubr.msk.bf16.mxu1 %vm1439_vm2, %v1799_v16 }
 0x75e   : > { %2696 = vmatmul.mubr.msk.bf16.vlgmr.msra.gmra.mrb[16].mxu1 %vm1439_vm2, %v1800_v15 }
 0x75f   : > { %2712 = vmatpush3.bf16.msra.mxu1 %v2950_v19 }
 0x760   : > { %2713 = vmatprep.subr.bf16.mxu1 %v2951_v20 }
 0x763   : > { %2714 = vmatpush3.bf16.msra.mxu1 %v2951_v20 }
 0x764   : > { %2715 = vmatprep.subr.bf16.mxu1 %v2952_v36 }
 0x767   : > { %2716 = vmatpush3.bf16.msra.mxu1 %v2952_v36 }
 0x768   : > { %2717 = vmatprep.subr.bf16.mxu1 %v2953_v37 }
 0x76b   : > { %2718 = vmatpush3.bf16.msra.mxu1 %v2953_v37 }
 0x831   : > { %v2697_v22 = vpop.f32.mrb[16].mxu1 }
 0x832   : > { %v1889_v23 = vadd.f32 %v2697_v22, %v2479_v21  ;;  %v1880_v24 = vpop.f32.mrb[17].mxu1 }
 0x833   : > { %v1881_v25 = vadd.f32 %v2479_v21, %v1880_v24  ;;  %v2698_v26 = vpop.f32.mrb[18].mxu1 }
 0x834   : > { %v1892_v27 = vadd.f32 %v2698_v26, %v2479_v21  ;;  %v1883_v28 = vpop.f32.mrb[19].mxu1  ;;  %v1897_v30 = vmax.f32 %v1889_v23, 0.0 }
 0x835   : > { %v1884_v29 = vadd.f32 %v2479_v21, %v1883_v28  ;;  %v1895_v32 = vmax.f32 %v1881_v25, 0.0 }
 0x836   : > { %v1898_v31 = vmax.f32 %v1892_v27, 0.0 }
 0x837   : > { %v1896_v33 = vmax.f32 %v1884_v29, 0.0 }
 0x838   : > { %v1900_v34 = vpack.c.bf16 %v1898_v31, %v1897_v30 }
 0x839   : > { %v1899_v35 = vpack.c.bf16 %v1896_v33, %v1895_v32 }
 0x83b   : > { %2707 = vmatprep.mubr.msk.bf16.mxu0 %vm1439_vm2, %v1899_v35 }
 0x83c   : > { %2708 = vmatmul.mubr.msk.bf16.vlgmr.msra.gmra.mrb[20].mxu0 %vm1439_vm2, %v1900_v34 }
 0x83d   : > { %2724 = vmatpush3.bf16.msra.mxu0 %v2954_v38 }
 0x83e   : > { %2725 = vmatprep.subr.bf16.mxu0 %v2955_v39 }
 0x841   : > { %2726 = vmatpush3.bf16.msra.mxu0 %v2955_v39 }
 0x842   : > { %2727 = vmatprep.subr.bf16.mxu0 %v2956_v55 }
 0x845   : > { %2728 = vmatpush3.bf16.msra.mxu0 %v2956_v55 }
 0x846   : > { %2729 = vmatprep.subr.bf16.mxu0 %v2957_v56 }
 0x849   : > { %2730 = vmatpush3.bf16.msra.mxu0 %v2957_v56 }
 0x90f   : > { %v2709_v41 = vpop.f32.mrb[20].mxu0 }
 0x910   : > { %v1989_v42 = vadd.f32 %v2709_v41, %v2486_v40  ;;  %v1980_v43 = vpop.f32.mrb[21].mxu0 }
 0x911   : > { %v1981_v44 = vadd.f32 %v2486_v40, %v1980_v43  ;;  %v2710_v45 = vpop.f32.mrb[22].mxu0 }
 0x912   : > { %v1992_v46 = vadd.f32 %v2710_v45, %v2486_v40  ;;  %v1983_v47 = vpop.f32.mrb[23].mxu0  ;;  %v1997_v49 = vmax.f32 %v1989_v42, 0.0 }
 0x913   : > { %v1984_v48 = vadd.f32 %v2486_v40, %v1983_v47  ;;  %v1995_v51 = vmax.f32 %v1981_v44, 0.0 }
 0x914   : > { %v1998_v50 = vmax.f32 %v1992_v46, 0.0 }
 0x915   : > { %v1996_v52 = vmax.f32 %v1984_v48, 0.0 }
 0x916   : > { %v2000_v53 = vpack.c.bf16 %v1998_v50, %v1997_v49 }
 0x917   : > { %v1999_v54 = vpack.c.bf16 %v1996_v52, %v1995_v51 }
 0x919   : > { %2719 = vmatprep.mubr.msk.bf16.mxu1 %vm1439_vm2, %v1999_v54 }
 0x91a   : > { %2720 = vmatmul.mubr.msk.bf16.vlgmr.msra.gmra.mrb[20].mxu1 %vm1439_vm2, %v2000_v53 }
 0x9ed   : > { %v2721_v58 = vpop.f32.mrb[20].mxu1 }
 0x9ee   : > { %v2089_v59 = vadd.f32 %v2721_v58, %v2493_v57  ;;  %v2080_v60 = vpop.f32.mrb[21].mxu1 }
 0x9ef   : > { %v2081_v61 = vadd.f32 %v2493_v57, %v2080_v60  ;;  %v2722_v62 = vpop.f32.mrb[22].mxu1 }
 0x9f0   : > { %v2092_v63 = vadd.f32 %v2722_v62, %v2493_v57  ;;  %v2083_v0 = vpop.f32.mrb[23].mxu1  ;;  %v2097_v2 = vmax.f32 %v2089_v59, 0.0 }
 0x9f1   : > { %v2084_v1 = vadd.f32 %v2493_v57, %v2083_v0  ;;  %v2095_v4 = vmax.f32 %v2081_v61, 0.0 }
 0x9f2   : > { %v2098_v3 = vmax.f32 %v2092_v63, 0.0 }
 0x9f3   : > { %v2096_v5 = vmax.f32 %v2084_v1, 0.0 }
 0x9f4   : > { %v2100_v6 = vpack.c.bf16 %v2098_v3, %v2097_v2 }
 0x9f5   : > { %v2099_v7 = vpack.c.bf16 %v2096_v5, %v2095_v4 }
 0x9f7   : > { %2731 = vmatprep.mubr.msk.bf16.mxu0 %vm1439_vm2, %v2099_v7 }
 0x9f8   : > { %2732 = vmatmul.mubr.msk.bf16.vlgmr.msra.gmra.mrb[24].mxu0 %vm1439_vm2, %v2100_v6 }
 0xacb   : > { %v2733_v8 = vpop.f32.mrb[24].mxu0 }
 0xacc   : > { %v2180_v10 = vpop.f32.mrb[25].mxu0  ;;  %v2189_v12 = vadd.f32 %v2733_v8, %v2500_v9 }
 0xacd   : > { %v2734_v11 = vpop.f32.mrb[26].mxu0  ;;  %v2181_v15 = vadd.f32 %v2500_v9, %v2180_v10 }
 0xace   : > { %v2192_v13 = vadd.f32 %v2734_v11, %v2500_v9  ;;  %v2183_v14 = vpop.f32.mrb[27].mxu0 }
 0xacf   : > { %v2184_v16 = vadd.f32 %v2500_v9, %v2183_v14 }
 0xad0   : > { %v2530_v17 = vpack.c.bf16 %v2192_v13, %v2189_v12 }
 0xad1   : > { %v2525_v18 = vpack.c.bf16 %v2184_v16, %v2181_v15 }
 0xad2   : > { %2532 = vst [vmem:[%s823_s0 + $0x8] sm:$0xff] %v2530_v17  }
 0xad3   : > { %2526 = vst [vmem:[%s823_s0] sm:$0xff] %v2525_v18  }
 0xad4   : > { %3195 = shalt.err (!%p3192_p4)
}
 0xad5   : > { %s3196_s1 = scalar_lea.hbm %s3804_s4, 256  ;;  %s3200_s0 = scalar_lea.hbm %s3957_s19, 512 }
 0xad6   : > { %p3197_p12 = scmp.ne.s32.totalorder %s3804_s4, %s3196_s1  ;;  %p3201_p11 = scmp.lt.u32.totalorder %s3804_s4, %s3957_s19 }
 0xad7   : > { %p3202_p13 = scmp.lt.u32.totalorder %s3200_s0, %s3196_s1  ;;  %p3204_p6 = scmp.lt.u32.totalorder %s3196_s1, %s3804_s4 }
 0xad8   : > { %p3198_p7 = pnand %p3197_p12, %p3958_p9 }
 0xad9   : > { %p3203_p1 = por %p3202_p13, %p3201_p11 }
 0xada   : > { %p3199_p8 = pneg %p3198_p7 }
 0xadb   : > { %p3205_p5 = por %p3204_p6, %p3203_p1 }
 0xadd   : > { %p3206_p0 = pnand %p3205_p5, %p3199_p8 }
 0xadf   : > { %3209 = shalt.err (!%p3206_p0)
}
 0xae0   : > { %s3279_s20 = smov 64   ;;  %s3280_s7 = smov 4  }
 0xae1   : > { %2767 = dma.vmem_to_hbm [thread:$0]  (%p3958_p9), %s3799_s24, 256, %s3804_s4, %s3806_s5, %s3279_s20, %s3279_s20, %s3280_s7  }
 0xae2 PF: > { %s3959_s29 = sld [smem:[#allocation26_spill]]  ;;  %s3960_s8 = sld [smem:[#allocation23_spill]] }
 0xae3   : > { %s3961_s22 = sld [smem:[#allocation30_spill]] }
 0xae8   : > { %p2814_p10 = scmp.ge.s32.totalorder %s3959_s29, 2  ;;  %s2244_s23 = sand.u32 1, %s3960_s8  }
 0xae9   : > { %p3962_p2 = scmp.ne.s32.totalorder %s3961_s22, 0  ;;  %s2245_s1 = scalar_lea.sflag [#allocation4], %s2244_s23 }
 0xaeb   : > { %p2795_p3 = pnand %p2814_p10, %p3962_p2 }
 0xaed   : > { %3247 = dma.done.wait (!%p2795_p3), %s2245_s1, 256  }
 0xaee   : > { %3249 = vsyncadd (!%p2795_p3), %s2245_s1, 4294967040  ;;  %s3963_s30 = sld [smem:[#allocation27_spill]]  ;;  %s3964_s4 = sld [smem:[#allocation24_spill]] }
 0xaef   : > { %s3965_s0 = sld [smem:[#allocation25_spill]]  ;;  %s3966_s24 = sld [smem:[#allocation28_spill]] }
 0xaf4   : > { %s3967_s26 = smov %s3963_s30  ;;  %p38_p4 = scmp.ge.s32.totalorder %s3963_s30, 4  }
 0xaf5   : > { %s3968_s30 = smov %s3965_s0  ;;  %3969 = sst [smem:[#allocation23_spill]] %s3967_s26 }
 0xaf6   :  { %40 = sbr.rel (!%p38_p4) target bundleno = 24 (0x18), region = 180 }
 0xafd   :  { %2250 = vsyncpa [#allocation3], 1 }
 0xafe   :  { %2252 = vsyncpa [#allocation3 + $0x1], 1 }
 0xaff   :  { %2253 = vsyncpa [#allocation6], 1 }
 0xb00   :  { %2254 = vsyncpa [#allocation9], 1 }
 0xb01   :  { %2255 = vsyncpa [#allocation12], 1 }
 0xb02   :  { %2256 = vsyncpa [#allocation15], 1 }
 0xb03   :  { %2257 = vsyncpa [#allocation4], 1 }
 0xb04   :  { %2259 = vsyncpa [#allocation4 + $0x1], 1 }

// kernel: tpu_custom_call.1
= control target key start
LH: loop header
LB: loop body
LE: loop exit
PB: predicated region body
PF: predicated region fallthrough
CT: control target
= control target key end

     0   :  { %s3847_s0 = inlined_call_operand.vmem [shape: bf16[64,184], index: 0, kind: input, shape index: {}]   ;;  %s3848_s1 = inlined_call_operand.hbm [shape: bf16[184,256], index: 1, kind: input, shape index: {}]   ;;  %s3849_s2 = inlined_call_operand.hbm [shape: bf16[256,128], index: 2, kind: input, shape index: {}]   ;;  %s3850_s3 = inlined_call_operand.vmem [shape: bf16[128,64], index: 3, kind: input, shape index: {}]   ;;  %s3851_s4 = inlined_call_operand.vmem [shape: bf16[64,64], index: 4, kind: input, shape index: {}]   ;;  %s3852_s5 = inlined_call_operand.hbm [shape: bf16[64,64], index: 5, kind: input, shape index: {}]   ;;  %s3853_s6 = inlined_call_operand.hbm [shape: bf16[64,64], index: 6, kind: input, shape index: {}]   ;;  %s3854_s7 = inlined_call_operand.hbm [shape: bf16[64,64], index: 7, kind: input, shape index: {}]   ;;  %s3855_s8 = inlined_call_operand.hbm [shape: bf16[64,64], index: 8, kind: input, shape index: {}]   ;;  %s3856_s9 = inlined_call_operand.vmem [shape: bf16[64,64], index: 9, kind: input, shape index: {}]   ;;  %s3857_s10 = inlined_call_operand.hbm [shape: bf16[64,64], index: 10, kind: input, shape index: {}]   ;;  %s3858_s11 = inlined_call_operand.hbm [shape: bf16[64,128], index: 11, kind: input, shape index: {}]   ;;  %s3859_s12 = inlined_call_operand.vmem [shape: f32[1,256], index: 12, kind: input, shape index: {}]   ;;  %s3860_s13 = inlined_call_operand.vmem [shape: f32[1,128], index: 13, kind: input, shape index: {}]   ;;  %s3861_s14 = inlined_call_operand.vmem [shape: f32[1,64], index: 14, kind: input, shape index: {}]   ;;  %s3862_s15 = inlined_call_operand.vmem [shape: f32[1,64], index: 15, kind: input, shape index: {}]   ;;  %s3863_s16 = inlined_call_operand.vmem [shape: f32[1,64], index: 16, kind: input, shape index: {}]   ;;  %s3864_s17 = inlined_call_operand.vmem [shape: f32[1,64], index: 17, kind: input, shape index: {}]   ;;  %s3865_s18 = inlined_call_operand.vmem [shape: f32[1,64], index: 18, kind: input, shape index: {}]   ;;  %s3866_s19 = inlined_call_operand.vmem [shape: f32[1,64], index: 19, kind: input, shape index: {}]   ;;  %s3867_s20 = inlined_call_operand.vmem [shape: f32[1,64], index: 20, kind: input, shape index: {}]   ;;  %s3868_s21 = inlined_call_operand.vmem [shape: f32[1,64], index: 21, kind: input, shape index: {}]   ;;  %s3869_s22 = inlined_call_operand.vmem [shape: f32[1,128], index: 22, kind: input, shape index: {}]   ;;  %s3870_s23 = inlined_call_operand.hbm [shape: bf16[64,128], index: 23, kind: output, shape index: {}]  }
   0x1   :  { %3897 = sst [smem:[#allocation31_spill]] %s3847_s0 }
   0x2   :  { %3898 = sst [smem:[#allocation32_spill]] %s3848_s1 }
   0x3   :  { %3899 = sst [smem:[#allocation33_spill]] %s3849_s2 }
   0x4   :  { %3900 = sst [smem:[#allocation34_spill]] %s3850_s3 }
   0x5   :  { %3901 = sst [smem:[#allocation35_spill]] %s3851_s4 }
   0x6   :  { %3902 = sst [smem:[#allocation36_spill]] %s3852_s5 }
   0x7   :  { %3903 = sst [smem:[#allocation37_spill]] %s3853_s6 }
   0x8   :  { %3904 = sst [smem:[#allocation38_spill]] %s3854_s7 }
   0x9   :  { %3905 = sst [smem:[#allocation39_spill]] %s3855_s8 }
   0xa   :  { %3906 = sst [smem:[#allocation40_spill]] %s3866_s19 }
   0xb   :  { %3907 = sst [smem:[#allocation41_spill]] %s3867_s20 }
   0xc   :  { %3908 = sst [smem:[#allocation42_spill]] %s3868_s21 }
   0xd   :  { %3909 = sst [smem:[#allocation43_spill]] %s3869_s22 }
   0xe   :  { %3910 = sst [smem:[#allocation44_spill]] %s3870_s23 }
   0xf   :  { %28 = vsyncpa [#allocation3], 0 }
  0x10   :  { %29 = vsyncpa [#allocation6], 0 }
  0x11   :  { %30 = vsyncpa [#allocation9], 0 }
  0x12   :  { %31 = vsyncpa [#allocation12], 0 }
  0x13   :  { %32 = vsyncpa [#allocation15], 0 }
  0x14   :  { %33 = vsyncpa [#allocation4], 0 }
  0x15   :  { %35 = vsyncpa [#allocation4 + $0x1], 0  ;;  %s3401_s4 = smov 0   ;;  %s3403_s30 = smov 0  }
  0x16   :  { %s3405_s24 = smov 0   ;;  %s3407_s25 = smov 0  }
  0x17   :  { %3911 = sst [smem:[#allocation23_spill]] %s3407_s25 }
  0x18 LB: > { %s3913_s25 = sld [smem:[#allocation23_spill]]  ;;  %3915 = sst [smem:[#allocation24_spill]] %s3256_s30  ;;  %s3260_s24 = sphi %s3405_s24, %s3966_s24   ;;  %s3256_s30 = sphi %s3403_s30, %s3968_s30   ;;  %s3252_s4 = sphi %s3401_s4, %s3964_s4  }
  0x19   : > { %3914 = sst [smem:[#allocation23_spill]] %s3252_s4  ;;  %s536_s2 = sadd.s32 1, %s3260_s24 }
  0x1a   : > { %3916 = sst [smem:[#allocation25_spill]] %s3260_s24  ;;  %p546_p0 = scmp.ne.s32.totalorder %s3260_s24, %s3256_s30 }
  0x1b   : > { %p552_p3 = scmp.ne.s32.totalorder %s3256_s30, %s3252_s4  ;;  %s3266_s3 = smov [#allocation5]  }
  0x1c   : > { %s585_s0 = sshll.u32 %s3266_s3, 4  ;;  %s3926_s3 = sld [smem:[#allocation33_spill]]  ;;  %s3456_s0 = int_to_ptr.vmem [resolvable:$true] %s585_s0 }
  0x1e   : > { %3917 = sst [smem:[#allocation26_spill]] %s3913_s25  ;;  %s3422_s5 = sadd.s32 4294967295, %s3913_s25  }
  0x1f   : > { %s2370_s1 = sadd.s32 4294967294, %s3913_s25   ;;  %s3426_s26 = sadd.s32 1, %s3913_s25  }
  0x20   : > { %3918 = sst [smem:[#allocation27_spill]] %s3426_s26  ;;  %s533_s6 = ssub.s32 %s3913_s25, %s3426_s26 }
  0x21   : > { %p534_p1 = scmp.eq.s32.totalorder %s533_s6, 0  ;;  %p547_p2 = scmp.eq.s32.totalorder %s3422_s5, 1 }
  0x22   : > { %p553_p4 = scmp.eq.s32.totalorder %s2370_s1, 1  ;;  %p2371_p7 = scmp.ge.s32.totalorder %s3913_s25, 1 }
  0x23   : > { %s3437_s27 = scalar_select %p534_p1, %s3260_s24, %s536_s2  }
  0x24   : > { %p3439_p5 = por %p547_p2, %p546_p0  ;;  %p3443_p6 = por %p553_p4, %p552_p3 }
  0x25   : > { %3919 = sst [smem:[#allocation28_spill]] %s3437_s27  ;;  %p560_p8 = scmp.lt.s32.totalorder %s3913_s25, 3 }
  0x26   : > { %s3920_s7 = scalar_select %p3439_p5, 1, 0 }
  0x27   : > { %s3922_s28 = scalar_select %p3443_p6, 1, 0 }
  0x28   : > { %3921 = sst [smem:[#allocation29_spill]] %s3920_s7  ;;  %p3887_p9 = scmp.eq.s32.totalorder %s3422_s5, 0 }
  0x29   : > { %3923 = sst [smem:[#allocation30_spill]] %s3922_s28  ;;  %p3450_p10 = pnand %p2371_p7, %p560_p8 }
  0x2a   : > { %s3267_s2 = smov [#allocation8]   ;;  %s3268_s27 = smov [#allocation11]  }
  0x2b   : > { %s3924_s29 = scalar_select %p3450_p10, 1, 0 }
  0x2c   : > { %p2769_p11 = pneg %p3450_p10  ;;  %s617_s6 = sshll.u32 %s3267_s2, 4  ;;  %s3464_s6 = int_to_ptr.vmem [resolvable:$true] %s617_s6 }
  0x2d   : > { %s3466_s24 = sshll.u32 %s3268_s27, 4  ;;  %s2958_s4 = scalar_lea.hbm %s3926_s3, 2048  ;;  %s644_s24 = int_to_ptr.vmem [resolvable:$true] %s3466_s24 }
  0x2e   : > { %p3460_p12 = pnand %p3887_p9, %p2769_p11  ;;  %p2959_p13 = scmp.ne.s32.totalorder %s3926_s3, %s2958_s4 }
  0x2f   : > { %p2965_p3 = scmp.lt.u32.totalorder %s2958_s4, %s3926_s3 }
  0x30   : > { %p3476_p0 = pneg %p3460_p12 }
  0x32   : > { %p2961_p1 = pnand %p3476_p0, %p2959_p13 }
  0x34   : > { %p2962_p2 = pneg %p2961_p1 }
  0x36   : > { %p2967_p4 = pnand %p2965_p3, %p2962_p2 }
  0x38   : > { %2970 = shalt.err (!%p2967_p4)
}
  0x39   : > { %s2971_s23 = scalar_lea.vmem %s3456_s0, 2048  ;;  %p2979_p9 = scmp.lt.s32.totalorder %s3456_s0, %s3456_s0 }
  0x3a   : > { %p2972_p7 = scmp.ne.s32.totalorder %s3456_s0, %s2971_s23  ;;  %p2980_p6 = scmp.lt.s32.totalorder %s2971_s23, %s2971_s23 }
  0x3c   : > { %p2974_p8 = pnand %p2972_p7, %p3476_p0  ;;  %p2981_p13 = por %p2980_p6, %p2979_p9 }
  0x3e   : > { %p2975_p11 = pneg %p2974_p8 }
  0x40   : > { %p2982_p1 = pnand %p2981_p13, %p2975_p11 }
  0x42   : > { %2985 = shalt.err (!%p2982_p1)
}
  0x43   : > { %s3892_s25 = smov 64   ;;  %s3894_s4 = smov 4  }
  0x44   : > { %2775 = dma.hbm_to_vmem [thread:$0]  (!%p3460_p12), %s3926_s3, 2048, %s3456_s0, [#allocation6], %s3892_s25, %s3892_s25, %s3894_s4  }
  0x45   : > { %s3928_s22 = sld [smem:[#allocation37_spill]] }
  0x4b   : > { %s2986_s23 = scalar_lea.hbm %s3928_s22, 512 }
  0x4c   : > { %p2987_p6 = scmp.ne.s32.totalorder %s3928_s22, %s2986_s23  ;;  %p2993_p3 = scmp.lt.u32.totalorder %s2986_s23, %s3928_s22 }
  0x4e   : > { %p2989_p9 = pnand %p2987_p6, %p3476_p0 }
  0x50   : > { %p2990_p2 = pneg %p2989_p9 }
  0x52   : > { %p2995_p4 = pnand %p2993_p3, %p2990_p2 }
  0x54   : > { %2998 = shalt.err (!%p2995_p4)
}
  0x55   : > { %s2999_s0 = scalar_lea.vmem %s3464_s6, 512  ;;  %p3007_p13 = scmp.lt.s32.totalorder %s3464_s6, %s3464_s6 }
  0x56   : > { %p3000_p7 = scmp.ne.s32.totalorder %s3464_s6, %s2999_s0  ;;  %p3008_p1 = scmp.lt.s32.totalorder %s2999_s0, %s2999_s0 }
  0x58   : > { %p3002_p8 = pnand %p3000_p7, %p3476_p0  ;;  %p3009_p6 = por %p3008_p1, %p3007_p13 }
  0x5a   : > { %p3003_p11 = pneg %p3002_p8 }
  0x5c   : > { %p3010_p9 = pnand %p3009_p6, %p3003_p11 }
  0x5e   : > { %3013 = shalt.err (!%p3010_p9)
}
  0x5f   : > { %2781 = dma.hbm_to_vmem [thread:$0]  (!%p3460_p12), %s3928_s22, 512, %s3464_s6, [#allocation9], %s3892_s25, %s3892_s25, %s3894_s4  }
  0x60   : > { %s3929_s8 = sld [smem:[#allocation39_spill]] }
  0x66   : > { %s3014_s26 = scalar_lea.hbm %s3929_s8, 512 }
  0x67   : > { %p3015_p2 = scmp.ne.s32.totalorder %s3929_s8, %s3014_s26  ;;  %p3021_p7 = scmp.lt.u32.totalorder %s3014_s26, %s3929_s8 }
  0x69   : > { %p3017_p3 = pnand %p3015_p2, %p3476_p0 }
  0x6b   : > { %p3018_p4 = pneg %p3017_p3 }
  0x6d   : > { %p3023_p8 = pnand %p3021_p7, %p3018_p4 }
  0x6f   : > { %3026 = shalt.err (!%p3023_p8)
}
  0x70   : > { %s3027_s0 = scalar_lea.vmem %s644_s24, 512  ;;  %p3035_p6 = scmp.lt.s32.totalorder %s644_s24, %s644_s24 }
  0x71   : > { %p3028_p11 = scmp.ne.s32.totalorder %s644_s24, %s3027_s0  ;;  %p3036_p9 = scmp.lt.s32.totalorder %s3027_s0, %s3027_s0 }
  0x73   : > { %p3030_p13 = pnand %p3028_p11, %p3476_p0  ;;  %p3037_p5 = por %p3036_p9, %p3035_p6 }
  0x75   : > { %p3031_p1 = pneg %p3030_p13 }
  0x77   : > { %p3038_p10 = pnand %p3037_p5, %p3031_p1 }
  0x79   : > { %3041 = shalt.err (!%p3038_p10)
}
  0x7a   : > { %2787 = dma.hbm_to_vmem [thread:$0]  (!%p3460_p12), %s3929_s8, 512, %s644_s24, [#allocation12], %s3892_s25, %s3892_s25, %s3894_s4  }
  0x7b   : > { %s3271_s20 = smov [#allocation2]   ;;  %s3930_s28 = sld [smem:[#allocation32_spill]] }
  0x7c   : > { %s572_s21 = sshll.u32 %s3271_s20, 4  ;;  %s573_s21 = int_to_ptr.vmem [resolvable:$true] %s572_s21 }
  0x81   : > { %s3042_s2 = scalar_lea.hbm %s3930_s28, 2944 }
  0x82   : > { %p3043_p5 = scmp.ne.s32.totalorder %s3930_s28, %s3042_s2  ;;  %p3049_p3 = scmp.lt.u32.totalorder %s3042_s2, %s3930_s28 }
  0x84   : > { %p3045_p10 = pnand %p3043_p5, %p3476_p0 }
  0x86   : > { %p3046_p2 = pneg %p3045_p10 }
  0x88   : > { %p3051_p4 = pnand %p3049_p3, %p3046_p2 }
  0x8a   : > { %3054 = shalt.err (!%p3051_p4)
}
  0x8b   : > { %s3055_s24 = scalar_lea.vmem %s573_s21, 2944  ;;  %p3063_p13 = scmp.lt.s32.totalorder %s573_s21, %s573_s21 }
  0x8c   : > { %p3056_p7 = scmp.ne.s32.totalorder %s573_s21, %s3055_s24  ;;  %p3064_p1 = scmp.lt.s32.totalorder %s3055_s24, %s3055_s24 }
  0x8e   : > { %p3058_p8 = pnand %p3056_p7, %p3476_p0  ;;  %p3065_p6 = por %p3064_p1, %p3063_p13 }
  0x90   : > { %p3059_p11 = pneg %p3058_p8 }
  0x92   : > { %p3066_p9 = pnand %p3065_p6, %p3059_p11 }
  0x94   : > { %3069 = shalt.err (!%p3066_p9)
}
  0x95   : > { %s3272_s6 = smov 128   ;;  %s3273_s19 = smov 8  }
  0x96   : > { %2772 = dma.hbm_to_vmem [thread:$0]  (!%p3460_p12), %s3930_s28, 2944, %s573_s21, [#allocation3], %s3272_s6, %s3272_s6, %s3273_s19  }
  0x97   : > { %s3274_s30 = smov [#allocation7]   ;;  %s3275_s2 = smov [#allocation10]  }
  0x98   : > { %s604_s26 = sshll.u32 %s3274_s30, 4  ;;  %s630_s27 = sshll.u32 %s3275_s2, 4  ;;  %s605_s26 = int_to_ptr.vmem [resolvable:$true] %s604_s26  ;;  %s3566_s27 = int_to_ptr.vmem [resolvable:$true] %s630_s27 }
  0x99   : > { %s3931_s24 = sld [smem:[#allocation36_spill]] }
  0x9f   : > { %s3932_s25 = smov %s3931_s24  ;;  %s3070_s4 = scalar_lea.hbm %s3931_s24, 512 }
  0xa0   : > { %p3071_p5 = scmp.ne.s32.totalorder %s3932_s25, %s3070_s4  ;;  %p3077_p3 = scmp.lt.u32.totalorder %s3070_s4, %s3932_s25 }
  0xa2   : > { %p3073_p10 = pnand %p3071_p5, %p3476_p0 }
  0xa4   : > { %p3074_p2 = pneg %p3073_p10 }
  0xa6   : > { %p3079_p4 = pnand %p3077_p3, %p3074_p2 }
  0xa8   : > { %3082 = shalt.err (!%p3079_p4)
}
  0xa9   : > { %s3083_s6 = scalar_lea.vmem %s605_s26, 512  ;;  %p3091_p13 = scmp.lt.s32.totalorder %s605_s26, %s605_s26 }
  0xaa   : > { %p3084_p7 = scmp.ne.s32.totalorder %s605_s26, %s3083_s6  ;;  %p3092_p1 = scmp.lt.s32.totalorder %s3083_s6, %s3083_s6 }
  0xac   : > { %p3086_p8 = pnand %p3084_p7, %p3476_p0  ;;  %p3093_p6 = por %p3092_p1, %p3091_p13 }
  0xae   : > { %p3087_p11 = pneg %p3086_p8 }
  0xb0   : > { %p3094_p9 = pnand %p3093_p6, %p3087_p11 }
  0xb2   : > { %3097 = shalt.err (!%p3094_p9)
}
  0xb3   : > { %s3933_s8 = smov 4   ;;  %s3934_s22 = smov 64  }
  0xb4   : > { %2778 = dma.hbm_to_vmem [thread:$0]  (!%p3460_p12), %s3932_s25, 512, %s605_s26, [#allocation6], %s3934_s22, %s3934_s22, %s3933_s8  }
  0xb5   : > { %s3935_s2 = sld [smem:[#allocation38_spill]] }
  0xbb   : > { %s3098_s23 = scalar_lea.hbm %s3935_s2, 512 }
  0xbc   : > { %p3099_p5 = scmp.ne.s32.totalorder %s3935_s2, %s3098_s23  ;;  %p3105_p3 = scmp.lt.u32.totalorder %s3098_s23, %s3935_s2 }
  0xbe   : > { %p3101_p10 = pnand %p3099_p5, %p3476_p0 }
  0xc0   : > { %p3102_p2 = pneg %p3101_p10 }
  0xc2   : > { %p3107_p4 = pnand %p3105_p3, %p3102_p2 }
  0xc4   : > { %3110 = shalt.err (!%p3107_p4)
}
  0xc5   : > { %s3111_s26 = scalar_lea.vmem %s3566_s27, 512  ;;  %p3119_p13 = scmp.lt.s32.totalorder %s3566_s27, %s3566_s27 }
  0xc6   : > { %p3112_p7 = scmp.ne.s32.totalorder %s3566_s27, %s3111_s26  ;;  %p3120_p1 = scmp.lt.s32.totalorder %s3111_s26, %s3111_s26 }
  0xc8   : > { %p3114_p8 = pnand %p3112_p7, %p3476_p0  ;;  %p3121_p6 = por %p3120_p1, %p3119_p13 }
  0xca   : > { %p3115_p11 = pneg %p3114_p8 }
  0xcc   : > { %p3122_p9 = pnand %p3121_p6, %p3115_p11 }
  0xce   : > { %3125 = shalt.err (!%p3122_p9)
}
  0xcf   : > { %2784 = dma.hbm_to_vmem [thread:$0]  (!%p3460_p12), %s3935_s2, 512, %s3566_s27, [#allocation9], %s3934_s22, %s3934_s22, %s3933_s8  }
  0xd0   : > { %s3276_s4 = smov [#allocation13]   ;;  %s3277_s30 = smov [#allocation14]  }
  0xd1   : > { %s659_s20 = sshll.u32 %s3276_s4, 4  ;;  %s672_s23 = sshll.u32 %s3277_s30, 4  ;;  %s660_s20 = int_to_ptr.vmem [resolvable:$true] %s659_s20  ;;  %s3615_s23 = int_to_ptr.vmem [resolvable:$true] %s672_s23 }
  0xd2   : > { %s3126_s3 = scalar_lea.hbm %s3857_s10, 512 }
  0xd3   : > { %p3127_p5 = scmp.ne.s32.totalorder %s3857_s10, %s3126_s3  ;;  %p3133_p3 = scmp.lt.u32.totalorder %s3126_s3, %s3857_s10 }
  0xd5   : > { %p3129_p10 = pnand %p3127_p5, %p3476_p0 }
  0xd7   : > { %p3130_p2 = pneg %p3129_p10 }
  0xd9   : > { %p3135_p4 = pnand %p3133_p3, %p3130_p2 }
  0xdb   : > { %3138 = shalt.err (!%p3135_p4)
}
  0xdc   : > { %s3139_s19 = scalar_lea.vmem %s660_s20, 512  ;;  %p3147_p13 = scmp.lt.s32.totalorder %s660_s20, %s660_s20 }
  0xdd   : > { %p3140_p7 = scmp.ne.s32.totalorder %s660_s20, %s3139_s19  ;;  %p3148_p1 = scmp.lt.s32.totalorder %s3139_s19, %s3139_s19 }
  0xdf   : > { %p3142_p8 = pnand %p3140_p7, %p3476_p0  ;;  %p3149_p6 = por %p3148_p1, %p3147_p13 }
  0xe1   : > { %p3143_p11 = pneg %p3142_p8 }
  0xe3   : > { %p3150_p9 = pnand %p3149_p6, %p3143_p11 }
  0xe5   : > { %3153 = shalt.err (!%p3150_p9)
}
  0xe6   : > { %2790 = dma.hbm_to_vmem [thread:$0]  (!%p3460_p12), %s3857_s10, 512, %s660_s20, [#allocation12], %s3934_s22, %s3934_s22, %s3933_s8  }
  0xe7   : > { %s3154_s3 = scalar_lea.hbm %s3858_s11, 512 }
  0xe8   : > { %p3155_p5 = scmp.ne.s32.totalorder %s3858_s11, %s3154_s3  ;;  %p3161_p3 = scmp.lt.u32.totalorder %s3154_s3, %s3858_s11 }
  0xea   : > { %p3157_p10 = pnand %p3155_p5, %p3476_p0 }
  0xec   : > { %p3158_p2 = pneg %p3157_p10 }
  0xee   : > { %p3163_p4 = pnand %p3161_p3, %p3158_p2 }
  0xf0   : > { %3166 = shalt.err (!%p3163_p4)
}
  0xf1   : > { %s3167_s20 = scalar_lea.vmem %s3615_s23, 512  ;;  %p3175_p13 = scmp.lt.s32.totalorder %s3615_s23, %s3615_s23 }
  0xf2   : > { %p3168_p7 = scmp.ne.s32.totalorder %s3615_s23, %s3167_s20  ;;  %p3176_p1 = scmp.lt.s32.totalorder %s3167_s20, %s3167_s20 }
  0xf4   : > { %p3170_p8 = pnand %p3168_p7, %p3476_p0  ;;  %p3177_p6 = por %p3176_p1, %p3175_p13 }
  0xf6   : > { %p3171_p11 = pneg %p3170_p8 }
  0xf8   : > { %p3178_p9 = pnand %p3177_p6, %p3171_p11 }
  0xfa   : > { %3181 = shalt.err (!%p3178_p9)
}
  0xfb   : > { %2793 = dma.hbm_to_vmem [thread:$0]  (!%p3460_p12), %s3858_s11, 512, %s3615_s23, [#allocation15], %s3934_s22, %s3934_s22, %s3933_s8  }
  0xfc   : > { %p3936_p5 = scmp.ne.s32.totalorder %s3924_s29, 0 }
  0xfd   : > { %p3937_p0 = scmp.eq.s32.totalorder (!%p3936_p5), %s3422_s5, 0 }
  0xfe   : > { %731 = sbr.rel (%p3936_p5) target bundleno = 2786 (0xae2), region = 112 }
 0x105   : > { %3227 = dma.done.wait (%p3937_p0), [#allocation3], 2944   ;;  %p3938_p10 = pmov %p3937_p0 }
 0x106   : > { %p3939_p2 = pmov %p3937_p0 }
 0x107   : > { %3229 = vsyncadd (%p3938_p10), [#allocation3], 4294964352 }
 0x108   : > { %3231 = dma.done.wait (%p3939_p2), [#allocation6], 2560   ;;  %p3940_p3 = pmov %p3937_p0 }
 0x109   : > { %p3941_p4 = pmov %p3937_p0 }
 0x10a   : > { %3233 = vsyncadd (%p3940_p3), [#allocation6], 4294964736 }
 0x10b   : > { %3235 = dma.done.wait (%p3941_p4), [#allocation9], 1024   ;;  %p3942_p12 = pmov %p3937_p0 }
 0x10c   : > { %p3943_p7 = pmov %p3937_p0 }
 0x10d   : > { %3237 = vsyncadd (%p3942_p12), [#allocation9], 4294966272 }
 0x10e   : > { %3239 = dma.done.wait (%p3943_p7), [#allocation12], 1024   ;;  %p3944_p8 = pmov %p3937_p0 }
 0x10f   : > { %p3945_p11 = pmov %p3937_p0 }
 0x110   : > { %3241 = vsyncadd (%p3944_p8), [#allocation12], 4294966272 }
 0x111   : > { %3243 = dma.done.wait (%p3945_p11), [#allocation15], 512   ;;  %p3946_p13 = pmov %p3937_p0 }
 0x112   : > { %s2391_s7 = sshll.u32 %s3422_s5, 2  ;;  %v2861_v0 = vld [vmem:[#allocation2 + $0x4] ss:$8 sps:$4 sm:$0xff]   ;;  %v2863_v1 = vld [vmem:[#allocation2] ss:$8 sps:$4 sm:$0xff]   ;;  %s3947_s22 = sld [smem:[#allocation31_spill]]  ;;  %v862_v47 = vlaneseq }
 0x113   : > { %3245 = vsyncadd (%p3946_p13), [#allocation15], 4294966784  ;;  %1019 = vmatprep.subr.bf16.mxu0 %v2861_v0  ;;  %v2864_v2 = vld [vmem:[#allocation2 + $0x14] ss:$8 sps:$4 sm:$0xff]   ;;  %p825_p1 = scmp.lt.s32.totalorder %s2391_s7, 7  ;;  %vm1005_vm0 = vcmask 457728  }
 0x114   : > { %1020 = vmatpush1.bf16.msra.mxu0 %v2863_v1  ;;  %v2866_v3 = vld [vmem:[#allocation2 + $0x10] ss:$8 sps:$4 sm:$0xff]   ;;  %v2867_v4 = vld [vmem:[#allocation2 + $0x24] ss:$8 sps:$4 sm:$0xff]   ;;  %v2869_v5 = vld [vmem:[#allocation2 + $0x20] ss:$8 sps:$4 sm:$0xff]  }
 0x115   : > { %1021 = vmatprep.subr.bf16.mxu0 %v2864_v2  ;;  %s3971_s7 = smov (!%p825_p1, %s2391_s7), 7  ;;  %v2870_v6 = vld [vmem:[#allocation2 + $0x34] ss:$8 sps:$4 sm:$0xff]   ;;  %v2872_v7 = vld [vmem:[#allocation2 + $0x30] ss:$8 sps:$4 sm:$0xff]   ;;  %v2904_v17 = vld [vmem:[#allocation5 + $0x48] sm:$0xff]  }
 0x116   : > { %s2516_s29 = sshll.u32 %s3971_s7, 3  ;;  %v2873_v8 = vld [vmem:[#allocation2 + $0x44] ss:$8 sps:$4 sm:$0xff]   ;;  %v2875_v9 = vld [vmem:[#allocation2 + $0x40] ss:$8 sps:$4 sm:$0xff]   ;;  %v2902_v13 = vld [vmem:[#allocation5 + $0x40] sm:$0xff]  }
 0x117   : > { %v2876_v10 = vld [vmem:[#allocation2 + $0x54] ss:$8 sps:$4 sm:$0xff]   ;;  %v2878_v12 = vld [vmem:[#allocation2 + $0x50] ss:$8 sps:$4 sm:$0xff]   ;;  %v2879_v14 = vld [vmem:[#allocation2 + $0x64] ss:$8 sps:$4 sm:$0xff]   ;;  %2533 = vmatprep.subr.bf16.mxu1 %v2902_v13 }
 0x118   : > { %1022 = vmatpush1.bf16.msra.mxu0 %v2866_v3  ;;  %s3690_s23 = scalar_lea.vmem %s3947_s22, %s2516_s29  ;;  %v859_v15 = vld [vmem:[#allocation2 + $0xb0] sm:$0xff]  ;;  %v2903_v16 = vld [vmem:[#allocation5] sm:$0xff]   ;;  %v2905_v18 = vld [vmem:[#allocation5 + $0x8] sm:$0xff]   ;;  %vm1012_vm1 = vcmask 1043456   ;;  %s3948_s24 = sld [smem:[#allocation34_spill]]  ;;  %v863_v48 = vshrl.u32 %v862_v47, 7 }
 0x119   : > { %1023 = vmatprep.subr.bf16.mxu0 %v2867_v4  ;;  %v2898_v11 = vld [vmem:[%s3690_s23 + $0x4] ss:$8 sps:$4 sm:$0xff]   ;;  %2534 = vmatpush3.bf16.msra.mxu1 %v2903_v16  ;;  %v2881_v20 = vld [vmem:[#allocation2 + $0x60] ss:$8 sps:$4 sm:$0xff]   ;;  %v2882_v21 = vld [vmem:[#allocation2 + $0x74] ss:$8 sps:$4 sm:$0xff]   ;;  %v2420_v22 = vcombine.low %v859_v15, %v859_v15  ;;  %v2421_v37 = vcombine.high %v859_v15, %v859_v15 }
 0x11a   : > { %2423 = vmatprep.mubr.msk.bf16.mxu0 %vm1005_vm0, %v2898_v11  ;;  %2535 = vmatprep.subr.bf16.mxu1 %v2904_v17  ;;  %v2906_v19 = vld [vmem:[#allocation5 + $0x50] sm:$0xff]   ;;  %v2884_v23 = vld [vmem:[#allocation2 + $0x70] ss:$8 sps:$4 sm:$0xff]   ;;  %v2888_v31 = vld [vmem:[#allocation2 + $0x94] ss:$8 sps:$4 sm:$0xff]   ;;  %v864_v49 = vsub.s32 0, %v863_v48 }
 0x11b   : > { %v2907_v24 = vld [vmem:[#allocation5 + $0x10] sm:$0xff]   ;;  %v2908_v25 = vld [vmem:[#allocation5 + $0x58] sm:$0xff]   ;;  %v1014_v27 = vsel %vm1012_vm1, %v2420_v22, 0  ;;  %v2910_v29 = vld [vmem:[#allocation5 + $0x60] sm:$0xff]   ;;  %v868_v51 = vsub.s32 1, %v863_v48  ;;  %s3950_s6 = sld [smem:[#allocation35_spill]] }
 0x11c   : > { %1024 = vmatpush1.bf16.msra.mxu0 %v2869_v5  ;;  %v2885_v26 = vld [vmem:[#allocation2 + $0x84] ss:$8 sps:$4 sm:$0xff]   ;;  %v2909_v28 = vld [vmem:[#allocation5 + $0x18] sm:$0xff]   ;;  %v2887_v30 = vld [vmem:[#allocation2 + $0x80] ss:$8 sps:$4 sm:$0xff]   ;;  %vm1439_vm2 = vcmask 523264  }
 0x11d   : > { %1025 = vmatprep.subr.bf16.mxu0 %v2870_v6  ;;  %2536 = vmatpush3.bf16.msra.mxu1 %v2905_v18  ;;  %v2911_v32 = vld [vmem:[#allocation5 + $0x20] sm:$0xff]   ;;  %v2912_v33 = vld [vmem:[#allocation5 + $0x68] sm:$0xff]   ;;  %v2914_v42 = vld [vmem:[#allocation5 + $0x70] sm:$0xff]   ;;  %s3951_s21 = sld [smem:[#allocation40_spill]]  ;;  %s3952_s20 = sld [smem:[#allocation41_spill]] }
 0x11e   : > { %2537 = vmatprep.subr.bf16.mxu1 %v2906_v19  ;;  %v2890_v34 = vld [vmem:[#allocation2 + $0x90] ss:$8 sps:$4 sm:$0xff]   ;;  %v2891_v35 = vld [vmem:[#allocation2 + $0xa4] ss:$8 sps:$4 sm:$0xff]   ;;  %v2893_v36 = vld [vmem:[#allocation2 + $0xa0] ss:$8 sps:$4 sm:$0xff]   ;;  %s3949_s3 = smov %s3948_s24 }
 0x11f   : > { %v2896_v38 = vld [vmem:[%s3690_s23] ss:$8 sps:$4 sm:$0xff]   ;;  %v2899_v39 = vld [vmem:[%s3690_s23 + $0x14] ss:$8 sps:$4 sm:$0xff]   ;;  %v2901_v40 = vld [vmem:[%s3690_s23 + $0x10] ss:$8 sps:$4 sm:$0xff]  }
 0x120   : > { %1026 = vmatpush1.bf16.msra.mxu0 %v2872_v7  ;;  %v2913_v41 = vld [vmem:[#allocation5 + $0x28] sm:$0xff]   ;;  %v2915_v43 = vld [vmem:[#allocation5 + $0x30] sm:$0xff]   ;;  %v2916_v44 = vld [vmem:[#allocation5 + $0x78] sm:$0xff]   ;;  %s3953_s7 = sld [smem:[#allocation42_spill]]  ;;  %s3954_s29 = sld [smem:[#allocation24_spill]] }
 0x121   : > { %1027 = vmatprep.subr.bf16.mxu0 %v2873_v8  ;;  %2538 = vmatpush3.bf16.msra.mxu1 %v2907_v24  ;;  %v2917_v45 = vld [vmem:[#allocation5 + $0x38] sm:$0xff]   ;;  %v2918_v46 = vld [vmem:[%s3948_s24] sm:$0xff]   ;;  %v2919_v7 = vld [vmem:[%s3949_s3 + $0x8] sm:$0xff]   ;;  %s3955_s30 = sld [smem:[#allocation43_spill]]  ;;  %s2521_s26 = sshll.u32 %s3422_s5, 8 }
 0x122   : > { %2539 = vmatprep.subr.bf16.mxu1 %v2908_v25  ;;  %v860_v50 = vld [vmem:[%s3859_s12] sm:$0x3]  ;;  %v2920_v15 = vld [vmem:[%s3949_s3 + $0x10] sm:$0xff]   ;;  %v2923_v22 = vld [vmem:[%s3949_s3 + $0x28] sm:$0xff]   ;;  %s3957_s19 = sld [smem:[#allocation44_spill]] }
 0x123   : > { %v865_v52 = vrot.slane %v860_v50, %v864_v49  ;;  %v869_v53 = vrot.slane %v860_v50, %v868_v51  ;;  %v2925_v24 = vld [vmem:[%s3949_s3 + $0x38] sm:$0xff]   ;;  %v2926_v25 = vld [vmem:[%s3950_s6] sm:$0xff]   ;;  %v2928_v50 = vld [vmem:[%s3950_s6 + $0x10] sm:$0xff]  }
 0x124   : > { %1028 = vmatpush1.bf16.msra.mxu0 %v2875_v9  ;;  %v2929_v51 = vld [vmem:[%s3950_s6 + $0x18] sm:$0xff]  }
 0x125   : > { %1029 = vmatprep.subr.bf16.mxu0 %v2876_v10  ;;  %2540 = vmatpush3.bf16.msra.mxu1 %v2909_v28  ;;  %v2425_v28 = vld [vmem:[%s3860_s13] ss:$0 sm:$0xff] }
 0x126   : > { %2541 = vmatprep.subr.bf16.mxu1 %v2910_v29  ;;  %s821_s1 = sand.u32 1, %s3954_s29   ;;  %s3278_s29 = smov [#allocation16]  }
 0x127   : > { %s2390_s8 = sshll.u32 %s821_s1, 4  ;;  %s3806_s5 = scalar_lea.sflag [#allocation4], %s821_s1 }
 0x128   : > { %1030 = vmatpush1.bf16.msra.mxu0 %v2878_v12  ;;  %s823_s0 = scalar_lea.vmem [#allocation16], %s2390_s8  ;;  %s3804_s4 = scalar_lea.hbm %s3957_s19, %s2521_s26 }
 0x129   : > { %1031 = vmatprep.subr.bf16.mxu0 %v2879_v14  ;;  %2542 = vmatpush3.bf16.msra.mxu1 %v2911_v32  ;;  %s2229_s24 = sshll.u32 %s823_s0, 4  ;;  %s3186_s8 = sshll.u32 %s3278_s29, 4  ;;  %s3799_s24 = int_to_ptr.vmem [resolvable:$true] %s2229_s24  ;;  %s3187_s8 = int_to_ptr.vmem [resolvable:$false] %s3186_s8 }
 0x12a   : > { %2543 = vmatprep.subr.bf16.mxu1 %v2912_v33  ;;  %s3188_s22 = scalar_lea.vmem %s3187_s8, 512  ;;  %p3189_p10 = scmp.lt.s32.totalorder %s3799_s24, %s3187_s8 }
 0x12c   : > { %1032 = vmatpush1.bf16.msra.mxu0 %v2881_v20  ;;  %v2921_v20 = vld [vmem:[%s3949_s3 + $0x18] sm:$0xff]  }
 0x12d   : > { %1033 = vmatprep.subr.bf16.mxu0 %v2882_v21  ;;  %2544 = vmatpush3.bf16.msra.mxu1 %v2913_v41  ;;  %v2922_v21 = vld [vmem:[%s3949_s3 + $0x20] sm:$0xff]  }
 0x12e   : > { %2545 = vmatprep.subr.bf16.mxu1 %v2914_v42 }
 0x130   : > { %1034 = vmatpush1.bf16.msra.mxu0 %v2884_v23  ;;  %v2924_v23 = vld [vmem:[%s3949_s3 + $0x30] sm:$0xff]  }
 0x131   : > { %1035 = vmatprep.subr.bf16.mxu0 %v2885_v26  ;;  %2546 = vmatpush3.bf16.msra.mxu1 %v2915_v43  ;;  %v2927_v26 = vld [vmem:[%s3950_s6 + $0x8] sm:$0xff]  }
 0x132   : > { %2547 = vmatprep.subr.bf16.mxu1 %v2916_v44 }
 0x134   : > { %1036 = vmatpush1.bf16.msra.mxu0 %v2887_v30 }
 0x135   : > { %1037 = vmatprep.subr.bf16.mxu0 %v2888_v31  ;;  %2548 = vmatpush3.bf16.msra.mxu1 %v2917_v45 }
 0x136   : > { %2619 = vmatprep.subr.bf16.mxu1 %v2918_v46 }
 0x138   : > { %1038 = vmatpush1.bf16.msra.mxu0 %v2890_v34 }
 0x139   : > { %1039 = vmatprep.subr.bf16.mxu0 %v2891_v35 }
 0x13c   : > { %1040 = vmatpush1.bf16.msra.mxu0 %v2893_v36 }
 0x13d   : > { %2422 = vmatprep.subr.msk.bf16.mxu0 %vm1012_vm1, %v2421_v37 }
 0x140   : > { %1042 = vmatpush1.bf16.msra.mxu0 %v1014_v27 }
 0x141   : > { %2639 = vmatprep.subr.bf16.mxu0 %v2926_v25 }
 0x143   : > { %1052 = vmatmul.mubr.bf16.vlgmr.msra.gmra.mrb[0].mxu0 %v2896_v38 }
 0x144   : > { %2424 = vmatprep.mubr.msk.bf16.mxu0 %vm1005_vm0, %v2899_v39  ;;  %2640 = vmatpush3.bf16.msra.mxu0 %v2926_v25  ;;  %v2937_v25 = vld [vmem:[#allocation8 + $0x18] sm:$0xff]  }
 0x145   : > { %2641 = vmatprep.subr.bf16.mxu0 %v2927_v26 }
 0x148   : > { %2642 = vmatpush3.bf16.msra.mxu0 %v2927_v26  ;;  %v2938_v26 = vld [vmem:[#allocation10] sm:$0xff]  }
 0x149   : > { %2643 = vmatprep.subr.bf16.mxu0 %v2928_v50 }
 0x14b   : > { %1062 = vmatmul.mubr.bf16.gmra.mrb[4].mxu0 %v2901_v40 }
 0x14c   : > { %2644 = vmatpush3.bf16.msra.mxu0 %v2928_v50 }
 0x14d   : > { %2645 = vmatprep.subr.bf16.mxu0 %v2929_v51 }
 0x150   : > { %2646 = vmatpush3.bf16.msra.mxu0 %v2929_v51 }
 0x216   : > { %v1053_v54 = vpop.f32.mrb[0].mxu0 }
 0x217   : > { %v1054_v55 = vadd.f32 %v1053_v54, %v865_v52  ;;  %v1055_v56 = vpop.f32.mrb[1].mxu0 }
 0x218   : > { %v1056_v57 = vadd.f32 %v1055_v56, %v869_v53  ;;  %v1057_v58 = vpop.f32.mrb[2].mxu0 }
 0x219   : > { %v1058_v59 = vadd.f32 %v1057_v58, %v865_v52  ;;  %v1059_v60 = vpop.f32.mrb[3].mxu0  ;;  %v1072_v62 = vmax.f32 %v1054_v55, 0.0 }
 0x21a   : > { %v1060_v61 = vadd.f32 %v1059_v60, %v869_v53  ;;  %v1073_v0 = vmax.f32 %v1056_v57, 0.0 }
 0x21b   : > { %v1074_v63 = vmax.f32 %v1058_v59, 0.0 }
 0x21c   : > { %v1075_v1 = vmax.f32 %v1060_v61, 0.0 }
 0x21d   : > { %v1080_v2 = vpack.c.bf16 %v1074_v63, %v1072_v62 }
 0x21e   : > { %v1063_v3 = vpop.f32.mrb[4].mxu0  ;;  %v1081_v4 = vpack.c.bf16 %v1075_v1, %v1073_v0 }
 0x21f   : > { %v1064_v5 = vadd.f32 %v1063_v3, %v865_v52  ;;  %v1065_v6 = vpop.f32.mrb[5].mxu0 }
 0x220   : > { %v1066_v8 = vadd.f32 %v1065_v6, %v869_v53  ;;  %v1067_v9 = vpop.f32.mrb[6].mxu0  ;;  %1251 = vmatprep.mubr.bf16.mxu1 %v1081_v4  ;;  %v2931_v4 = vld [vmem:[#allocation7 + $0x8] sm:$0xff]   ;;  %v2933_v6 = vld [vmem:[#allocation7 + $0x18] sm:$0xff]  }
 0x221   : > { %v1068_v10 = vadd.f32 %v1067_v9, %v865_v52  ;;  %v1069_v11 = vpop.f32.mrb[7].mxu0  ;;  %1252 = vmatmul.mubr.bf16.vlgmr.msra.gmra.mrb[0].mxu1 %v1080_v2  ;;  %v1076_v13 = vmax.f32 %v1064_v5, 0.0  ;;  %v2930_v52 = vld [vmem:[#allocation7] sm:$0xff]   ;;  %v2932_v5 = vld [vmem:[#allocation7 + $0x10] sm:$0xff]   ;;  %v2451_v9 = vld [vmem:[%s3862_s15] ss:$0 sm:$0xff] }
 0x222   : > { %v1070_v12 = vadd.f32 %v1069_v11, %v869_v53  ;;  %2620 = vmatpush3.bf16.msra.mxu1 %v2918_v46  ;;  %v1077_v16 = vmax.f32 %v1066_v8, 0.0  ;;  %2651 = vmatprep.subr.bf16.mxu0 %v2930_v52  ;;  %v2442_v53 = vld [vmem:[%s3861_s14] ss:$0 sm:$0xff] }
 0x223   : > { %v1078_v14 = vmax.f32 %v1068_v10, 0.0  ;;  %2621 = vmatprep.subr.bf16.mxu1 %v2919_v7  ;;  %v2935_v8 = vld [vmem:[#allocation8 + $0x8] sm:$0xff]  }
 0x224   : > { %v1079_v17 = vmax.f32 %v1070_v12, 0.0 }
 0x225   : > { %v1082_v18 = vpack.c.bf16 %v1078_v14, %v1076_v13 }
 0x226   : > { %v1083_v19 = vpack.c.bf16 %v1079_v17, %v1077_v16  ;;  %2622 = vmatpush3.bf16.msra.mxu1 %v2919_v7  ;;  %v2934_v7 = vld [vmem:[#allocation8] sm:$0xff]  }
 0x227   : > { %2623 = vmatprep.subr.bf16.mxu1 %v2920_v15 }
 0x228   : > { %1259 = vmatprep.mubr.bf16.mxu1 %v1083_v19 }
 0x229   : > { %1260 = vmatmul.mubr.bf16.gmra.mrb[4].mxu1 %v1082_v18 }
 0x22a   : > { %2624 = vmatpush3.bf16.msra.mxu1 %v2920_v15 }
 0x22b   : > { %2625 = vmatprep.subr.bf16.mxu1 %v2921_v20 }
 0x22e   : > { %2626 = vmatpush3.bf16.msra.mxu1 %v2921_v20 }
 0x22f   : > { %2627 = vmatprep.subr.bf16.mxu1 %v2922_v21 }
 0x232   : > { %2628 = vmatpush3.bf16.msra.mxu1 %v2922_v21 }
 0x233   : > { %2629 = vmatprep.subr.bf16.mxu1 %v2923_v22 }
 0x236   : > { %2630 = vmatpush3.bf16.msra.mxu1 %v2923_v22 }
 0x237   : > { %2631 = vmatprep.subr.bf16.mxu1 %v2924_v23 }
 0x23a   : > { %2632 = vmatpush3.bf16.msra.mxu1 %v2924_v23 }
 0x23b   : > { %2633 = vmatprep.subr.bf16.mxu1 %v2925_v24 }
 0x23e   : > { %2634 = vmatpush3.bf16.msra.mxu1 %v2925_v24  ;;  %v2936_v24 = vld [vmem:[#allocation8 + $0x10] sm:$0xff]  }
 0x23f   : > { %2663 = vmatprep.subr.bf16.mxu1 %v2934_v7 }
 0x2f4   : > { %v2549_v27 = vpop.f32.mrb[0].mxu1 }
 0x2f5   : > { %v2550_v29 = vpop.f32.mrb[1].mxu1 }
 0x2f6   : > { %v2551_v30 = vadd.f32 %v2550_v29, %v2549_v27  ;;  %v2552_v31 = vpop.f32.mrb[2].mxu1  ;;  %v2939_v27 = vld [vmem:[#allocation10 + $0x8] sm:$0xff]  }
 0x2f7   : > { %v2553_v32 = vpop.f32.mrb[3].mxu1 }
 0x2f8   : > { %v1254_v33 = vadd.f32 %v2551_v30, %v2425_v28  ;;  %v2554_v34 = vadd.f32 %v2553_v32, %v2552_v31 }
 0x2fa   : > { %v1257_v35 = vadd.f32 %v2554_v34, %v2425_v28  ;;  %v1268_v36 = vmax.f32 %v1254_v33, 0.0 }
 0x2fc   : > { %v1269_v37 = vmax.f32 %v1257_v35, 0.0  ;;  %v2555_v38 = vpop.f32.mrb[4].mxu1 }
 0x2fd   : > { %v2556_v39 = vpop.f32.mrb[5].mxu1 }
 0x2fe   : > { %v2557_v40 = vadd.f32 %v2556_v39, %v2555_v38  ;;  %v2558_v41 = vpop.f32.mrb[6].mxu1  ;;  %v1272_v42 = vpack.c.bf16 %v1269_v37, %v1268_v36 }
 0x2ff   : > { %v2559_v43 = vpop.f32.mrb[7].mxu1 }
 0x300   : > { %v1262_v44 = vadd.f32 %v2557_v40, %v2425_v28  ;;  %v2560_v45 = vadd.f32 %v2559_v43, %v2558_v41  ;;  %2635 = vmatprep.mubr.bf16.mxu1 %v1272_v42  ;;  %v2940_v43 = vld [vmem:[#allocation10 + $0x10] sm:$0xff]  }
 0x302   : > { %v1265_v46 = vadd.f32 %v2560_v45, %v2425_v28  ;;  %v1270_v47 = vmax.f32 %v1262_v44, 0.0  ;;  %v2458_v28 = vld [vmem:[%s3863_s16] ss:$0 sm:$0xff]  ;;  %v2941_v44 = vld [vmem:[#allocation10 + $0x18] sm:$0xff]   ;;  %v2942_v45 = vld [vmem:[#allocation11] sm:$0xff]  }
 0x304   : > { %v1271_v48 = vmax.f32 %v1265_v46, 0.0  ;;  %v2943_v46 = vld [vmem:[#allocation11 + $0x8] sm:$0xff]  }
 0x306   : > { %v1273_v49 = vpack.c.bf16 %v1271_v48, %v1270_v47  ;;  %v2465_v47 = vld [vmem:[%s3864_s17] ss:$0 sm:$0xff] }
 0x308   : > { %2636 = vmatmul.mubr.bf16.vlgmr.msra.gmra.mrb[8].mxu1 %v1273_v49 }
 0x309   : > { %2664 = vmatpush3.bf16.msra.mxu1 %v2934_v7 }
 0x30a   : > { %2665 = vmatprep.subr.bf16.mxu1 %v2935_v8 }
 0x30d   : > { %2666 = vmatpush3.bf16.msra.mxu1 %v2935_v8 }
 0x30e   : > { %2667 = vmatprep.subr.bf16.mxu1 %v2936_v24 }
 0x311   : > { %2668 = vmatpush3.bf16.msra.mxu1 %v2936_v24 }
 0x312   : > { %2669 = vmatprep.subr.bf16.mxu1 %v2937_v25 }
 0x315   : > { %2670 = vmatpush3.bf16.msra.mxu1 %v2937_v25 }
 0x316   : > { %2687 = vmatprep.subr.bf16.mxu1 %v2942_v45 }
 0x3db   : > { %v2637_v54 = vpop.f32.mrb[8].mxu1 }
 0x3dc   : > { %v1388_v55 = vadd.f32 %v2637_v54, %v2442_v53  ;;  %v1379_v56 = vpop.f32.mrb[9].mxu1 }
 0x3dd   : > { %v1380_v57 = vadd.f32 %v2442_v53, %v1379_v56  ;;  %v2638_v58 = vpop.f32.mrb[10].mxu1 }
 0x3de   : > { %v1391_v59 = vadd.f32 %v2638_v58, %v2442_v53  ;;  %v1382_v60 = vpop.f32.mrb[11].mxu1  ;;  %v1396_v62 = vmax.f32 %v1388_v55, 0.0 }
 0x3df   : > { %v1383_v61 = vadd.f32 %v2442_v53, %v1382_v60  ;;  %v1394_v0 = vmax.f32 %v1380_v57, 0.0 }
 0x3e0   : > { %v1397_v63 = vmax.f32 %v1391_v59, 0.0 }
 0x3e1   : > { %v1395_v1 = vmax.f32 %v1383_v61, 0.0 }
 0x3e2   : > { %v1399_v2 = vpack.c.bf16 %v1397_v63, %v1396_v62  ;;  %v2944_v62 = vld [vmem:[#allocation11 + $0x10] sm:$0xff]   ;;  %v2945_v63 = vld [vmem:[#allocation11 + $0x18] sm:$0xff]  }
 0x3e3   : > { %v1398_v3 = vpack.c.bf16 %v1395_v1, %v1394_v0  ;;  %v2946_v0 = vld [vmem:[%s3856_s9] sm:$0xff]   ;;  %v2947_v1 = vld [vmem:[%s3856_s9 + $0x8] sm:$0xff]  }
 0x3e5   : > { %2647 = vmatprep.mubr.msk.bf16.mxu0 %vm1439_vm2, %v1398_v3 }
 0x3e6   : > { %2648 = vmatmul.mubr.msk.bf16.vlgmr.msra.gmra.mrb[8].mxu0 %vm1439_vm2, %v1399_v2  ;;  %v2472_v2 = vld [vmem:[%s3865_s18] ss:$0 sm:$0xff] }
 0x3e7   : > { %2652 = vmatpush3.bf16.msra.mxu0 %v2930_v52 }
 0x3e8   : > { %2653 = vmatprep.subr.bf16.mxu0 %v2931_v4 }
 0x3eb   : > { %2654 = vmatpush3.bf16.msra.mxu0 %v2931_v4 }
 0x3ec   : > { %2655 = vmatprep.subr.bf16.mxu0 %v2932_v5 }
 0x3ef   : > { %2656 = vmatpush3.bf16.msra.mxu0 %v2932_v5 }
 0x3f0   : > { %2657 = vmatprep.subr.bf16.mxu0 %v2933_v6 }
 0x3f3   : > { %2658 = vmatpush3.bf16.msra.mxu0 %v2933_v6 }
 0x3f4   : > { %2675 = vmatprep.subr.bf16.mxu0 %v2938_v26 }
 0x4b9   : > { %v2649_v10 = vpop.f32.mrb[8].mxu0 }
 0x4ba   : > { %v1489_v11 = vadd.f32 %v2649_v10, %v2451_v9  ;;  %v1480_v12 = vpop.f32.mrb[9].mxu0 }
 0x4bb   : > { %v1481_v13 = vadd.f32 %v2451_v9, %v1480_v12  ;;  %v2650_v14 = vpop.f32.mrb[10].mxu0 }
 0x4bc   : > { %v1492_v15 = vadd.f32 %v2650_v14, %v2451_v9  ;;  %v1483_v16 = vpop.f32.mrb[11].mxu0  ;;  %v1497_v18 = vmax.f32 %v1489_v11, 0.0 }
 0x4bd   : > { %v1484_v17 = vadd.f32 %v2451_v9, %v1483_v16  ;;  %v1495_v20 = vmax.f32 %v1481_v13, 0.0 }
 0x4be   : > { %v1498_v19 = vmax.f32 %v1492_v15, 0.0 }
 0x4bf   : > { %v1496_v21 = vmax.f32 %v1484_v17, 0.0  ;;  %v2948_v17 = vld [vmem:[%s3856_s9 + $0x10] sm:$0xff]  }
 0x4c0   : > { %v1500_v22 = vpack.c.bf16 %v1498_v19, %v1497_v18  ;;  %v2949_v18 = vld [vmem:[%s3856_s9 + $0x18] sm:$0xff]  }
 0x4c1   : > { %v1499_v23 = vpack.c.bf16 %v1496_v21, %v1495_v20  ;;  %v2950_v19 = vld [vmem:[#allocation13] sm:$0xff]   ;;  %v2951_v20 = vld [vmem:[#allocation13 + $0x8] sm:$0xff]  }
 0x4c2   : > { %v2479_v21 = vld [vmem:[%s3951_s21] ss:$0 sm:$0xff]  ;;  %s3956_s21 = sld [smem:[#allocation29_spill]] }
 0x4c3   : > { %2659 = vmatprep.mubr.msk.bf16.mxu0 %vm1439_vm2, %v1499_v23 }
 0x4c4   : > { %2660 = vmatmul.mubr.msk.bf16.vlgmr.msra.gmra.mrb[12].mxu0 %vm1439_vm2, %v1500_v22 }
 0x4c5   : > { %2676 = vmatpush3.bf16.msra.mxu0 %v2938_v26 }
 0x4c6   : > { %2677 = vmatprep.subr.bf16.mxu0 %v2939_v27 }
 0x4c8   : > { %p3958_p9 = scmp.ne.s32.totalorder %s3956_s21, 0 }
 0x4c9   : > { %2678 = vmatpush3.bf16.msra.mxu0 %v2939_v27 }
 0x4ca   : > { %2679 = vmatprep.subr.bf16.mxu0 %v2940_v43 }
 0x4cd   : > { %2680 = vmatpush3.bf16.msra.mxu0 %v2940_v43 }
 0x4ce   : > { %2681 = vmatprep.subr.bf16.mxu0 %v2941_v44 }
 0x4d1   : > { %2682 = vmatpush3.bf16.msra.mxu0 %v2941_v44 }
 0x4d2   : > { %2699 = vmatprep.subr.bf16.mxu0 %v2946_v0 }
 0x597   : > { %v2661_v29 = vpop.f32.mrb[12].mxu0 }
 0x598   : > { %v1589_v30 = vadd.f32 %v2661_v29, %v2458_v28  ;;  %v1580_v31 = vpop.f32.mrb[13].mxu0 }
 0x599   : > { %v1581_v32 = vadd.f32 %v2458_v28, %v1580_v31  ;;  %v2662_v33 = vpop.f32.mrb[14].mxu0 }
 0x59a   : > { %v1592_v34 = vadd.f32 %v2662_v33, %v2458_v28  ;;  %v1583_v35 = vpop.f32.mrb[15].mxu0  ;;  %v1597_v37 = vmax.f32 %v1589_v30, 0.0 }
 0x59b   : > { %v1584_v36 = vadd.f32 %v2458_v28, %v1583_v35  ;;  %v1595_v39 = vmax.f32 %v1581_v32, 0.0 }
 0x59c   : > { %v1598_v38 = vmax.f32 %v1592_v34, 0.0 }
 0x59d   : > { %v1596_v40 = vmax.f32 %v1584_v36, 0.0  ;;  %v2952_v36 = vld [vmem:[#allocation13 + $0x10] sm:$0xff]  }
 0x59e   : > { %v1600_v41 = vpack.c.bf16 %v1598_v38, %v1597_v37  ;;  %v2953_v37 = vld [vmem:[#allocation13 + $0x18] sm:$0xff]   ;;  %v2954_v38 = vld [vmem:[#allocation14] sm:$0xff]  }
 0x59f   : > { %v1599_v42 = vpack.c.bf16 %v1596_v40, %v1595_v39  ;;  %v2955_v39 = vld [vmem:[#allocation14 + $0x8] sm:$0xff]  }
 0x5a0   : > { %v2486_v40 = vld [vmem:[%s3952_s20] ss:$0 sm:$0xff] }
 0x5a1   : > { %2671 = vmatprep.mubr.msk.bf16.mxu1 %vm1439_vm2, %v1599_v42 }
 0x5a2   : > { %2672 = vmatmul.mubr.msk.bf16.vlgmr.msra.gmra.mrb[12].mxu1 %vm1439_vm2, %v1600_v41 }
 0x5a3   : > { %2688 = vmatpush3.bf16.msra.mxu1 %v2942_v45 }
 0x5a4   : > { %2689 = vmatprep.subr.bf16.mxu1 %v2943_v46 }
 0x5a7   : > { %2690 = vmatpush3.bf16.msra.mxu1 %v2943_v46 }
 0x5a8   : > { %2691 = vmatprep.subr.bf16.mxu1 %v2944_v62 }
 0x5ab   : > { %2692 = vmatpush3.bf16.msra.mxu1 %v2944_v62 }
 0x5ac   : > { %2693 = vmatprep.subr.bf16.mxu1 %v2945_v63 }
 0x5af   : > { %2694 = vmatpush3.bf16.msra.mxu1 %v2945_v63 }
 0x5b0   : > { %2711 = vmatprep.subr.bf16.mxu1 %v2950_v19 }
 0x675   : > { %v2673_v48 = vpop.f32.mrb[12].mxu1 }
 0x676   : > { %v1689_v49 = vadd.f32 %v2673_v48, %v2465_v47  ;;  %v1680_v50 = vpop.f32.mrb[13].mxu1 }
 0x677   : > { %v1681_v51 = vadd.f32 %v2465_v47, %v1680_v50  ;;  %v2674_v52 = vpop.f32.mrb[14].mxu1 }
 0x678   : > { %v1692_v53 = vadd.f32 %v2674_v52, %v2465_v47  ;;  %v1683_v54 = vpop.f32.mrb[15].mxu1  ;;  %v1697_v56 = vmax.f32 %v1689_v49, 0.0 }
 0x679   : > { %v1684_v55 = vadd.f32 %v2465_v47, %v1683_v54  ;;  %v1695_v58 = vmax.f32 %v1681_v51, 0.0 }
 0x67a   : > { %v1698_v57 = vmax.f32 %v1692_v53, 0.0 }
 0x67b   : > { %v1696_v59 = vmax.f32 %v1684_v55, 0.0  ;;  %v2956_v55 = vld [vmem:[#allocation14 + $0x10] sm:$0xff]  }
 0x67c   : > { %v1700_v60 = vpack.c.bf16 %v1698_v57, %v1697_v56  ;;  %v2957_v56 = vld [vmem:[#allocation14 + $0x18] sm:$0xff]   ;;  %v2493_v57 = vld [vmem:[%s3953_s7] ss:$0 sm:$0xff]  ;;  %s3182_s7 = scalar_lea.vmem %s3799_s24, 256 }
 0x67d   : > { %v1699_v61 = vpack.c.bf16 %v1696_v59, %v1695_v58  ;;  %p3183_p6 = scmp.ne.s32.totalorder %s3799_s24, %s3182_s7  ;;  %p3190_p2 = scmp.lt.s32.totalorder %s3188_s22, %s3182_s7 }
 0x67f   : > { %2683 = vmatprep.mubr.msk.bf16.mxu0 %vm1439_vm2, %v1699_v61  ;;  %p3184_p5 = pnand %p3183_p6, %p3958_p9  ;;  %p3191_p3 = por %p3190_p2, %p3189_p10 }
 0x680   : > { %2684 = vmatmul.mubr.msk.bf16.vlgmr.msra.gmra.mrb[16].mxu0 %vm1439_vm2, %v1700_v60 }
 0x681   : > { %2700 = vmatpush3.bf16.msra.mxu0 %v2946_v0  ;;  %p3185_p0 = pneg %p3184_p5 }
 0x682   : > { %2701 = vmatprep.subr.bf16.mxu0 %v2947_v1 }
 0x683   : > { %p3192_p4 = pnand %p3191_p3, %p3185_p0 }
 0x685   : > { %2702 = vmatpush3.bf16.msra.mxu0 %v2947_v1 }
 0x686   : > { %2703 = vmatprep.subr.bf16.mxu0 %v2948_v17 }
 0x689   : > { %2704 = vmatpush3.bf16.msra.mxu0 %v2948_v17 }
 0x68a   : > { %2705 = vmatprep.subr.bf16.mxu0 %v2949_v18 }
 0x68d   : > { %2706 = vmatpush3.bf16.msra.mxu0 %v2949_v18 }
 0x68e   : > { %2723 = vmatprep.subr.bf16.mxu0 %v2954_v38 }
 0x753   : > { %v2685_v3 = vpop.f32.mrb[16].mxu0 }
 0x754   : > { %v1789_v4 = vadd.f32 %v2685_v3, %v2472_v2  ;;  %v1780_v5 = vpop.f32.mrb[17].mxu0 }
 0x755   : > { %v1781_v6 = vadd.f32 %v2472_v2, %v1780_v5  ;;  %v2686_v7 = vpop.f32.mrb[18].mxu0 }
 0x756   : > { %v1792_v8 = vadd.f32 %v2686_v7, %v2472_v2  ;;  %v1783_v9 = vpop.f32.mrb[19].mxu0  ;;  %v1797_v11 = vmax.f32 %v1789_v4, 0.0 }
 0x757   : > { %v1784_v10 = vadd.f32 %v2472_v2, %v1783_v9  ;;  %v1795_v13 = vmax.f32 %v1781_v6, 0.0  ;;  %v2500_v9 = vld [vmem:[%s3955_s30] ss:$0 sm:$0xff] }
 0x758   : > { %v1798_v12 = vmax.f32 %v1792_v8, 0.0 }
 0x759   : > { %v1796_v14 = vmax.f32 %v1784_v10, 0.0 }
 0x75a   : > { %v1800_v15 = vpack.c.bf16 %v1798_v12, %v1797_v11 }
 0x75b   : > { %v1799_v16 = vpack.c.bf16 %v1796_v14, %v1795_v13 }
 0x75d   : > { %2695 = vmatprep.mubr.msk.bf16.mxu1 %vm1439_vm2, %v1799_v16 }
 0x75e   : > { %2696 = vmatmul.mubr.msk.bf16.vlgmr.msra.gmra.mrb[16].mxu1 %vm1439_vm2, %v1800_v15 }
 0x75f   : > { %2712 = vmatpush3.bf16.msra.mxu1 %v2950_v19 }
 0x760   : > { %2713 = vmatprep.subr.bf16.mxu1 %v2951_v20 }
 0x763   : > { %2714 = vmatpush3.bf16.msra.mxu1 %v2951_v20 }
 0x764   : > { %2715 = vmatprep.subr.bf16.mxu1 %v2952_v36 }
 0x767   : > { %2716 = vmatpush3.bf16.msra.mxu1 %v2952_v36 }
 0x768   : > { %2717 = vmatprep.subr.bf16.mxu1 %v2953_v37 }
 0x76b   : > { %2718 = vmatpush3.bf16.msra.mxu1 %v2953_v37 }
 0x831   : > { %v2697_v22 = vpop.f32.mrb[16].mxu1 }
 0x832   : > { %v1889_v23 = vadd.f32 %v2697_v22, %v2479_v21  ;;  %v1880_v24 = vpop.f32.mrb[17].mxu1 }
 0x833   : > { %v1881_v25 = vadd.f32 %v2479_v21, %v1880_v24  ;;  %v2698_v26 = vpop.f32.mrb[18].mxu1 }
 0x834   : > { %v1892_v27 = vadd.f32 %v2698_v26, %v2479_v21  ;;  %v1883_v28 = vpop.f32.mrb[19].mxu1  ;;  %v1897_v30 = vmax.f32 %v1889_v23, 0.0 }
 0x835   : > { %v1884_v29 = vadd.f32 %v2479_v21, %v1883_v28  ;;  %v1895_v32 = vmax.f32 %v1881_v25, 0.0 }
 0x836   : > { %v1898_v31 = vmax.f32 %v1892_v27, 0.0 }
 0x837   : > { %v1896_v33 = vmax.f32 %v1884_v29, 0.0 }
 0x838   : > { %v1900_v34 = vpack.c.bf16 %v1898_v31, %v1897_v30 }
 0x839   : > { %v1899_v35 = vpack.c.bf16 %v1896_v33, %v1895_v32 }
 0x83b   : > { %2707 = vmatprep.mubr.msk.bf16.mxu0 %vm1439_vm2, %v1899_v35 }
 0x83c   : > { %2708 = vmatmul.mubr.msk.bf16.vlgmr.msra.gmra.mrb[20].mxu0 %vm1439_vm2, %v1900_v34 }
 0x83d   : > { %2724 = vmatpush3.bf16.msra.mxu0 %v2954_v38 }
 0x83e   : > { %2725 = vmatprep.subr.bf16.mxu0 %v2955_v39 }
 0x841   : > { %2726 = vmatpush3.bf16.msra.mxu0 %v2955_v39 }
 0x842   : > { %2727 = vmatprep.subr.bf16.mxu0 %v2956_v55 }
 0x845   : > { %2728 = vmatpush3.bf16.msra.mxu0 %v2956_v55 }
 0x846   : > { %2729 = vmatprep.subr.bf16.mxu0 %v2957_v56 }
 0x849   : > { %2730 = vmatpush3.bf16.msra.mxu0 %v2957_v56 }
 0x90f   : > { %v2709_v41 = vpop.f32.mrb[20].mxu0 }
 0x910   : > { %v1989_v42 = vadd.f32 %v2709_v41, %v2486_v40  ;;  %v1980_v43 = vpop.f32.mrb[21].mxu0 }
 0x911   : > { %v1981_v44 = vadd.f32 %v2486_v40, %v1980_v43  ;;  %v2710_v45 = vpop.f32.mrb[22].mxu0 }
 0x912   : > { %v1992_v46 = vadd.f32 %v2710_v45, %v2486_v40  ;;  %v1983_v47 = vpop.f32.mrb[23].mxu0  ;;  %v1997_v49 = vmax.f32 %v1989_v42, 0.0 }
 0x913   : > { %v1984_v48 = vadd.f32 %v2486_v40, %v1983_v47  ;;  %v1995_v51 = vmax.f32 %v1981_v44, 0.0 }
 0x914   : > { %v1998_v50 = vmax.f32 %v1992_v46, 0.0 }
 0x915   : > { %v1996_v52 = vmax.f32 %v1984_v48, 0.0 }
 0x916   : > { %v2000_v53 = vpack.c.bf16 %v1998_v50, %v1997_v49 }
 0x917   : > { %v1999_v54 = vpack.c.bf16 %v1996_v52, %v1995_v51 }
 0x919   : > { %2719 = vmatprep.mubr.msk.bf16.mxu1 %vm1439_vm2, %v1999_v54 }
 0x91a   : > { %2720 = vmatmul.mubr.msk.bf16.vlgmr.msra.gmra.mrb[20].mxu1 %vm1439_vm2, %v2000_v53 }
 0x9ed   : > { %v2721_v58 = vpop.f32.mrb[20].mxu1 }
 0x9ee   : > { %v2089_v59 = vadd.f32 %v2721_v58, %v2493_v57  ;;  %v2080_v60 = vpop.f32.mrb[21].mxu1 }
 0x9ef   : > { %v2081_v61 = vadd.f32 %v2493_v57, %v2080_v60  ;;  %v2722_v62 = vpop.f32.mrb[22].mxu1 }
 0x9f0   : > { %v2092_v63 = vadd.f32 %v2722_v62, %v2493_v57  ;;  %v2083_v0 = vpop.f32.mrb[23].mxu1  ;;  %v2097_v2 = vmax.f32 %v2089_v59, 0.0 }
 0x9f1   : > { %v2084_v1 = vadd.f32 %v2493_v57, %v2083_v0  ;;  %v2095_v4 = vmax.f32 %v2081_v61, 0.0 }
 0x9f2   : > { %v2098_v3 = vmax.f32 %v2092_v63, 0.0 }
 0x9f3   : > { %v2096_v5 = vmax.f32 %v2084_v1, 0.0 }
 0x9f4   : > { %v2100_v6 = vpack.c.bf16 %v2098_v3, %v2097_v2 }
 0x9f5   : > { %v2099_v7 = vpack.c.bf16 %v2096_v5, %v2095_v4 }
 0x9f7   : > { %2731 = vmatprep.mubr.msk.bf16.mxu0 %vm1439_vm2, %v2099_v7 }
 0x9f8   : > { %2732 = vmatmul.mubr.msk.bf16.vlgmr.msra.gmra.mrb[24].mxu0 %vm1439_vm2, %v2100_v6 }
 0xacb   : > { %v2733_v8 = vpop.f32.mrb[24].mxu0 }
 0xacc   : > { %v2180_v10 = vpop.f32.mrb[25].mxu0  ;;  %v2189_v12 = vadd.f32 %v2733_v8, %v2500_v9 }
 0xacd   : > { %v2734_v11 = vpop.f32.mrb[26].mxu0  ;;  %v2181_v15 = vadd.f32 %v2500_v9, %v2180_v10 }
 0xace   : > { %v2192_v13 = vadd.f32 %v2734_v11, %v2500_v9  ;;  %v2183_v14 = vpop.f32.mrb[27].mxu0 }
 0xacf   : > { %v2184_v16 = vadd.f32 %v2500_v9, %v2183_v14 }
 0xad0   : > { %v2530_v17 = vpack.c.bf16 %v2192_v13, %v2189_v12 }
 0xad1   : > { %v2525_v18 = vpack.c.bf16 %v2184_v16, %v2181_v15 }
 0xad2   : > { %2532 = vst [vmem:[%s823_s0 + $0x8] sm:$0xff] %v2530_v17  }
 0xad3   : > { %2526 = vst [vmem:[%s823_s0] sm:$0xff] %v2525_v18  }
 0xad4   : > { %3195 = shalt.err (!%p3192_p4)
}
 0xad5   : > { %s3196_s1 = scalar_lea.hbm %s3804_s4, 256  ;;  %s3200_s0 = scalar_lea.hbm %s3957_s19, 512 }
 0xad6   : > { %p3197_p12 = scmp.ne.s32.totalorder %s3804_s4, %s3196_s1  ;;  %p3201_p11 = scmp.lt.u32.totalorder %s3804_s4, %s3957_s19 }
 0xad7   : > { %p3202_p13 = scmp.lt.u32.totalorder %s3200_s0, %s3196_s1  ;;  %p3204_p6 = scmp.lt.u32.totalorder %s3196_s1, %s3804_s4 }
 0xad8   : > { %p3198_p7 = pnand %p3197_p12, %p3958_p9 }
 0xad9   : > { %p3203_p1 = por %p3202_p13, %p3201_p11 }
 0xada   : > { %p3199_p8 = pneg %p3198_p7 }
 0xadb   : > { %p3205_p5 = por %p3204_p6, %p3203_p1 }
 0xadd   : > { %p3206_p0 = pnand %p3205_p5, %p3199_p8 }
 0xadf   : > { %3209 = shalt.err (!%p3206_p0)
}
 0xae0   : > { %s3279_s20 = smov 64   ;;  %s3280_s7 = smov 4  }
 0xae1   : > { %2767 = dma.vmem_to_hbm [thread:$0]  (%p3958_p9), %s3799_s24, 256, %s3804_s4, %s3806_s5, %s3279_s20, %s3279_s20, %s3280_s7  }
 0xae2 PF: > { %s3959_s29 = sld [smem:[#allocation26_spill]]  ;;  %s3960_s8 = sld [smem:[#allocation23_spill]] }
 0xae3   : > { %s3961_s22 = sld [smem:[#allocation30_spill]] }
 0xae8   : > { %p2814_p10 = scmp.ge.s32.totalorder %s3959_s29, 2  ;;  %s2244_s23 = sand.u32 1, %s3960_s8  }
 0xae9   : > { %p3962_p2 = scmp.ne.s32.totalorder %s3961_s22, 0  ;;  %s2245_s1 = scalar_lea.sflag [#allocation4], %s2244_s23 }
 0xaeb   : > { %p2795_p3 = pnand %p2814_p10, %p3962_p2 }
 0xaed   : > { %3247 = dma.done.wait (!%p2795_p3), %s2245_s1, 256  }
 0xaee   : > { %3249 = vsyncadd (!%p2795_p3), %s2245_s1, 4294967040  ;;  %s3963_s30 = sld [smem:[#allocation27_spill]]  ;;  %s3964_s4 = sld [smem:[#allocation24_spill]] }
 0xaef   : > { %s3965_s0 = sld [smem:[#allocation25_spill]]  ;;  %s3966_s24 = sld [smem:[#allocation28_spill]] }
 0xaf4   : > { %s3967_s26 = smov %s3963_s30  ;;  %p38_p4 = scmp.ge.s32.totalorder %s3963_s30, 4  }
 0xaf5   : > { %s3968_s30 = smov %s3965_s0  ;;  %3969 = sst [smem:[#allocation23_spill]] %s3967_s26 }
 0xaf6   :  { %40 = sbr.rel (!%p38_p4) target bundleno = 24 (0x18), region = 180 }
 0xafd   :  { %2250 = vsyncpa [#allocation3], 1 }
 0xafe   :  { %2252 = vsyncpa [#allocation3 + $0x1], 1 }
 0xaff   :  { %2253 = vsyncpa [#allocation6], 1 }
 0xb00   :  { %2254 = vsyncpa [#allocation9], 1 }
 0xb01   :  { %2255 = vsyncpa [#allocation12], 1 }
 0xb02   :  { %2256 = vsyncpa [#allocation15], 1 }
 0xb03   :  { %2257 = vsyncpa [#allocation4], 1 }
 0xb04   :  { %2259 = vsyncpa [#allocation4 + $0x1], 1 }

</bundles_post_ra>
